<compile_context>
chip_gen: v5e
topology: v5e:2x2
jax: 0.10.0
libtpu: 0.0.40
codegen_flags: <defaults>
</compile_context>

<pallas_src>
import functools

import jax
import jax.numpy as jnp
from jax import lax
from jax.experimental import pallas as pl
from jax.experimental.pallas import tpu as pltpu

# Problem constants (fixed by the module / demo shapes).
H = W = 16
HP = H + 2                # conv1 is evaluated on the SAME-padding grid (18)
WP = W + 2                # 18
WQ = 24                   # WP padded to a multiple of 8 -> free reshapes
P = HP * WQ               # rows per sample in the flattened padded grid (432)
CIN, CIN_P = 3, 8         # input channels, padded for lane-friendlier loads
C1 = 16                   # hidden channels
COUT, COUT_P = 10, 128    # conv3 channels, padded to a full lane tile
K1 = 9 * CIN_P            # conv1 im2col depth (72)
GUARD = 32                # scratch guard rows (> WQ + 1), multiple of 8


def _cnn_forward_kernel(p1_ref, w1_ref, b1_ref, w2_ref, b2_ref, w3_ref,
                        b3_ref, o_ref, act_ref, *, nb):
    """Forward pass for a block of `nb` samples.

    p1_ref : (nb*P, 72)    conv1 im2col patches on the padded 18x24 grid
    w1_ref : (72, 16)      conv1 weights (BN1 folded), row = (3*ky+kx)*8 + ci
    b1_ref : (1, 16)
    w2_ref : (9, 16, 16)   conv2 per-tap weights (BN2 folded), tap t = 3*ky+kx
    b2_ref : (1, 16)
    w3_ref : (16, 128)     1x1 conv3, out channels zero padded 10 -> 128
    b3_ref : (1, 128)
    o_ref  : (nb*P, 128)   lane-dense output slab on the padded grid
    act_ref: (2*GUARD + nb*P, 16) VMEM scratch for conv1 activations
    """
    m = nb * P

    # ---- conv1 + bn1 + relu: one matmul over precomputed patches ----------
    a1 = jnp.dot(p1_ref[...], w1_ref[...], preferred_element_type=jnp.float32)
    a1 = jnp.maximum(a1 + b1_ref[...], 0.0)

    # Zero the SAME-padding halo (ring rows/cols and the x-pad columns) so
    # conv2's border taps read genuine zeros.  Pure iota compares, no HBM mask.
    yi = lax.broadcasted_iota(jnp.int32, (nb, HP, WQ, C1), 1)
    xi = lax.broadcasted_iota(jnp.int32, (nb, HP, WQ, C1), 2)
    keep = (yi >= 1) & (yi <= H) & (xi >= 1) & (xi <= W)
    a1 = a1 * keep.astype(jnp.float32).reshape(m, C1)

    # ---- stage act1 in a guard-padded scratch ------------------------------
    act_ref[pl.ds(0, GUARD), :] = jnp.zeros((GUARD, C1), jnp.float32)
    act_ref[pl.ds(GUARD + m, GUARD), :] = jnp.zeros((GUARD, C1), jnp.float32)
    act_ref[pl.ds(GUARD, m), :] = a1

    # ---- conv2 + bn2 + relu: nine row-shifted taps, one small matmul each --
    # Tap (ky,kx) of the SAME 3x3 conv is act1 shifted by (ky-1)*WQ + (kx-1)
    # rows in the flattened padded grid; halo zeros give correct borders.
    acc = jnp.zeros((m, C1), jnp.float32)
    for t in range(9):
        ky, kx = t // 3, t % 3
        off = (ky - 1) * WQ + (kx - 1)
        tap = act_ref[pl.ds(GUARD + off, m), :]
        acc = acc + jnp.dot(tap, w2_ref[t], preferred_element_type=jnp.float32)
    a2 = jnp.maximum(acc + b2_ref[...], 0.0)

    # ---- conv3 (1x1): plain matmul, lane-dense 128-wide store --------------
    o_ref[...] = (jnp.dot(a2, w3_ref[...], preferred_element_type=jnp.float32)
                  + b3_ref[...])


def _build_conv1_patches(x_nhwc):
    """im2col patches for conv1 evaluated on the padded HP x WQ grid (XLA)."""
    n = x_nhwc.shape[0]
    xp = jnp.pad(x_nhwc, ((0, 0), (2, 2), (2, 2), (0, CIN_P - CIN)))
    taps = [xp[:, ky:ky + HP, kx:kx + WP, :]
            for ky in range(3) for kx in range(3)]
    p1 = jnp.concatenate(taps, axis=-1)                       # (n, HP, WP, 72)
    p1 = jnp.pad(p1, ((0, 0), (0, 0), (0, WQ - WP), (0, 0)))  # pad x to WQ
    return p1.reshape(n * P, K1)


def _pick_block_n(n, max_block=8):
    """Largest divisor of n (<= max_block) that keeps the grid length >= 2
    (v7x has two TensorCores); falls back to 1 sample per step."""
    best = 1
    for bn in range(1, min(n, max_block) + 1):
        if n % bn == 0 and n // bn >= 2:
            best = bn
    return best if n >= 2 else n


@functools.partial(jax.jit, static_argnames=("block_n",))
def cnn_forward(x_nhwc, params, *, block_n=None):
    """Fused conv-bn-relu x2 + 1x1 conv.  Returns (N, H, W, COUT) NHWC."""
    n = x_nhwc.shape[0]
    if block_n is None:
        block_n = _pick_block_n(n)
    assert n % block_n == 0, "batch must be divisible by block_n"
    w1, b1, w2, b2, w3, b3 = params

    p1 = _build_conv1_patches(x_nhwc)                          # (n*P, 72)
    m_blk = block_n * P

    flops = 2 * n * P * (K1 * C1 + 9 * C1 * C1 + C1 * COUT_P)
    bytes_accessed = 4 * (n * P * K1 + n * P * COUT_P
                          + sum(a.size for a in params))

    out2d = pl.pallas_call(
        functools.partial(_cnn_forward_kernel, nb=block_n),
        grid=(n // block_n,),
        in_specs=[
            pl.BlockSpec((m_blk, K1), lambda i: (i, 0)),
            pl.BlockSpec((K1, C1), lambda i: (0, 0)),
            pl.BlockSpec((1, C1), lambda i: (0, 0)),
            pl.BlockSpec((9, C1, C1), lambda i: (0, 0, 0)),
            pl.BlockSpec((1, C1), lambda i: (0, 0)),
            pl.BlockSpec((C1, COUT_P), lambda i: (0, 0)),
            pl.BlockSpec((1, COUT_P), lambda i: (0, 0)),
        ],
        out_specs=pl.BlockSpec((m_blk, COUT_P), lambda i: (i, 0)),
        out_shape=jax.ShapeDtypeStruct((n * P, COUT_P), jnp.float32),
        scratch_shapes=[pltpu.VMEM((2 * GUARD + m_blk, C1), jnp.float32)],
        compiler_params=pltpu.CompilerParams(
            dimension_semantics=("parallel",),
            vmem_limit_bytes=48 * 1024 * 1024),
        cost_estimate=pl.CostEstimate(
            flops=flops, transcendentals=0, bytes_accessed=bytes_accessed),
    )(p1, w1, b1, w2, b2, w3, b3)

    out = out2d.reshape(n, HP, WQ, COUT_P)
    return out[:, 1:1 + H, 1:1 + W, :COUT]


def init_params(key):
    """Deterministic synthetic parameters with BN folded in (eval mode)."""
    eps = 1e-5
    keys = jax.random.split(key, 14)

    w1 = 0.1 * jax.random.normal(keys[0], (3, 3, CIN, C1), jnp.float32)
    b1 = 0.05 * jax.random.normal(keys[1], (C1,), jnp.float32)
    w2 = 0.1 * jax.random.normal(keys[2], (3, 3, C1, C1), jnp.float32)
    b2 = 0.05 * jax.random.normal(keys[3], (C1,), jnp.float32)
    w3 = 0.1 * jax.random.normal(keys[4], (1, 1, C1, COUT), jnp.float32)
    b3 = 0.05 * jax.random.normal(keys[5], (COUT,), jnp.float32)

    def bn(kg, kb, km, kv, c):
        gamma = 1.0 + 0.1 * jax.random.normal(kg, (c,), jnp.float32)
        beta = 0.1 * jax.random.normal(kb, (c,), jnp.float32)
        mean = 0.05 * jax.random.normal(km, (c,), jnp.float32)
        var = 1.0 + 0.1 * jnp.abs(jax.random.normal(kv, (c,), jnp.float32))
        return gamma, beta, mean, var

    g1, be1, m1, v1 = bn(keys[6], keys[7], keys[8], keys[9], C1)
    g2, be2, m2, v2 = bn(keys[10], keys[11], keys[12], keys[13], C1)

    def fold(w, b, gamma, beta, mean, var):
        s = gamma / jnp.sqrt(var + eps)
        return w * s, (b - mean) * s + beta

    w1f, b1f = fold(w1, b1, g1, be1, m1, v1)      # (3,3,3,16), (16,)
    w2f, b2f = fold(w2, b2, g2, be2, m2, v2)      # (3,3,16,16), (16,)
    return (w1f, b1f, w2f, b2f, w3, b3)           # plain folded HWIO weights


def pack_params(plain):
    """Pack the folded HWIO weights into the kernel's layouts."""
    w1f, b1f, w2f, b2f, w3, b3 = plain
    w1k = jnp.pad(w1f, ((0, 0), (0, 0), (0, CIN_P - CIN), (0, 0)))
    w1k = w1k.reshape(K1, C1)                      # row = (3*ky+kx)*8 + ci
    w2k = w2f.reshape(9, C1, C1)                   # tap t = 3*ky+kx
    w3k = jnp.pad(w3.reshape(C1, COUT), ((0, 0), (0, COUT_P - COUT)))
    b3k = jnp.pad(b3, (0, COUT_P - COUT)).reshape(1, COUT_P)
    return (w1k, b1f.reshape(1, C1), w2k, b2f.reshape(1, C1), w3k, b3k)


def reference_forward(x_nhwc, plain):
    """Pure-JAX reference (same folded params) for correctness check."""
    w1f, b1f, w2f, b2f, w3, b3 = plain
    dn = ("NHWC", "HWIO", "NHWC")
    y = lax.conv_general_dilated(x_nhwc, w1f, (1, 1), "SAME",
                                 dimension_numbers=dn) + b1f
    y = jnp.maximum(y, 0.0)
    y = lax.conv_general_dilated(y, w2f, (1, 1), "SAME",
                                 dimension_numbers=dn) + b2f
    y = jnp.maximum(y, 0.0)
    y = lax.conv_general_dilated(y, w3, (1, 1), "SAME",
                                 dimension_numbers=dn) + b3
    return y


if __name__ == "__main__":
    key = jax.random.PRNGKey(0)
    kx, kp = jax.random.split(key)

    n = 2
    # PyTorch-style NCHW input, transposed to NHWC for the kernel.
    x_nchw = jax.random.normal(kx, (n, CIN, H, W), jnp.float32)
    x_nhwc = jnp.transpose(x_nchw, (0, 2, 3, 1))

    plain = init_params(kp)
    params = pack_params(plain)

    out_nhwc = cnn_forward(x_nhwc, params)            # grid=(2,), parallel
    out_nchw = jnp.transpose(out_nhwc, (0, 3, 1, 2))  # back to NCHW
    jax.block_until_ready(out_nchw)

    assert out_nchw.shape == (n, COUT, H, W), out_nchw.shape

    ref_nchw = jnp.transpose(reference_forward(x_nhwc, plain), (0, 3, 1, 2))
    if not bool(jnp.allclose(out_nchw, ref_nchw, rtol=1e-4, atol=1e-4)):
        max_err = float(jnp.max(jnp.abs(out_nchw - ref_nchw)))
        raise RuntimeError(f"kernel output mismatch, max abs err = {max_err}")

    print("KERNEL_OK")
</pallas_src>

<mosaic_0001>
module attributes {stable_mosaic.version = 11 : i64} {
  func.func @_cnn_forward_kernel(%arg0: i32, %arg1: memref<432x72xf32, #tpu.memory_space<vmem>>, %arg2: memref<72x16xf32, #tpu.memory_space<vmem>>, %arg3: memref<1x16xf32, #tpu.memory_space<vmem>>, %arg4: memref<9x16x16xf32, #tpu.memory_space<vmem>>, %arg5: memref<1x16xf32, #tpu.memory_space<vmem>>, %arg6: memref<16x128xf32, #tpu.memory_space<vmem>>, %arg7: memref<1x128xf32, #tpu.memory_space<vmem>>, %arg8: memref<432x128xf32, #tpu.memory_space<vmem>>, %arg9: memref<496x16xf32, #tpu.memory_space<vmem>>) attributes {dimension_semantics = [#tpu.dimension_semantics<parallel>], iteration_bounds = array<i64: 2>, scalar_prefetch = 0 : i64, scratch_operands = 1 : i64, tpu.core_type = #tpu.core_type<tc>, window_params = [{transform_indices = @transform_0, window_bounds = array<i64: 432, 72>}, {pipeline_mode = #tpu.pipeline_mode<synchronous>, transform_indices = @transform_1, window_bounds = array<i64: 72, 16>}, {pipeline_mode = #tpu.pipeline_mode<synchronous>, transform_indices = @transform_2, window_bounds = array<i64: 1, 16>}, {pipeline_mode = #tpu.pipeline_mode<synchronous>, transform_indices = @transform_3, window_bounds = array<i64: 9, 16, 16>}, {pipeline_mode = #tpu.pipeline_mode<synchronous>, transform_indices = @transform_4, window_bounds = array<i64: 1, 16>}, {pipeline_mode = #tpu.pipeline_mode<synchronous>, transform_indices = @transform_5, window_bounds = array<i64: 16, 128>}, {pipeline_mode = #tpu.pipeline_mode<synchronous>, transform_indices = @transform_6, window_bounds = array<i64: 1, 128>}, {transform_indices = @transform_7, window_bounds = array<i64: 432, 128>}]} {
    %c0 = arith.constant 0 : index
    %c0_0 = arith.constant 0 : index
    %0 = vector.load %arg1[%c0, %c0_0] : memref<432x72xf32, #tpu.memory_space<vmem>>, vector<432x72xf32>
    %c0_1 = arith.constant 0 : index
    %c0_2 = arith.constant 0 : index
    %1 = vector.load %arg2[%c0_1, %c0_2] : memref<72x16xf32, #tpu.memory_space<vmem>>, vector<72x16xf32>
    %cst = arith.constant dense<0.000000e+00> : vector<432x16xf32>
    %2 = tpu.matmul %0, %1, %cst {dimension_numbers = #tpu.dot_dimension_numbers<[1], [0], [0], [1], [0, 0, 1, 1], [], []>} : vector<432x72xf32>, vector<72x16xf32>, vector<432x16xf32> -> vector<432x16xf32>
    %c0_3 = arith.constant 0 : index
    %c0_4 = arith.constant 0 : index
    %3 = vector.load %arg3[%c0_3, %c0_4] : memref<1x16xf32, #tpu.memory_space<vmem>>, vector<1x16xf32>
    %4 = vector.broadcast %3 : vector<1x16xf32> to vector<432x16xf32>
    %5 = arith.addf %2, %4 : vector<432x16xf32>
    %cst_5 = arith.constant 0.000000e+00 : f32
    %6 = vector.broadcast %cst_5 : f32 to vector<432x16xf32>
    %7 = arith.maximumf %5, %6 : vector<432x16xf32>
    %8 = tpu.iota {dimensions = array<i32: 1>} : vector<1x18x24x16xi32>
    %9 = tpu.iota {dimensions = array<i32: 2>} : vector<1x18x24x16xi32>
    %c1_i32 = arith.constant 1 : i32
    %10 = vector.broadcast %c1_i32 : i32 to vector<1x18x24x16xi32>
    %11 = arith.cmpi sge, %8, %10 : vector<1x18x24x16xi32>
    %c16_i32 = arith.constant 16 : i32
    %12 = vector.broadcast %c16_i32 : i32 to vector<1x18x24x16xi32>
    %13 = arith.cmpi sle, %8, %12 : vector<1x18x24x16xi32>
    %14 = arith.andi %11, %13 : vector<1x18x24x16xi1>
    %c1_i32_6 = arith.constant 1 : i32
    %15 = vector.broadcast %c1_i32_6 : i32 to vector<1x18x24x16xi32>
    %16 = arith.cmpi sge, %9, %15 : vector<1x18x24x16xi32>
    %17 = arith.andi %14, %16 : vector<1x18x24x16xi1>
    %c16_i32_7 = arith.constant 16 : i32
    %18 = vector.broadcast %c16_i32_7 : i32 to vector<1x18x24x16xi32>
    %19 = arith.cmpi sle, %9, %18 : vector<1x18x24x16xi32>
    %20 = arith.andi %17, %19 : vector<1x18x24x16xi1>
    %21 = arith.extui %20 : vector<1x18x24x16xi1> to vector<1x18x24x16xi32>
    %22 = arith.sitofp %21 : vector<1x18x24x16xi32> to vector<1x18x24x16xf32>
    %23 = vector.shape_cast %22 : vector<1x18x24x16xf32> to vector<432x16xf32>
    %24 = arith.mulf %7, %23 : vector<432x16xf32>
    %cst_8 = arith.constant 0.000000e+00 : f32
    %25 = vector.broadcast %cst_8 : f32 to vector<32x16xf32>
    %c0_9 = arith.constant 0 : index
    %c0_10 = arith.constant 0 : index
    %26 = vector.load %arg9[%c0_9, %c0_10] : memref<496x16xf32, #tpu.memory_space<vmem>>, vector<32x16xf32>
    tpu.vector_store %arg9[%c0_9, %c0_10], %25 {strides = array<i32>} : memref<496x16xf32, #tpu.memory_space<vmem>>, vector<32x16xf32>,
    %cst_11 = arith.constant 0.000000e+00 : f32
    %27 = vector.broadcast %cst_11 : f32 to vector<32x16xf32>
    %c464 = arith.constant 464 : index
    %c0_12 = arith.constant 0 : index
    %28 = vector.load %arg9[%c464, %c0_12] : memref<496x16xf32, #tpu.memory_space<vmem>>, vector<32x16xf32>
    tpu.vector_store %arg9[%c464, %c0_12], %27 {strides = array<i32>} : memref<496x16xf32, #tpu.memory_space<vmem>>, vector<32x16xf32>,
    %c32 = arith.constant 32 : index
    %c0_13 = arith.constant 0 : index
    %29 = vector.load %arg9[%c32, %c0_13] : memref<496x16xf32, #tpu.memory_space<vmem>>, vector<432x16xf32>
    tpu.vector_store %arg9[%c32, %c0_13], %24 {strides = array<i32>} : memref<496x16xf32, #tpu.memory_space<vmem>>, vector<432x16xf32>,
    %cst_14 = arith.constant 0.000000e+00 : f32
    %30 = vector.broadcast %cst_14 : f32 to vector<432x16xf32>
    %c7 = arith.constant 7 : index
    %c0_15 = arith.constant 0 : index
    %31 = vector.load %arg9[%c7, %c0_15] : memref<496x16xf32, #tpu.memory_space<vmem>>, vector<432x16xf32>
    %c0_16 = arith.constant 0 : index
    %c0_17 = arith.constant 0 : index
    %c0_18 = arith.constant 0 : index
    %32 = vector.load %arg4[%c0_16, %c0_17, %c0_18] : memref<9x16x16xf32, #tpu.memory_space<vmem>>, vector<1x16x16xf32>
    %33 = vector.shape_cast %32 : vector<1x16x16xf32> to vector<16x16xf32>
    %cst_19 = arith.constant dense<0.000000e+00> : vector<432x16xf32>
    %34 = tpu.matmul %31, %33, %cst_19 {dimension_numbers = #tpu.dot_dimension_numbers<[1], [0], [0], [1], [0, 0, 1, 1], [], []>} : vector<432x16xf32>, vector<16x16xf32>, vector<432x16xf32> -> vector<432x16xf32>
    %35 = arith.addf %30, %34 : vector<432x16xf32>
    %c8 = arith.constant 8 : index
    %c0_20 = arith.constant 0 : index
    %36 = vector.load %arg9[%c8, %c0_20] : memref<496x16xf32, #tpu.memory_space<vmem>>, vector<432x16xf32>
    %c1 = arith.constant 1 : index
    %c0_21 = arith.constant 0 : index
    %c0_22 = arith.constant 0 : index
    %37 = vector.load %arg4[%c1, %c0_21, %c0_22] : memref<9x16x16xf32, #tpu.memory_space<vmem>>, vector<1x16x16xf32>
    %38 = vector.shape_cast %37 : vector<1x16x16xf32> to vector<16x16xf32>
    %cst_23 = arith.constant dense<0.000000e+00> : vector<432x16xf32>
    %39 = tpu.matmul %36, %38, %cst_23 {dimension_numbers = #tpu.dot_dimension_numbers<[1], [0], [0], [1], [0, 0, 1, 1], [], []>} : vector<432x16xf32>, vector<16x16xf32>, vector<432x16xf32> -> vector<432x16xf32>
    %40 = arith.addf %35, %39 : vector<432x16xf32>
    %c9 = arith.constant 9 : index
    %c0_24 = arith.constant 0 : index
    %41 = vector.load %arg9[%c9, %c0_24] : memref<496x16xf32, #tpu.memory_space<vmem>>, vector<432x16xf32>
    %c2 = arith.constant 2 : index
    %c0_25 = arith.constant 0 : index
    %c0_26 = arith.constant 0 : index
    %42 = vector.load %arg4[%c2, %c0_25, %c0_26] : memref<9x16x16xf32, #tpu.memory_space<vmem>>, vector<1x16x16xf32>
    %43 = vector.shape_cast %42 : vector<1x16x16xf32> to vector<16x16xf32>
    %cst_27 = arith.constant dense<0.000000e+00> : vector<432x16xf32>
    %44 = tpu.matmul %41, %43, %cst_27 {dimension_numbers = #tpu.dot_dimension_numbers<[1], [0], [0], [1], [0, 0, 1, 1], [], []>} : vector<432x16xf32>, vector<16x16xf32>, vector<432x16xf32> -> vector<432x16xf32>
    %45 = arith.addf %40, %44 : vector<432x16xf32>
    %c31 = arith.constant 31 : index
    %c0_28 = arith.constant 0 : index
    %46 = vector.load %arg9[%c31, %c0_28] : memref<496x16xf32, #tpu.memory_space<vmem>>, vector<432x16xf32>
    %c3 = arith.constant 3 : index
    %c0_29 = arith.constant 0 : index
    %c0_30 = arith.constant 0 : index
    %47 = vector.load %arg4[%c3, %c0_29, %c0_30] : memref<9x16x16xf32, #tpu.memory_space<vmem>>, vector<1x16x16xf32>
    %48 = vector.shape_cast %47 : vector<1x16x16xf32> to vector<16x16xf32>
    %cst_31 = arith.constant dense<0.000000e+00> : vector<432x16xf32>
    %49 = tpu.matmul %46, %48, %cst_31 {dimension_numbers = #tpu.dot_dimension_numbers<[1], [0], [0], [1], [0, 0, 1, 1], [], []>} : vector<432x16xf32>, vector<16x16xf32>, vector<432x16xf32> -> vector<432x16xf32>
    %50 = arith.addf %45, %49 : vector<432x16xf32>
    %c32_32 = arith.constant 32 : index
    %c0_33 = arith.constant 0 : index
    %51 = vector.load %arg9[%c32_32, %c0_33] : memref<496x16xf32, #tpu.memory_space<vmem>>, vector<432x16xf32>
    %c4 = arith.constant 4 : index
    %c0_34 = arith.constant 0 : index
    %c0_35 = arith.constant 0 : index
    %52 = vector.load %arg4[%c4, %c0_34, %c0_35] : memref<9x16x16xf32, #tpu.memory_space<vmem>>, vector<1x16x16xf32>
    %53 = vector.shape_cast %52 : vector<1x16x16xf32> to vector<16x16xf32>
    %cst_36 = arith.constant dense<0.000000e+00> : vector<432x16xf32>
    %54 = tpu.matmul %51, %53, %cst_36 {dimension_numbers = #tpu.dot_dimension_numbers<[1], [0], [0], [1], [0, 0, 1, 1], [], []>} : vector<432x16xf32>, vector<16x16xf32>, vector<432x16xf32> -> vector<432x16xf32>
    %55 = arith.addf %50, %54 : vector<432x16xf32>
    %c33 = arith.constant 33 : index
    %c0_37 = arith.constant 0 : index
    %56 = vector.load %arg9[%c33, %c0_37] : memref<496x16xf32, #tpu.memory_space<vmem>>, vector<432x16xf32>
    %c5 = arith.constant 5 : index
    %c0_38 = arith.constant 0 : index
    %c0_39 = arith.constant 0 : index
    %57 = vector.load %arg4[%c5, %c0_38, %c0_39] : memref<9x16x16xf32, #tpu.memory_space<vmem>>, vector<1x16x16xf32>
    %58 = vector.shape_cast %57 : vector<1x16x16xf32> to vector<16x16xf32>
    %cst_40 = arith.constant dense<0.000000e+00> : vector<432x16xf32>
    %59 = tpu.matmul %56, %58, %cst_40 {dimension_numbers = #tpu.dot_dimension_numbers<[1], [0], [0], [1], [0, 0, 1, 1], [], []>} : vector<432x16xf32>, vector<16x16xf32>, vector<432x16xf32> -> vector<432x16xf32>
    %60 = arith.addf %55, %59 : vector<432x16xf32>
    %c55 = arith.constant 55 : index
    %c0_41 = arith.constant 0 : index
    %61 = vector.load %arg9[%c55, %c0_41] : memref<496x16xf32, #tpu.memory_space<vmem>>, vector<432x16xf32>
    %c6 = arith.constant 6 : index
    %c0_42 = arith.constant 0 : index
    %c0_43 = arith.constant 0 : index
    %62 = vector.load %arg4[%c6, %c0_42, %c0_43] : memref<9x16x16xf32, #tpu.memory_space<vmem>>, vector<1x16x16xf32>
    %63 = vector.shape_cast %62 : vector<1x16x16xf32> to vector<16x16xf32>
    %cst_44 = arith.constant dense<0.000000e+00> : vector<432x16xf32>
    %64 = tpu.matmul %61, %63, %cst_44 {dimension_numbers = #tpu.dot_dimension_numbers<[1], [0], [0], [1], [0, 0, 1, 1], [], []>} : vector<432x16xf32>, vector<16x16xf32>, vector<432x16xf32> -> vector<432x16xf32>
    %65 = arith.addf %60, %64 : vector<432x16xf32>
    %c56 = arith.constant 56 : index
    %c0_45 = arith.constant 0 : index
    %66 = vector.load %arg9[%c56, %c0_45] : memref<496x16xf32, #tpu.memory_space<vmem>>, vector<432x16xf32>
    %c7_46 = arith.constant 7 : index
    %c0_47 = arith.constant 0 : index
    %c0_48 = arith.constant 0 : index
    %67 = vector.load %arg4[%c7_46, %c0_47, %c0_48] : memref<9x16x16xf32, #tpu.memory_space<vmem>>, vector<1x16x16xf32>
    %68 = vector.shape_cast %67 : vector<1x16x16xf32> to vector<16x16xf32>
    %cst_49 = arith.constant dense<0.000000e+00> : vector<432x16xf32>
    %69 = tpu.matmul %66, %68, %cst_49 {dimension_numbers = #tpu.dot_dimension_numbers<[1], [0], [0], [1], [0, 0, 1, 1], [], []>} : vector<432x16xf32>, vector<16x16xf32>, vector<432x16xf32> -> vector<432x16xf32>
    %70 = arith.addf %65, %69 : vector<432x16xf32>
    %c57 = arith.constant 57 : index
    %c0_50 = arith.constant 0 : index
    %71 = vector.load %arg9[%c57, %c0_50] : memref<496x16xf32, #tpu.memory_space<vmem>>, vector<432x16xf32>
    %c8_51 = arith.constant 8 : index
    %c0_52 = arith.constant 0 : index
    %c0_53 = arith.constant 0 : index
    %72 = vector.load %arg4[%c8_51, %c0_52, %c0_53] : memref<9x16x16xf32, #tpu.memory_space<vmem>>, vector<1x16x16xf32>
    %73 = vector.shape_cast %72 : vector<1x16x16xf32> to vector<16x16xf32>
    %cst_54 = arith.constant dense<0.000000e+00> : vector<432x16xf32>
    %74 = tpu.matmul %71, %73, %cst_54 {dimension_numbers = #tpu.dot_dimension_numbers<[1], [0], [0], [1], [0, 0, 1, 1], [], []>} : vector<432x16xf32>, vector<16x16xf32>, vector<432x16xf32> -> vector<432x16xf32>
    %75 = arith.addf %70, %74 : vector<432x16xf32>
    %c0_55 = arith.constant 0 : index
    %c0_56 = arith.constant 0 : index
    %76 = vector.load %arg5[%c0_55, %c0_56] : memref<1x16xf32, #tpu.memory_space<vmem>>, vector<1x16xf32>
    %77 = vector.broadcast %76 : vector<1x16xf32> to vector<432x16xf32>
    %78 = arith.addf %75, %77 : vector<432x16xf32>
    %cst_57 = arith.constant 0.000000e+00 : f32
    %79 = vector.broadcast %cst_57 : f32 to vector<432x16xf32>
    %80 = arith.maximumf %78, %79 : vector<432x16xf32>
    %c0_58 = arith.constant 0 : index
    %c0_59 = arith.constant 0 : index
    %81 = vector.load %arg6[%c0_58, %c0_59] : memref<16x128xf32, #tpu.memory_space<vmem>>, vector<16x128xf32>
    %cst_60 = arith.constant dense<0.000000e+00> : vector<432x128xf32>
    %82 = tpu.matmul %80, %81, %cst_60 {dimension_numbers = #tpu.dot_dimension_numbers<[1], [0], [0], [1], [0, 0, 1, 1], [], []>} : vector<432x16xf32>, vector<16x128xf32>, vector<432x128xf32> -> vector<432x128xf32>
    %c0_61 = arith.constant 0 : index
    %c0_62 = arith.constant 0 : index
    %83 = vector.load %arg7[%c0_61, %c0_62] : memref<1x128xf32, #tpu.memory_space<vmem>>, vector<1x128xf32>
    %84 = vector.broadcast %83 : vector<1x128xf32> to vector<432x128xf32>
    %85 = arith.addf %82, %84 : vector<432x128xf32>
    %c0_63 = arith.constant 0 : index
    %c0_64 = arith.constant 0 : index
    %86 = vector.load %arg8[%c0_63, %c0_64] : memref<432x128xf32, #tpu.memory_space<vmem>>, vector<432x128xf32>
    tpu.vector_store %arg8[%c0_63, %c0_64], %85 {strides = array<i32>} : memref<432x128xf32, #tpu.memory_space<vmem>>, vector<432x128xf32>,
    return
  }
  func.func @transform_0(%arg0: i32) -> (i32, i32) {
    %c0_i32 = arith.constant 0 : i32
    %c0_i32_0 = arith.constant 0 : i32
    return %arg0, %c0_i32 : i32, i32
  }
  func.func @transform_1(%arg0: i32) -> (i32, i32) {
    %c0_i32 = arith.constant 0 : i32
    %c0_i32_0 = arith.constant 0 : i32
    %c0_i32_1 = arith.constant 0 : i32
    return %c0_i32, %c0_i32_0 : i32, i32
  }
  func.func @transform_2(%arg0: i32) -> (i32, i32) {
    %c0_i32 = arith.constant 0 : i32
    %c0_i32_0 = arith.constant 0 : i32
    %c0_i32_1 = arith.constant 0 : i32
    return %c0_i32, %c0_i32_0 : i32, i32
  }
  func.func @transform_3(%arg0: i32) -> (i32, i32, i32) {
    %c0_i32 = arith.constant 0 : i32
    %c0_i32_0 = arith.constant 0 : i32
    %c0_i32_1 = arith.constant 0 : i32
    %c0_i32_2 = arith.constant 0 : i32
    return %c0_i32, %c0_i32_0, %c0_i32_1 : i32, i32, i32
  }
  func.func @transform_4(%arg0: i32) -> (i32, i32) {
    %c0_i32 = arith.constant 0 : i32
    %c0_i32_0 = arith.constant 0 : i32
    %c0_i32_1 = arith.constant 0 : i32
    return %c0_i32, %c0_i32_0 : i32, i32
  }
  func.func @transform_5(%arg0: i32) -> (i32, i32) {
    %c0_i32 = arith.constant 0 : i32
    %c0_i32_0 = arith.constant 0 : i32
    %c0_i32_1 = arith.constant 0 : i32
    return %c0_i32, %c0_i32_0 : i32, i32
  }
  func.func @transform_6(%arg0: i32) -> (i32, i32) {
    %c0_i32 = arith.constant 0 : i32
    %c0_i32_0 = arith.constant 0 : i32
    %c0_i32_1 = arith.constant 0 : i32
    return %c0_i32, %c0_i32_0 : i32, i32
  }
  func.func @transform_7(%arg0: i32) -> (i32, i32) {
    %c0_i32 = arith.constant 0 : i32
    %c0_i32_0 = arith.constant 0 : i32
    return %arg0, %c0_i32 : i32, i32
  }
}

</mosaic_0001>

<bundles_post_ra>
// kernel: cnn_forward.1
= control target key start
LH: loop header
LB: loop body
LE: loop exit
PB: predicated region body
PF: predicated region fallthrough
CT: control target
= control target key end

     0   :  { %s6115_s24 = smov 0   ;;  %s8190_s0 = inlined_call_operand.vmem [shape: f32[864,72], index: 0, kind: input, shape index: {}]   ;;  %s8191_s1 = inlined_call_operand.vmem [shape: f32[72,16], index: 1, kind: input, shape index: {}]   ;;  %s8192_s2 = inlined_call_operand.vmem [shape: f32[1,16], index: 2, kind: input, shape index: {}]   ;;  %s8193_s3 = inlined_call_operand.vmem [shape: f32[9,16,16], index: 3, kind: input, shape index: {}]   ;;  %s8194_s4 = inlined_call_operand.vmem [shape: f32[1,16], index: 4, kind: input, shape index: {}]   ;;  %s8195_s5 = inlined_call_operand.vmem [shape: f32[16,128], index: 5, kind: input, shape index: {}]   ;;  %s8196_s6 = inlined_call_operand.vmem [shape: f32[1,128], index: 6, kind: input, shape index: {}]   ;;  %s8197_s7 = inlined_call_operand.vmem [shape: f32[864,128], index: 7, kind: output, shape index: {}]  }
   0x1 LB: > { %s5424_s25 = sadd.s32 4294967295, %s6072_s24   ;;  %p5428_p0 = scmp.ge.s32.totalorder %s6072_s24, 1  ;;  %s6072_s24 = sphi %s6115_s24, %s17_s24  }
   0x2   : > { %p238_p1 = scmp.lt.s32.totalorder %s6072_s24, 3 }
   0x4   : > { %p239_p2 = pnand %p5428_p0, %p238_p1 }
   0x6   : > { %242 = sbr.rel (%p239_p2) target bundleno = 1707 (0x6ab), region = 48 }
   0xb   : > { %v344_v0 = vld [vmem:[%s8191_s1 + $0x40] sm:$0xff]  ;;  %v343_v1 = vld [vmem:[%s8191_s1 + $0x38] sm:$0xff]  ;;  %s270_s30 = smul.u32 54, %s5424_s25  ;;  %v342_v2 = vld [vmem:[%s8191_s1 + $0x30] sm:$0xff]  ;;  %vm349_vm0 = vcmask 588800   ;;  %vm833_vm1 = vcmask 130048   ;;  %v745_v37 = vlaneseq }
   0xc   : > { %519 = vmatpush.msra.mxu0 %v344_v0  ;;  %v341_v3 = vld [vmem:[%s8191_s1 + $0x28] sm:$0xff]  ;;  %v340_v4 = vld [vmem:[%s8191_s1 + $0x20] sm:$0xff]  ;;  %v339_v5 = vld [vmem:[%s8191_s1 + $0x18] sm:$0xff]  ;;  %v6074_v22 = vmov 0.0  }
   0xd   : > { %p271_p3 = scmp.lt.s32.totalorder %s270_s30, 107  ;;  %v338_v6 = vld [vmem:[%s8191_s1 + $0x10] sm:$0xff]  ;;  %v337_v7 = vld [vmem:[%s8191_s1 + $0x8] sm:$0xff]  ;;  %v336_v8 = vld [vmem:[%s8191_s1] sm:$0xff]  ;;  %834 = vst.msk [vmem:[#allocation2] sm:$0xff] %vm833_vm1, %v6074_v22  ;;  %v746_v42 = vshrl.u32 %v745_v37, 7 }
   0xe   : > { %520 = vmatpush.msra.mxu0 %v343_v1  ;;  %835 = vst.msk [vmem:[#allocation2 + $0x8] sm:$0xff] %vm833_vm1, %v6074_v22  ;;  %v6203_v26 = vld [vmem:[%s8192_s2] ss:$0 sm:$0xff] }
   0xf   : > { %s8447_s30 = smov (!%p271_p3, %s270_s30), 107  ;;  %836 = vst.msk [vmem:[#allocation2 + $0x10] sm:$0xff] %vm833_vm1, %v6074_v22  ;;  %vm749_vm2 = vcmp.ge.s32.totalorder %v746_v42, 1  ;;  %v748_v54 = vadd.s32 16, %v746_v42 }
  0x10   : > { %521 = vmatpush.msra.mxu0 %v342_v2  ;;  %s5429_s16 = sshll.u32 %s8447_s30, 3  ;;  %837 = vst.msk [vmem:[#allocation2 + $0x18] sm:$0xff] %vm833_vm1, %v6074_v22  ;;  %v6219_v47 = vsel %vm749_vm2, 1.0, %v6074_v22 }
  0x11   : > { %s6155_s23 = scalar_lea.vmem %s8190_s0, %s5429_s16  ;;  %838 = vst.msk [vmem:[#allocation2 + $0x1d0] sm:$0xff] %vm833_vm1, %v6074_v22  ;;  %vm760_vm3 = vcmp.le.s32.totalorder %v748_v54, 16  ;;  %s7854_s15 = scalar_lea.vmem %s8197_s7, %s5429_s16 }
  0x12   : > { %522 = vmatpush.msra.mxu0 %v341_v3  ;;  %v282_v9 = vld [vmem:[%s6155_s23] sm:$0xff]  ;;  %v283_v10 = vld [vmem:[%s6155_s23 + $0x8] sm:$0xff]  ;;  %v284_v11 = vld [vmem:[%s6155_s23 + $0x10] sm:$0xff]  ;;  %839 = vst.msk [vmem:[#allocation2 + $0x1d8] sm:$0xff] %vm833_vm1, %v6074_v22  ;;  %v6230_v58 = vsel %vm760_vm3, 1.0, %v6074_v22 }
  0x13   : > { %v285_v12 = vld [vmem:[%s6155_s23 + $0x18] sm:$0xff]  ;;  %v286_v13 = vld [vmem:[%s6155_s23 + $0x20] sm:$0xff]  ;;  %v287_v14 = vld [vmem:[%s6155_s23 + $0x28] sm:$0xff]  ;;  %840 = vst.msk [vmem:[#allocation2 + $0x1e0] sm:$0xff] %vm833_vm1, %v6074_v22 }
  0x14   : > { %523 = vmatpush.msra.mxu0 %v340_v4  ;;  %v288_v15 = vld [vmem:[%s6155_s23 + $0x30] sm:$0xff]  ;;  %v289_v16 = vld [vmem:[%s6155_s23 + $0x38] sm:$0xff]  ;;  %v290_v17 = vld [vmem:[%s6155_s23 + $0x40] sm:$0xff]  ;;  %841 = vst.msk [vmem:[#allocation2 + $0x1e8] sm:$0xff] %vm833_vm1, %v6074_v22 }
  0x15   : > { %v291_v18 = vld [vmem:[%s6155_s23 + $0x48] sm:$0xff]  ;;  %v292_v19 = vld [vmem:[%s6155_s23 + $0x50] sm:$0xff]  ;;  %v293_v20 = vld [vmem:[%s6155_s23 + $0x58] sm:$0xff] }
  0x16   : > { %524 = vmatpush.msra.mxu0 %v339_v5  ;;  %v294_v21 = vld [vmem:[%s6155_s23 + $0x60] sm:$0xff]  ;;  %v295_v23 = vld [vmem:[%s6155_s23 + $0x68] sm:$0xff]  ;;  %v296_v24 = vld [vmem:[%s6155_s23 + $0x70] sm:$0xff] }
  0x17   : > { %v297_v25 = vld [vmem:[%s6155_s23 + $0x78] sm:$0xff]  ;;  %v298_v28 = vld [vmem:[%s6155_s23 + $0x80] sm:$0xff]  ;;  %v299_v33 = vld [vmem:[%s6155_s23 + $0x88] sm:$0xff] }
  0x18   : > { %525 = vmatpush.msra.mxu0 %v338_v6  ;;  %v300_v39 = vld [vmem:[%s6155_s23 + $0x90] sm:$0xff]  ;;  %v301_v45 = vld [vmem:[%s6155_s23 + $0x98] sm:$0xff]  ;;  %v302_v51 = vld [vmem:[%s6155_s23 + $0xa0] sm:$0xff] }
  0x19   : > { %v303_v56 = vld [vmem:[%s6155_s23 + $0xa8] sm:$0xff]  ;;  %v304_v62 = vld [vmem:[%s6155_s23 + $0xb0] sm:$0xff]  ;;  %v305_v3 = vld [vmem:[%s6155_s23 + $0xb8] sm:$0xff] }
  0x1a   : > { %526 = vmatpush.msra.mxu0 %v337_v7  ;;  %v5488_v5 = vld [vmem:[%s8193_s3 + $0x18] sm:$0xff]  ;;  %v951_v6 = vld [vmem:[%s8193_s3 + $0x8] sm:$0xff]  ;;  %v310_v37 = vld [vmem:[%s6155_s23 + $0xe0] sm:$0xff] }
  0x1b   : > { %6045 = vmatpush.msra.mxu1 %v5488_v5  ;;  %6047 = vmatpush.msra.mxu2 %v951_v6 }
  0x1c   : > { %527 = vmatpush.msra.mxu0 %v336_v8  ;;  %v5487_v8 = vld [vmem:[%s8193_s3 + $0x10] sm:$0xff] }
  0x1d   : > { %5431 = vmatmul.msk.f32.vlgmr.msra.gmra.mxu0 %vm349_vm0, %v282_v9  ;;  %v950_v9 = vld [vmem:[%s8193_s3] sm:$0xff]  ;;  %6046 = vmatpush.msra.mxu1 %v5487_v8 }
  0x1e   : > { %6048 = vmatpush.msra.mxu2 %v950_v9  ;;  %1185 = vmatpush.msrb.mxu0 %v5488_v5 }
  0x20   : > { %1186 = vmatpush.msrb.mxu0 %v5487_v8 }
  0x22   : > { %1526 = vmatpush.msra.mxu0 %v951_v6  ;;  %v314_v6 = vld [vmem:[%s6155_s23 + $0x100] sm:$0xff] }
  0x24   : > { %1527 = vmatpush.msra.mxu0 %v950_v9 }
  0x25   : > { %5432 = vmatmul.msk.f32.gmra.mxu0 %vm349_vm0, %v283_v10  ;;  %v5710_v10 = vld [vmem:[%s8193_s3 + $0x48] sm:$0xff] }
  0x26   : > { %2828 = vmatpush.msrb.mxu2 %v5710_v10 }
  0x2d   : > { %5433 = vmatmul.msk.f32.gmra.mxu0 %vm349_vm0, %v284_v11 }
  0x35   : > { %5434 = vmatmul.msk.f32.gmra.mxu0 %vm349_vm0, %v285_v12  ;;  %v306_v12 = vld [vmem:[%s6155_s23 + $0xc0] sm:$0xff] }
  0x3d   : > { %5435 = vmatmul.msk.f32.gmra.mxu0 %vm349_vm0, %v286_v13 }
  0x45   : > { %5436 = vmatmul.msk.f32.gmra.mxu0 %vm349_vm0, %v287_v14 }
  0x4d   : > { %5437 = vmatmul.msk.f32.gmra.mxu0 %vm349_vm0, %v288_v15  ;;  %v6265_v15 = vld [vmem:[%s8193_s3 + $0x28] sm:$0xff] }
  0x4e   : > { %6049 = vmatpush.msra.mxu3 %v6265_v15 }
  0x55   : > { %5438 = vmatmul.msk.f32.gmra.mxu0 %vm349_vm0, %v289_v16 }
  0x5d   : > { %5439 = vmatmul.msk.f32.gmra.mxu0 %vm349_vm0, %v290_v17  ;;  %v6272_v17 = vld [vmem:[%s8193_s3 + $0x20] sm:$0xff] }
  0x5e   : > { %6050 = vmatpush.msra.mxu3 %v6272_v17 }
  0x65   : > { %5440 = vmatmul.msk.f32.gmra.mxu0 %vm349_vm0, %v291_v18  ;;  %v5654_v18 = vld [vmem:[%s8193_s3 + $0x38] sm:$0xff] }
  0x66   : > { %2376 = vmatpush.msrb.mxu1 %v5654_v18 }
  0x6d   : > { %5441 = vmatmul.msk.f32.gmra.mxu0 %vm349_vm0, %v292_v19 }
  0x75   : > { %5442 = vmatmul.msk.f32.gmra.mxu0 %vm349_vm0, %v293_v20  ;;  %v307_v20 = vld [vmem:[%s6155_s23 + $0xc8] sm:$0xff] }
  0x7d   : > { %5443 = vmatmul.msk.f32.gmra.mxu0 %vm349_vm0, %v294_v21 }
  0x85   : > { %5444 = vmatmul.msk.f32.gmra.mxu0 %vm349_vm0, %v295_v23 }
  0x8d   : > { %5445 = vmatmul.msk.f32.gmra.mxu0 %vm349_vm0, %v296_v24 }
  0x95   : > { %5446 = vmatmul.msk.f32.gmra.mxu0 %vm349_vm0, %v297_v25  ;;  %v308_v25 = vld [vmem:[%s6155_s23 + $0xd0] sm:$0xff] }
  0x9a   : > { %v529_v27 = vpop.f32.mrf.mxu0 }
  0x9b   : > { %v530_v29 = vadd.f32 %v6203_v26, %v529_v27 }
  0x9d   : > { %v691_v30 = vmax.f32 %v530_v29, 0.0  ;;  %5447 = vmatmul.msk.f32.gmra.mxu0 %vm349_vm0, %v298_v28 }
  0x9f   : > { %v779_v31 = vmul.f32 0.0, %v691_v30  ;;  %v309_v30 = vld [vmem:[%s6155_s23 + $0xd8] sm:$0xff] }
  0xa1   : > { %842 = vst.msk [vmem:[#allocation2 + $0x20] sm:$0xff] %vm833_vm1, %v779_v31 }
  0xa2   : > { %v532_v32 = vpop.f32.mrf.mxu0 }
  0xa3   : > { %v533_v34 = vadd.f32 %v6203_v26, %v532_v32 }
  0xa5   : > { %v692_v35 = vmax.f32 %v533_v34, 0.0  ;;  %5448 = vmatmul.msk.f32.gmra.mxu0 %vm349_vm0, %v299_v33 }
  0xa7   : > { %v780_v36 = vmul.f32 0.0, %v692_v35 }
  0xa9   : > { %843 = vst.msk [vmem:[#allocation2 + $0x28] sm:$0xff] %vm833_vm1, %v780_v36 }
  0xaa   : > { %v535_v38 = vpop.f32.mrf.mxu0 }
  0xab   : > { %v536_v40 = vadd.f32 %v6203_v26, %v535_v38 }
  0xad   : > { %v693_v41 = vmax.f32 %v536_v40, 0.0  ;;  %5449 = vmatmul.msk.f32.gmra.mxu0 %vm349_vm0, %v300_v39 }
  0xaf   : > { %v781_v43 = vmul.f32 0.0, %v693_v41 }
  0xb1   : > { %844 = vst.msk [vmem:[#allocation2 + $0x30] sm:$0xff] %vm833_vm1, %v781_v43 }
  0xb2   : > { %v538_v44 = vpop.f32.mrf.mxu0 }
  0xb3   : > { %v539_v46 = vadd.f32 %v6203_v26, %v538_v44 }
  0xb5   : > { %v694_v48 = vmax.f32 %v539_v46, 0.0  ;;  %5450 = vmatmul.msk.f32.gmra.mxu0 %vm349_vm0, %v301_v45  ;;  %v311_v45 = vld [vmem:[%s6155_s23 + $0xe8] sm:$0xff] }
  0xb7   : > { %v782_v49 = vmul.f32 %v6219_v47, %v694_v48 }
  0xb9   : > { %845 = vst.msk [vmem:[#allocation2 + $0x38] sm:$0xff] %vm833_vm1, %v782_v49 }
  0xba   : > { %v541_v50 = vpop.f32.mrf.mxu0 }
  0xbb   : > { %v542_v52 = vadd.f32 %v6203_v26, %v541_v50 }
  0xbd   : > { %v695_v53 = vmax.f32 %v542_v52, 0.0  ;;  %5451 = vmatmul.msk.f32.gmra.mxu0 %vm349_vm0, %v302_v51 }
  0xbf   : > { %846 = vst.msk [vmem:[#allocation2 + $0x40] sm:$0xff] %vm833_vm1, %v695_v53  ;;  %v312_v53 = vld [vmem:[%s6155_s23 + $0xf0] sm:$0xff] }
  0xc2   : > { %v544_v55 = vpop.f32.mrf.mxu0 }
  0xc3   : > { %v545_v57 = vadd.f32 %v6203_v26, %v544_v55 }
  0xc5   : > { %v696_v59 = vmax.f32 %v545_v57, 0.0  ;;  %5452 = vmatmul.msk.f32.gmra.mxu0 %vm349_vm0, %v303_v56 }
  0xc7   : > { %v784_v60 = vmul.f32 %v6230_v58, %v696_v59 }
  0xc9   : > { %847 = vst.msk [vmem:[#allocation2 + $0x48] sm:$0xff] %vm833_vm1, %v784_v60 }
  0xca   : > { %v547_v61 = vpop.f32.mrf.mxu0 }
  0xcb   : > { %v548_v63 = vadd.f32 %v6203_v26, %v547_v61 }
  0xcd   : > { %v697_v0 = vmax.f32 %v548_v63, 0.0  ;;  %5453 = vmatmul.msk.f32.gmra.mxu0 %vm349_vm0, %v304_v62  ;;  %v313_v62 = vld [vmem:[%s6155_s23 + $0xf8] sm:$0xff] }
  0xcf   : > { %v785_v1 = vmul.f32 %v6219_v47, %v697_v0 }
  0xd1   : > { %848 = vst.msk [vmem:[#allocation2 + $0x50] sm:$0xff] %vm833_vm1, %v785_v1 }
  0xd2   : > { %v550_v2 = vpop.f32.mrf.mxu0 }
  0xd3   : > { %v551_v4 = vadd.f32 %v6203_v26, %v550_v2 }
  0xd5   : > { %v698_v7 = vmax.f32 %v551_v4, 0.0  ;;  %5454 = vmatmul.msk.f32.gmra.mxu0 %vm349_vm0, %v305_v3 }
  0xd7   : > { %849 = vst.msk [vmem:[#allocation2 + $0x58] sm:$0xff] %vm833_vm1, %v698_v7 }
  0xda   : > { %v553_v11 = vpop.f32.mrf.mxu0 }
  0xdb   : > { %v554_v13 = vadd.f32 %v6203_v26, %v553_v11 }
  0xdd   : > { %v699_v14 = vmax.f32 %v554_v13, 0.0  ;;  %5455 = vmatmul.msk.f32.gmra.mxu0 %vm349_vm0, %v306_v12  ;;  %v315_v13 = vld [vmem:[%s6155_s23 + $0x108] sm:$0xff] }
  0xdf   : > { %v787_v16 = vmul.f32 %v6230_v58, %v699_v14 }
  0xe1   : > { %850 = vst.msk [vmem:[#allocation2 + $0x60] sm:$0xff] %vm833_vm1, %v787_v16 }
  0xe2   : > { %v556_v19 = vpop.f32.mrf.mxu0 }
  0xe3   : > { %v557_v21 = vadd.f32 %v6203_v26, %v556_v19 }
  0xe5   : > { %v700_v22 = vmax.f32 %v557_v21, 0.0  ;;  %5456 = vmatmul.msk.f32.gmra.mxu0 %vm349_vm0, %v307_v20 }
  0xe7   : > { %v788_v23 = vmul.f32 %v6219_v47, %v700_v22 }
  0xe9   : > { %851 = vst.msk [vmem:[#allocation2 + $0x68] sm:$0xff] %vm833_vm1, %v788_v23  ;;  %v316_v23 = vld [vmem:[%s6155_s23 + $0x110] sm:$0xff] }
  0xea   : > { %v559_v24 = vpop.f32.mrf.mxu0 }
  0xeb   : > { %v560_v27 = vadd.f32 %v6203_v26, %v559_v24 }
  0xed   : > { %v701_v28 = vmax.f32 %v560_v27, 0.0  ;;  %5457 = vmatmul.msk.f32.gmra.mxu0 %vm349_vm0, %v308_v25 }
  0xef   : > { %852 = vst.msk [vmem:[#allocation2 + $0x70] sm:$0xff] %vm833_vm1, %v701_v28 }
  0xf2   : > { %v562_v29 = vpop.f32.mrf.mxu0 }
  0xf3   : > { %v563_v31 = vadd.f32 %v6203_v26, %v562_v29 }
  0xf5   : > { %v702_v32 = vmax.f32 %v563_v31, 0.0  ;;  %5458 = vmatmul.msk.f32.gmra.mxu0 %vm349_vm0, %v309_v30 }
  0xf6   : > { %v965_v33 = vld [vmem:[#allocation2 + $0x70] sm:$0xff] }
  0xf7   : > { %v909_v34 = vld [vmem:[#allocation2 + $0x6f] sm:$0xff]  ;;  %v790_v35 = vmul.f32 %v6230_v58, %v702_v32  ;;  %5502 = vmatmul.msk.f32.vlgmr.msra.gmra.mxu1 %vm833_vm1, %v965_v33  ;;  %v317_v32 = vld [vmem:[%s6155_s23 + $0x118] sm:$0xff] }
  0xf8   : > { %5556 = vmatmul.msk.f32.vlgmr.msra.gmra.mxu2 %vm833_vm1, %v909_v34 }
  0xf9   : > { %853 = vst.msk [vmem:[#allocation2 + $0x78] sm:$0xff] %vm833_vm1, %v790_v35 }
  0xfa   : > { %v565_v36 = vpop.f32.mrf.mxu0 }
  0xfb   : > { %v566_v38 = vadd.f32 %v6203_v26, %v565_v36 }
  0xfd   : > { %v703_v39 = vmax.f32 %v566_v38, 0.0  ;;  %5459 = vmatmul.msk.f32.gmra.mxu0 %vm349_vm0, %v310_v37 }
  0xff   : > { %v791_v40 = vmul.f32 %v6219_v47, %v703_v39  ;;  %v318_v39 = vld [vmem:[%s6155_s23 + $0x120] sm:$0xff] }
 0x100   : > { %v966_v41 = vld [vmem:[#allocation2 + $0x78] sm:$0xff] }
 0x101   : > { %v910_v42 = vld [vmem:[#allocation2 + $0x77] sm:$0xff]  ;;  %854 = vst.msk [vmem:[#allocation2 + $0x80] sm:$0xff] %vm833_vm1, %v791_v40  ;;  %5503 = vmatmul.msk.f32.gmra.mxu1 %vm833_vm1, %v966_v41 }
 0x102   : > { %v1704_v43 = vld [vmem:[#allocation2 + $0x71] sm:$0xff]  ;;  %5557 = vmatmul.msk.f32.gmra.mxu2 %vm833_vm1, %v910_v42  ;;  %v568_v44 = vpop.f32.mrf.mxu0 }
 0x103   : > { %5612 = vmatmul.msk.f32.vlgmr.msra.gmra.mxu3 %vm833_vm1, %v1704_v43  ;;  %v569_v46 = vadd.f32 %v6203_v26, %v568_v44 }
 0x105   : > { %v704_v48 = vmax.f32 %v569_v46, 0.0  ;;  %5460 = vmatmul.msk.f32.gmra.mxu0 %vm349_vm0, %v311_v45 }
 0x107   : > { %855 = vst.msk [vmem:[#allocation2 + $0x88] sm:$0xff] %vm833_vm1, %v704_v48  ;;  %v319_v48 = vld [vmem:[%s6155_s23 + $0x128] sm:$0xff] }
 0x108   : > { %v967_v49 = vld [vmem:[#allocation2 + $0x80] sm:$0xff] }
 0x109   : > { %v911_v50 = vld [vmem:[#allocation2 + $0x7f] sm:$0xff]  ;;  %5504 = vmatmul.msk.f32.gmra.mxu1 %vm833_vm1, %v967_v49 }
 0x10a   : > { %v1705_v51 = vld [vmem:[#allocation2 + $0x79] sm:$0xff]  ;;  %5558 = vmatmul.msk.f32.gmra.mxu2 %vm833_vm1, %v911_v50  ;;  %v571_v52 = vpop.f32.mrf.mxu0 }
 0x10b   : > { %5613 = vmatmul.msk.f32.gmra.mxu3 %vm833_vm1, %v1705_v51  ;;  %v572_v54 = vadd.f32 %v6203_v26, %v571_v52 }
 0x10d   : > { %v705_v55 = vmax.f32 %v572_v54, 0.0  ;;  %5461 = vmatmul.msk.f32.gmra.mxu0 %vm349_vm0, %v312_v53 }
 0x10e   : > { %v968_v57 = vld [vmem:[#allocation2 + $0x88] sm:$0xff] }
 0x10f   : > { %v793_v56 = vmul.f32 %v6230_v58, %v705_v55  ;;  %v912_v59 = vld [vmem:[#allocation2 + $0x87] sm:$0xff] }
 0x110   : > { %v1706_v60 = vld [vmem:[#allocation2 + $0x81] sm:$0xff] }
 0x111   : > { %856 = vst.msk [vmem:[#allocation2 + $0x90] sm:$0xff] %vm833_vm1, %v793_v56  ;;  %5505 = vmatmul.msk.f32.gmra.mxu1 %vm833_vm1, %v968_v57  ;;  %v320_v56 = vld [vmem:[%s6155_s23 + $0x130] sm:$0xff] }
 0x112   : > { %5559 = vmatmul.msk.f32.gmra.mxu2 %vm833_vm1, %v912_v59  ;;  %v574_v61 = vpop.f32.mrf.mxu0 }
 0x113   : > { %5614 = vmatmul.msk.f32.gmra.mxu3 %vm833_vm1, %v1706_v60  ;;  %v575_v63 = vadd.f32 %v6203_v26, %v574_v61 }
 0x115   : > { %v706_v0 = vmax.f32 %v575_v63, 0.0  ;;  %5462 = vmatmul.msk.f32.gmra.mxu0 %vm349_vm0, %v313_v62 }
 0x117   : > { %v794_v1 = vmul.f32 %v6219_v47, %v706_v0  ;;  %v321_v0 = vld [vmem:[%s6155_s23 + $0x138] sm:$0xff] }
 0x118   : > { %v969_v2 = vld [vmem:[#allocation2 + $0x90] sm:$0xff] }
 0x119   : > { %v913_v3 = vld [vmem:[#allocation2 + $0x8f] sm:$0xff]  ;;  %857 = vst.msk [vmem:[#allocation2 + $0x98] sm:$0xff] %vm833_vm1, %v794_v1  ;;  %5506 = vmatmul.msk.f32.gmra.mxu1 %vm833_vm1, %v969_v2 }
 0x11a   : > { %v1707_v4 = vld [vmem:[#allocation2 + $0x89] sm:$0xff]  ;;  %5560 = vmatmul.msk.f32.gmra.mxu2 %vm833_vm1, %v913_v3  ;;  %v577_v5 = vpop.f32.mrf.mxu0 }
 0x11b   : > { %5615 = vmatmul.msk.f32.gmra.mxu3 %vm833_vm1, %v1707_v4  ;;  %v578_v7 = vadd.f32 %v6203_v26, %v577_v5 }
 0x11d   : > { %v707_v8 = vmax.f32 %v578_v7, 0.0  ;;  %5463 = vmatmul.msk.f32.gmra.mxu0 %vm349_vm0, %v314_v6 }
 0x11f   : > { %858 = vst.msk [vmem:[#allocation2 + $0xa0] sm:$0xff] %vm833_vm1, %v707_v8  ;;  %v322_v8 = vld [vmem:[%s6155_s23 + $0x140] sm:$0xff] }
 0x120   : > { %v970_v9 = vld [vmem:[#allocation2 + $0x98] sm:$0xff] }
 0x121   : > { %v914_v10 = vld [vmem:[#allocation2 + $0x97] sm:$0xff]  ;;  %5507 = vmatmul.msk.f32.gmra.mxu1 %vm833_vm1, %v970_v9 }
 0x122   : > { %v1708_v11 = vld [vmem:[#allocation2 + $0x91] sm:$0xff]  ;;  %5561 = vmatmul.msk.f32.gmra.mxu2 %vm833_vm1, %v914_v10  ;;  %v580_v12 = vpop.f32.mrf.mxu0 }
 0x123   : > { %5616 = vmatmul.msk.f32.gmra.mxu3 %vm833_vm1, %v1708_v11  ;;  %v581_v14 = vadd.f32 %v6203_v26, %v580_v12 }
 0x125   : > { %v708_v16 = vmax.f32 %v581_v14, 0.0  ;;  %5464 = vmatmul.msk.f32.gmra.mxu0 %vm349_vm0, %v315_v13 }
 0x126   : > { %v971_v19 = vld [vmem:[#allocation2 + $0xa0] sm:$0xff] }
 0x127   : > { %v796_v18 = vmul.f32 %v6230_v58, %v708_v16  ;;  %v915_v20 = vld [vmem:[#allocation2 + $0x9f] sm:$0xff] }
 0x128   : > { %v1709_v21 = vld [vmem:[#allocation2 + $0x99] sm:$0xff] }
 0x129   : > { %859 = vst.msk [vmem:[#allocation2 + $0xa8] sm:$0xff] %vm833_vm1, %v796_v18  ;;  %5508 = vmatmul.msk.f32.gmra.mxu1 %vm833_vm1, %v971_v19  ;;  %v323_v18 = vld [vmem:[%s6155_s23 + $0x148] sm:$0xff] }
 0x12a   : > { %5562 = vmatmul.msk.f32.gmra.mxu2 %vm833_vm1, %v915_v20  ;;  %v583_v22 = vpop.f32.mrf.mxu0 }
 0x12b   : > { %5617 = vmatmul.msk.f32.gmra.mxu3 %vm833_vm1, %v1709_v21  ;;  %v584_v24 = vadd.f32 %v6203_v26, %v583_v22 }
 0x12d   : > { %v709_v25 = vmax.f32 %v584_v24, 0.0  ;;  %5465 = vmatmul.msk.f32.gmra.mxu0 %vm349_vm0, %v316_v23  ;;  %v5766_v24 = vld [vmem:[%s8193_s3 + $0x58] sm:$0xff] }
 0x12e   : > { %3280 = vmatpush.msrb.mxu3 %v5766_v24 }
 0x12f   : > { %v797_v27 = vmul.f32 %v6219_v47, %v709_v25 }
 0x130   : > { %v972_v28 = vld [vmem:[#allocation2 + $0xa8] sm:$0xff] }
 0x131   : > { %v916_v29 = vld [vmem:[#allocation2 + $0xa7] sm:$0xff]  ;;  %860 = vst.msk [vmem:[#allocation2 + $0xb0] sm:$0xff] %vm833_vm1, %v797_v27  ;;  %5509 = vmatmul.msk.f32.gmra.mxu1 %vm833_vm1, %v972_v28  ;;  %v324_v27 = vld [vmem:[%s6155_s23 + $0x150] sm:$0xff] }
 0x132   : > { %v1710_v30 = vld [vmem:[#allocation2 + $0xa1] sm:$0xff]  ;;  %5563 = vmatmul.msk.f32.gmra.mxu2 %vm833_vm1, %v916_v29  ;;  %v586_v31 = vpop.f32.mrf.mxu0 }
 0x133   : > { %5618 = vmatmul.msk.f32.gmra.mxu3 %vm833_vm1, %v1710_v30  ;;  %v587_v33 = vadd.f32 %v6203_v26, %v586_v31 }
 0x135   : > { %v710_v34 = vmax.f32 %v587_v33, 0.0  ;;  %5466 = vmatmul.msk.f32.gmra.mxu0 %vm349_vm0, %v317_v32 }
 0x137   : > { %861 = vst.msk [vmem:[#allocation2 + $0xb8] sm:$0xff] %vm833_vm1, %v710_v34 }
 0x138   : > { %v973_v35 = vld [vmem:[#allocation2 + $0xb0] sm:$0xff] }
 0x139   : > { %v917_v36 = vld [vmem:[#allocation2 + $0xaf] sm:$0xff]  ;;  %5510 = vmatmul.msk.f32.gmra.mxu1 %vm833_vm1, %v973_v35  ;;  %v325_v35 = vld [vmem:[%s6155_s23 + $0x158] sm:$0xff] }
 0x13a   : > { %v1711_v37 = vld [vmem:[#allocation2 + $0xa9] sm:$0xff]  ;;  %5564 = vmatmul.msk.f32.gmra.mxu2 %vm833_vm1, %v917_v36  ;;  %v589_v38 = vpop.f32.mrf.mxu0 }
 0x13b   : > { %5619 = vmatmul.msk.f32.gmra.mxu3 %vm833_vm1, %v1711_v37  ;;  %v590_v40 = vadd.f32 %v6203_v26, %v589_v38 }
 0x13d   : > { %v711_v41 = vmax.f32 %v590_v40, 0.0  ;;  %5467 = vmatmul.msk.f32.gmra.mxu0 %vm349_vm0, %v318_v39 }
 0x13e   : > { %v974_v43 = vld [vmem:[#allocation2 + $0xb8] sm:$0xff] }
 0x13f   : > { %v799_v42 = vmul.f32 %v6230_v58, %v711_v41  ;;  %v918_v44 = vld [vmem:[#allocation2 + $0xb7] sm:$0xff] }
 0x140   : > { %v1712_v45 = vld [vmem:[#allocation2 + $0xb1] sm:$0xff] }
 0x141   : > { %862 = vst.msk [vmem:[#allocation2 + $0xc0] sm:$0xff] %vm833_vm1, %v799_v42  ;;  %5511 = vmatmul.msk.f32.gmra.mxu1 %vm833_vm1, %v974_v43 }
 0x142   : > { %5565 = vmatmul.msk.f32.gmra.mxu2 %vm833_vm1, %v918_v44  ;;  %v592_v46 = vpop.f32.mrf.mxu0 }
 0x143   : > { %5620 = vmatmul.msk.f32.gmra.mxu3 %vm833_vm1, %v1712_v45  ;;  %v593_v49 = vadd.f32 %v6203_v26, %v592_v46  ;;  %v326_v45 = vld [vmem:[%s6155_s23 + $0x160] sm:$0xff] }
 0x145   : > { %v712_v50 = vmax.f32 %v593_v49, 0.0  ;;  %5468 = vmatmul.msk.f32.gmra.mxu0 %vm349_vm0, %v319_v48 }
 0x147   : > { %v800_v51 = vmul.f32 %v6219_v47, %v712_v50 }
 0x148   : > { %v975_v52 = vld [vmem:[#allocation2 + $0xc0] sm:$0xff] }
 0x149   : > { %v919_v53 = vld [vmem:[#allocation2 + $0xbf] sm:$0xff]  ;;  %863 = vst.msk [vmem:[#allocation2 + $0xc8] sm:$0xff] %vm833_vm1, %v800_v51  ;;  %5512 = vmatmul.msk.f32.gmra.mxu1 %vm833_vm1, %v975_v52 }
 0x14a   : > { %v1713_v54 = vld [vmem:[#allocation2 + $0xb9] sm:$0xff]  ;;  %5566 = vmatmul.msk.f32.gmra.mxu2 %vm833_vm1, %v919_v53  ;;  %v595_v55 = vpop.f32.mrf.mxu0 }
 0x14b   : > { %5621 = vmatmul.msk.f32.gmra.mxu3 %vm833_vm1, %v1713_v54  ;;  %v596_v57 = vadd.f32 %v6203_v26, %v595_v55  ;;  %v5709_v54 = vld [vmem:[%s8193_s3 + $0x40] sm:$0xff] }
 0x14c   : > { %2829 = vmatpush.msrb.mxu2 %v5709_v54 }
 0x14d   : > { %v713_v59 = vmax.f32 %v596_v57, 0.0  ;;  %5469 = vmatmul.msk.f32.gmra.mxu0 %vm349_vm0, %v320_v56  ;;  %v327_v56 = vld [vmem:[%s6155_s23 + $0x168] sm:$0xff]  ;;  %v5653_v57 = vld [vmem:[%s8193_s3 + $0x30] sm:$0xff] }
 0x14e   : > { %2377 = vmatpush.msrb.mxu1 %v5653_v57 }
 0x14f   : > { %864 = vst.msk [vmem:[#allocation2 + $0xd0] sm:$0xff] %vm833_vm1, %v713_v59 }
 0x150   : > { %v976_v60 = vld [vmem:[#allocation2 + $0xc8] sm:$0xff] }
 0x151   : > { %v920_v61 = vld [vmem:[#allocation2 + $0xc7] sm:$0xff]  ;;  %5513 = vmatmul.msk.f32.gmra.mxu1 %vm833_vm1, %v976_v60 }
 0x152   : > { %v1714_v62 = vld [vmem:[#allocation2 + $0xc1] sm:$0xff]  ;;  %5567 = vmatmul.msk.f32.gmra.mxu2 %vm833_vm1, %v920_v61  ;;  %v598_v63 = vpop.f32.mrf.mxu0 }
 0x153   : > { %5622 = vmatmul.msk.f32.gmra.mxu3 %vm833_vm1, %v1714_v62  ;;  %v599_v1 = vadd.f32 %v6203_v26, %v598_v63 }
 0x155   : > { %v714_v2 = vmax.f32 %v599_v1, 0.0  ;;  %5470 = vmatmul.msk.f32.gmra.mxu0 %vm349_vm0, %v321_v0 }
 0x156   : > { %v977_v4 = vld [vmem:[#allocation2 + $0xd0] sm:$0xff] }
 0x157   : > { %v802_v3 = vmul.f32 %v6230_v58, %v714_v2  ;;  %v921_v5 = vld [vmem:[#allocation2 + $0xcf] sm:$0xff] }
 0x158   : > { %v1715_v6 = vld [vmem:[#allocation2 + $0xc9] sm:$0xff] }
 0x159   : > { %865 = vst.msk [vmem:[#allocation2 + $0xd8] sm:$0xff] %vm833_vm1, %v802_v3  ;;  %5514 = vmatmul.msk.f32.gmra.mxu1 %vm833_vm1, %v977_v4 }
 0x15a   : > { %5568 = vmatmul.msk.f32.gmra.mxu2 %vm833_vm1, %v921_v5  ;;  %v601_v7 = vpop.f32.mrf.mxu0 }
 0x15b   : > { %5623 = vmatmul.msk.f32.gmra.mxu3 %vm833_vm1, %v1715_v6  ;;  %v602_v9 = vadd.f32 %v6203_v26, %v601_v7  ;;  %v328_v7 = vld [vmem:[%s6155_s23 + $0x170] sm:$0xff] }
 0x15d   : > { %v715_v10 = vmax.f32 %v602_v9, 0.0  ;;  %5471 = vmatmul.msk.f32.gmra.mxu0 %vm349_vm0, %v322_v8 }
 0x15f   : > { %v803_v11 = vmul.f32 %v6219_v47, %v715_v10 }
 0x160   : > { %v978_v12 = vld [vmem:[#allocation2 + $0xd8] sm:$0xff] }
 0x161   : > { %v922_v13 = vld [vmem:[#allocation2 + $0xd7] sm:$0xff]  ;;  %866 = vst.msk [vmem:[#allocation2 + $0xe0] sm:$0xff] %vm833_vm1, %v803_v11  ;;  %5515 = vmatmul.msk.f32.gmra.mxu1 %vm833_vm1, %v978_v12 }
 0x162   : > { %v1716_v14 = vld [vmem:[#allocation2 + $0xd1] sm:$0xff]  ;;  %5569 = vmatmul.msk.f32.gmra.mxu2 %vm833_vm1, %v922_v13  ;;  %v604_v16 = vpop.f32.mrf.mxu0 }
 0x163   : > { %5624 = vmatmul.msk.f32.gmra.mxu3 %vm833_vm1, %v1716_v14  ;;  %v605_v19 = vadd.f32 %v6203_v26, %v604_v16 }
 0x165   : > { %v716_v20 = vmax.f32 %v605_v19, 0.0  ;;  %5472 = vmatmul.msk.f32.gmra.mxu0 %vm349_vm0, %v323_v18 }
 0x167   : > { %867 = vst.msk [vmem:[#allocation2 + $0xe8] sm:$0xff] %vm833_vm1, %v716_v20 }
 0x168   : > { %v979_v21 = vld [vmem:[#allocation2 + $0xe0] sm:$0xff] }
 0x169   : > { %v923_v22 = vld [vmem:[#allocation2 + $0xdf] sm:$0xff]  ;;  %5516 = vmatmul.msk.f32.gmra.mxu1 %vm833_vm1, %v979_v21 }
 0x16a   : > { %v1717_v23 = vld [vmem:[#allocation2 + $0xd9] sm:$0xff]  ;;  %5570 = vmatmul.msk.f32.gmra.mxu2 %vm833_vm1, %v923_v22  ;;  %v607_v25 = vpop.f32.mrf.mxu0 }
 0x16b   : > { %5625 = vmatmul.msk.f32.gmra.mxu3 %vm833_vm1, %v1717_v23  ;;  %v608_v28 = vadd.f32 %v6203_v26, %v607_v25  ;;  %v329_v22 = vld [vmem:[%s6155_s23 + $0x178] sm:$0xff] }
 0x16d   : > { %v717_v29 = vmax.f32 %v608_v28, 0.0  ;;  %5473 = vmatmul.msk.f32.gmra.mxu0 %vm349_vm0, %v324_v27 }
 0x16e   : > { %v980_v31 = vld [vmem:[#allocation2 + $0xe8] sm:$0xff] }
 0x16f   : > { %v805_v30 = vmul.f32 %v6230_v58, %v717_v29  ;;  %v924_v32 = vld [vmem:[#allocation2 + $0xe7] sm:$0xff] }
 0x170   : > { %v1718_v33 = vld [vmem:[#allocation2 + $0xe1] sm:$0xff] }
 0x171   : > { %868 = vst.msk [vmem:[#allocation2 + $0xf0] sm:$0xff] %vm833_vm1, %v805_v30  ;;  %5517 = vmatmul.msk.f32.gmra.mxu1 %vm833_vm1, %v980_v31 }
 0x172   : > { %5571 = vmatmul.msk.f32.gmra.mxu2 %vm833_vm1, %v924_v32  ;;  %v610_v34 = vpop.f32.mrf.mxu0 }
 0x173   : > { %5626 = vmatmul.msk.f32.gmra.mxu3 %vm833_vm1, %v1718_v33  ;;  %v611_v36 = vadd.f32 %v6203_v26, %v610_v34 }
 0x174   : > { %v1227_v38 = vpop.f32.mrf.mxu1 }
 0x175   : > { %v718_v37 = vmax.f32 %v611_v36, 0.0  ;;  %5474 = vmatmul.msk.f32.gmra.mxu0 %vm349_vm0, %v325_v35  ;;  %v330_v35 = vld [vmem:[%s6155_s23 + $0x180] sm:$0xff] }
 0x177   : > { %v806_v39 = vmul.f32 %v6219_v47, %v718_v37 }
 0x178   : > { %v981_v40 = vld [vmem:[#allocation2 + $0xf0] sm:$0xff] }
 0x179   : > { %v925_v41 = vld [vmem:[#allocation2 + $0xef] sm:$0xff]  ;;  %869 = vst.msk [vmem:[#allocation2 + $0xf8] sm:$0xff] %vm833_vm1, %v806_v39  ;;  %5518 = vmatmul.msk.f32.gmra.mxu1 %vm833_vm1, %v981_v40 }
 0x17a   : > { %v1719_v42 = vld [vmem:[#allocation2 + $0xe9] sm:$0xff]  ;;  %5572 = vmatmul.msk.f32.gmra.mxu2 %vm833_vm1, %v925_v41  ;;  %v613_v43 = vpop.f32.mrf.mxu0 }
 0x17b   : > { %5627 = vmatmul.msk.f32.gmra.mxu3 %vm833_vm1, %v1719_v42  ;;  %v1568_v44 = vpop.f32.mrf.mxu2  ;;  %v614_v46 = vadd.f32 %v6203_v26, %v613_v43 }
 0x17c   : > { %v1569_v48 = vadd.f32 %v1568_v44, %v1227_v38 }
 0x17d   : > { %v719_v49 = vmax.f32 %v614_v46, 0.0  ;;  %5475 = vmatmul.msk.f32.gmra.mxu0 %vm349_vm0, %v326_v45 }
 0x17e   : > { %v1230_v50 = vpop.f32.mrf.mxu1 }
 0x17f   : > { %870 = vst.msk [vmem:[#allocation2 + $0x100] sm:$0xff] %vm833_vm1, %v719_v49  ;;  %v331_v49 = vld [vmem:[%s6155_s23 + $0x188] sm:$0xff] }
 0x180   : > { %v982_v51 = vld [vmem:[#allocation2 + $0xf8] sm:$0xff] }
 0x181   : > { %v926_v52 = vld [vmem:[#allocation2 + $0xf7] sm:$0xff]  ;;  %5519 = vmatmul.msk.f32.gmra.mxu1 %vm833_vm1, %v982_v51 }
 0x182   : > { %v1720_v53 = vld [vmem:[#allocation2 + $0xf1] sm:$0xff]  ;;  %5573 = vmatmul.msk.f32.gmra.mxu2 %vm833_vm1, %v926_v52  ;;  %v616_v55 = vpop.f32.mrf.mxu0 }
 0x183   : > { %5628 = vmatmul.msk.f32.gmra.mxu3 %vm833_vm1, %v1720_v53  ;;  %v617_v59 = vadd.f32 %v6203_v26, %v616_v55 }
 0x185   : > { %v1571_v60 = vpop.f32.mrf.mxu2  ;;  %v720_v61 = vmax.f32 %v617_v59, 0.0  ;;  %5476 = vmatmul.msk.f32.gmra.mxu0 %vm349_vm0, %v327_v56 }
 0x186   : > { %v1572_v62 = vadd.f32 %v1571_v60, %v1230_v50  ;;  %v1966_v63 = vpop.f32.mrf.mxu3  ;;  %v1233_v1 = vpop.f32.mrf.mxu1  ;;  %v983_v3 = vld [vmem:[#allocation2 + $0x100] sm:$0xff] }
 0x187   : > { %v6437_v0 = vadd.f32 %v1966_v63, %v1569_v48  ;;  %v808_v2 = vmul.f32 %v6230_v58, %v720_v61  ;;  %v927_v4 = vld [vmem:[#allocation2 + $0xff] sm:$0xff]  ;;  %v332_v63 = vld [vmem:[%s6155_s23 + $0x190] sm:$0xff] }
 0x188   : > { %v1721_v5 = vld [vmem:[#allocation2 + $0xf9] sm:$0xff] }
 0x189   : > { %871 = vst.msk [vmem:[#allocation2 + $0x108] sm:$0xff] %vm833_vm1, %v808_v2  ;;  %5520 = vmatmul.msk.f32.gmra.mxu1 %vm833_vm1, %v983_v3 }
 0x18a   : > { %5574 = vmatmul.msk.f32.gmra.mxu2 %vm833_vm1, %v927_v4  ;;  %v619_v6 = vpop.f32.mrf.mxu0 }
 0x18b   : > { %5629 = vmatmul.msk.f32.gmra.mxu3 %vm833_vm1, %v1721_v5  ;;  %v620_v8 = vadd.f32 %v6203_v26, %v619_v6 }
 0x18d   : > { %v1574_v9 = vpop.f32.mrf.mxu2  ;;  %v721_v10 = vmax.f32 %v620_v8, 0.0  ;;  %5477 = vmatmul.msk.f32.gmra.mxu0 %vm349_vm0, %v328_v7 }
 0x18e   : > { %v1575_v11 = vadd.f32 %v1574_v9, %v1233_v1  ;;  %v1969_v12 = vpop.f32.mrf.mxu3  ;;  %v1236_v14 = vpop.f32.mrf.mxu1 }
 0x18f   : > { %v6447_v13 = vadd.f32 %v1969_v12, %v1572_v62  ;;  %v809_v16 = vmul.f32 %v6219_v47, %v721_v10  ;;  %v333_v12 = vld [vmem:[%s6155_s23 + $0x198] sm:$0xff] }
 0x190   : > { %v984_v18 = vld [vmem:[#allocation2 + $0x108] sm:$0xff] }
 0x191   : > { %v928_v19 = vld [vmem:[#allocation2 + $0x107] sm:$0xff]  ;;  %872 = vst.msk [vmem:[#allocation2 + $0x110] sm:$0xff] %vm833_vm1, %v809_v16  ;;  %5521 = vmatmul.msk.f32.gmra.mxu1 %vm833_vm1, %v984_v18 }
 0x192   : > { %v1722_v20 = vld [vmem:[#allocation2 + $0x101] sm:$0xff]  ;;  %5575 = vmatmul.msk.f32.gmra.mxu2 %vm833_vm1, %v928_v19  ;;  %v622_v21 = vpop.f32.mrf.mxu0 }
 0x193   : > { %5630 = vmatmul.msk.f32.gmra.mxu3 %vm833_vm1, %v1722_v20  ;;  %v623_v23 = vadd.f32 %v6203_v26, %v622_v21 }
 0x195   : > { %v1577_v24 = vpop.f32.mrf.mxu2  ;;  %v722_v25 = vmax.f32 %v623_v23, 0.0  ;;  %5478 = vmatmul.msk.f32.gmra.mxu0 %vm349_vm0, %v329_v22 }
 0x196   : > { %v1578_v27 = vadd.f32 %v1577_v24, %v1236_v14  ;;  %v1972_v28 = vpop.f32.mrf.mxu3  ;;  %v1239_v30 = vpop.f32.mrf.mxu1 }
 0x197   : > { %v6457_v29 = vadd.f32 %v1972_v28, %v1575_v11  ;;  %873 = vst.msk [vmem:[#allocation2 + $0x118] sm:$0xff] %vm833_vm1, %v722_v25 }
 0x198   : > { %v985_v31 = vld [vmem:[#allocation2 + $0x110] sm:$0xff] }
 0x199   : > { %v929_v32 = vld [vmem:[#allocation2 + $0x10f] sm:$0xff]  ;;  %5522 = vmatmul.msk.f32.gmra.mxu1 %vm833_vm1, %v985_v31 }
 0x19a   : > { %v1723_v33 = vld [vmem:[#allocation2 + $0x109] sm:$0xff]  ;;  %5576 = vmatmul.msk.f32.gmra.mxu2 %vm833_vm1, %v929_v32  ;;  %v625_v34 = vpop.f32.mrf.mxu0 }
 0x19b   : > { %5631 = vmatmul.msk.f32.gmra.mxu3 %vm833_vm1, %v1723_v33  ;;  %v626_v36 = vadd.f32 %v6203_v26, %v625_v34 }
 0x19d   : > { %v1580_v37 = vpop.f32.mrf.mxu2  ;;  %v723_v38 = vmax.f32 %v626_v36, 0.0  ;;  %5479 = vmatmul.msk.f32.gmra.mxu0 %vm349_vm0, %v330_v35 }
 0x19e   : > { %v1581_v39 = vadd.f32 %v1580_v37, %v1239_v30  ;;  %v1975_v40 = vpop.f32.mrf.mxu3  ;;  %v1242_v42 = vpop.f32.mrf.mxu1  ;;  %v986_v44 = vld [vmem:[#allocation2 + $0x118] sm:$0xff]  ;;  %v334_v30 = vld [vmem:[%s6155_s23 + $0x1a0] sm:$0xff] }
 0x19f   : > { %v6466_v41 = vadd.f32 %v1975_v40, %v1578_v27  ;;  %v811_v43 = vmul.f32 %v6230_v58, %v723_v38  ;;  %v930_v45 = vld [vmem:[#allocation2 + $0x117] sm:$0xff] }
 0x1a0   : > { %v1724_v46 = vld [vmem:[#allocation2 + $0x111] sm:$0xff] }
 0x1a1   : > { %874 = vst.msk [vmem:[#allocation2 + $0x120] sm:$0xff] %vm833_vm1, %v811_v43  ;;  %5523 = vmatmul.msk.f32.gmra.mxu1 %vm833_vm1, %v986_v44  ;;  %v335_v44 = vld [vmem:[%s6155_s23 + $0x1a8] sm:$0xff] }
 0x1a2   : > { %5577 = vmatmul.msk.f32.gmra.mxu2 %vm833_vm1, %v930_v45  ;;  %v628_v48 = vpop.f32.mrf.mxu0 }
 0x1a3   : > { %5632 = vmatmul.msk.f32.gmra.mxu3 %vm833_vm1, %v1724_v46  ;;  %v629_v50 = vadd.f32 %v6203_v26, %v628_v48 }
 0x1a5   : > { %v1583_v51 = vpop.f32.mrf.mxu2  ;;  %v724_v52 = vmax.f32 %v629_v50, 0.0  ;;  %5480 = vmatmul.msk.f32.gmra.mxu0 %vm349_vm0, %v331_v49 }
 0x1a6   : > { %v1584_v53 = vadd.f32 %v1583_v51, %v1242_v42  ;;  %v1978_v54 = vpop.f32.mrf.mxu3  ;;  %v1245_v56 = vpop.f32.mrf.mxu1 }
 0x1a7   : > { %v6476_v55 = vadd.f32 %v1978_v54, %v1581_v39  ;;  %v812_v57 = vmul.f32 %v6219_v47, %v724_v52 }
 0x1a8   : > { %v987_v59 = vld [vmem:[#allocation2 + $0x120] sm:$0xff] }
 0x1a9   : > { %v931_v60 = vld [vmem:[#allocation2 + $0x11f] sm:$0xff]  ;;  %875 = vst.msk [vmem:[#allocation2 + $0x128] sm:$0xff] %vm833_vm1, %v812_v57  ;;  %5524 = vmatmul.msk.f32.gmra.mxu1 %vm833_vm1, %v987_v59  ;;  %v952_v59 = vld [vmem:[#allocation2 + $0x8] sm:$0xff] }
 0x1aa   : > { %v1725_v61 = vld [vmem:[#allocation2 + $0x119] sm:$0xff]  ;;  %5578 = vmatmul.msk.f32.gmra.mxu2 %vm833_vm1, %v931_v60  ;;  %v631_v62 = vpop.f32.mrf.mxu0 }
 0x1ab   : > { %5633 = vmatmul.msk.f32.gmra.mxu3 %vm833_vm1, %v1725_v61  ;;  %v632_v1 = vadd.f32 %v6203_v26, %v631_v62 }
 0x1ad   : > { %v1586_v2 = vpop.f32.mrf.mxu2  ;;  %v725_v3 = vmax.f32 %v632_v1, 0.0  ;;  %5481 = vmatmul.msk.f32.gmra.mxu0 %vm349_vm0, %v332_v63 }
 0x1ae   : > { %v1587_v4 = vadd.f32 %v1586_v2, %v1245_v56  ;;  %v1981_v5 = vpop.f32.mrf.mxu3  ;;  %v1248_v7 = vpop.f32.mrf.mxu1 }
 0x1af   : > { %v6486_v6 = vadd.f32 %v1981_v5, %v1584_v53  ;;  %876 = vst.msk [vmem:[#allocation2 + $0x130] sm:$0xff] %vm833_vm1, %v725_v3 }
 0x1b0   : > { %v988_v8 = vld [vmem:[#allocation2 + $0x128] sm:$0xff] }
 0x1b1   : > { %v932_v9 = vld [vmem:[#allocation2 + $0x127] sm:$0xff]  ;;  %5525 = vmatmul.msk.f32.gmra.mxu1 %vm833_vm1, %v988_v8 }
 0x1b2   : > { %v1726_v10 = vld [vmem:[#allocation2 + $0x121] sm:$0xff]  ;;  %5579 = vmatmul.msk.f32.gmra.mxu2 %vm833_vm1, %v932_v9  ;;  %v634_v11 = vpop.f32.mrf.mxu0  ;;  %v953_v9 = vld [vmem:[#allocation2 + $0x10] sm:$0xff] }
 0x1b3   : > { %5634 = vmatmul.msk.f32.gmra.mxu3 %vm833_vm1, %v1726_v10  ;;  %v635_v14 = vadd.f32 %v6203_v26, %v634_v11 }
 0x1b5   : > { %v1589_v16 = vpop.f32.mrf.mxu2  ;;  %v726_v18 = vmax.f32 %v635_v14, 0.0  ;;  %5482 = vmatmul.msk.f32.gmra.mxu0 %vm349_vm0, %v333_v12 }
 0x1b6   : > { %v1590_v19 = vadd.f32 %v1589_v16, %v1248_v7  ;;  %v1984_v20 = vpop.f32.mrf.mxu3  ;;  %v1251_v22 = vpop.f32.mrf.mxu1  ;;  %v989_v24 = vld [vmem:[#allocation2 + $0x130] sm:$0xff] }
 0x1b7   : > { %v6495_v21 = vadd.f32 %v1984_v20, %v1587_v4  ;;  %v814_v23 = vmul.f32 %v6230_v58, %v726_v18  ;;  %v933_v25 = vld [vmem:[#allocation2 + $0x12f] sm:$0xff] }
 0x1b8   : > { %v1727_v27 = vld [vmem:[#allocation2 + $0x129] sm:$0xff] }
 0x1b9   : > { %877 = vst.msk [vmem:[#allocation2 + $0x138] sm:$0xff] %vm833_vm1, %v814_v23  ;;  %5526 = vmatmul.msk.f32.gmra.mxu1 %vm833_vm1, %v989_v24 }
 0x1ba   : > { %5580 = vmatmul.msk.f32.gmra.mxu2 %vm833_vm1, %v933_v25  ;;  %v637_v28 = vpop.f32.mrf.mxu0  ;;  %v954_v25 = vld [vmem:[#allocation2 + $0x18] sm:$0xff] }
 0x1bb   : > { %5635 = vmatmul.msk.f32.gmra.mxu3 %vm833_vm1, %v1727_v27  ;;  %v638_v31 = vadd.f32 %v6203_v26, %v637_v28 }
 0x1bd   : > { %v1592_v32 = vpop.f32.mrf.mxu2  ;;  %v727_v33 = vmax.f32 %v638_v31, 0.0  ;;  %5483 = vmatmul.msk.f32.gmra.mxu0 %vm349_vm0, %v334_v30 }
 0x1be   : > { %v1593_v34 = vadd.f32 %v1592_v32, %v1251_v22  ;;  %v1987_v35 = vpop.f32.mrf.mxu3  ;;  %v1254_v37 = vpop.f32.mrf.mxu1 }
 0x1bf   : > { %v6505_v36 = vadd.f32 %v1987_v35, %v1590_v19  ;;  %v815_v38 = vmul.f32 %v6219_v47, %v727_v33 }
 0x1c0   : > { %v990_v39 = vld [vmem:[#allocation2 + $0x138] sm:$0xff] }
 0x1c1   : > { %v934_v40 = vld [vmem:[#allocation2 + $0x137] sm:$0xff]  ;;  %878 = vst.msk [vmem:[#allocation2 + $0x140] sm:$0xff] %vm833_vm1, %v815_v38  ;;  %5527 = vmatmul.msk.f32.gmra.mxu1 %vm833_vm1, %v990_v39 }
 0x1c2   : > { %v1728_v42 = vld [vmem:[#allocation2 + $0x131] sm:$0xff]  ;;  %5581 = vmatmul.msk.f32.gmra.mxu2 %vm833_vm1, %v934_v40  ;;  %v640_v43 = vpop.f32.mrf.mxu0 }
 0x1c3   : > { %5636 = vmatmul.msk.f32.gmra.mxu3 %vm833_vm1, %v1728_v42  ;;  %v641_v45 = vadd.f32 %v6203_v26, %v640_v43  ;;  %v6555_v43 = vld [vmem:[#allocation2 + $0x20] sm:$0xff] }
 0x1c5   : > { %v1595_v46 = vpop.f32.mrf.mxu2  ;;  %v728_v48 = vmax.f32 %v641_v45, 0.0  ;;  %5484 = vmatmul.msk.f32.gmra.mxu0 %vm349_vm0, %v335_v44 }
 0x1c6   : > { %v1596_v49 = vadd.f32 %v1595_v46, %v1254_v37  ;;  %v1990_v50 = vpop.f32.mrf.mxu3  ;;  %v1257_v52 = vpop.f32.mrf.mxu1 }
 0x1c7   : > { %v6515_v51 = vadd.f32 %v1990_v50, %v1593_v34  ;;  %879 = vst.msk [vmem:[#allocation2 + $0x148] sm:$0xff] %vm833_vm1, %v728_v48 }
 0x1c8   : > { %v991_v53 = vld [vmem:[#allocation2 + $0x140] sm:$0xff] }
 0x1c9   : > { %v935_v54 = vld [vmem:[#allocation2 + $0x13f] sm:$0xff]  ;;  %5528 = vmatmul.msk.f32.gmra.mxu1 %vm833_vm1, %v991_v53 }
 0x1ca   : > { %v1729_v56 = vld [vmem:[#allocation2 + $0x139] sm:$0xff]  ;;  %5582 = vmatmul.msk.f32.gmra.mxu2 %vm833_vm1, %v935_v54  ;;  %v643_v57 = vpop.f32.mrf.mxu0 }
 0x1cb   : > { %5637 = vmatmul.msk.f32.gmra.mxu3 %vm833_vm1, %v1729_v56  ;;  %v644_v60 = vadd.f32 %v6203_v26, %v643_v57 }
 0x1cd   : > { %v1598_v61 = vpop.f32.mrf.mxu2  ;;  %v729_v62 = vmax.f32 %v644_v60, 0.0  ;;  %5489 = vmatmul.msk.f32.vlgmr.msrb.gmra.mxu0 %vm833_vm1, %v952_v59  ;;  %v6567_v60 = vld [vmem:[#allocation2 + $0x28] sm:$0xff] }
 0x1ce   : > { %v1599_v63 = vadd.f32 %v1598_v61, %v1257_v52  ;;  %v1993_v1 = vpop.f32.mrf.mxu3  ;;  %v1260_v3 = vpop.f32.mrf.mxu1  ;;  %1924 = vmatpush.msrb.mxu0 %v6265_v15  ;;  %v992_v5 = vld [vmem:[#allocation2 + $0x148] sm:$0xff]  ;;  %v6535_v15 = vld [vmem:[%s8192_s2] ss:$0 sm:$0xff] }
 0x1cf   : > { %v6523_v2 = vadd.f32 %v1993_v1, %v1596_v49  ;;  %v817_v4 = vmul.f32 %v6230_v58, %v729_v62  ;;  %v936_v7 = vld [vmem:[#allocation2 + $0x147] sm:$0xff] }
 0x1d0   : > { %1925 = vmatpush.msrb.mxu0 %v6272_v17  ;;  %v1730_v26 = vld [vmem:[#allocation2 + $0x141] sm:$0xff] }
 0x1d1   : > { %880 = vst.msk [vmem:[#allocation2 + $0x150] sm:$0xff] %vm833_vm1, %v817_v4  ;;  %5529 = vmatmul.msk.f32.gmra.mxu1 %vm833_vm1, %v992_v5 }
 0x1d2   : > { %5583 = vmatmul.msk.f32.gmra.mxu2 %vm833_vm1, %v936_v7  ;;  %v646_v8 = vpop.f32.mrf.mxu0 }
 0x1d3   : > { %5638 = vmatmul.msk.f32.gmra.mxu3 %vm833_vm1, %v1730_v26  ;;  %v647_v10 = vadd.f32 %v6535_v15, %v646_v8 }
 0x1d5   : > { %v1601_v11 = vpop.f32.mrf.mxu2  ;;  %v730_v17 = vmax.f32 %v647_v10, 0.0  ;;  %5490 = vmatmul.msk.f32.gmra.mxu0 %vm833_vm1, %v953_v9 }
 0x1d6   : > { %v1602_v12 = vadd.f32 %v1601_v11, %v1260_v3  ;;  %v1996_v14 = vpop.f32.mrf.mxu3  ;;  %v1263_v18 = vpop.f32.mrf.mxu1  ;;  %v6579_v11 = vld [vmem:[#allocation2 + $0x30] sm:$0xff] }
 0x1d7   : > { %v6539_v16 = vadd.f32 %v1996_v14, %v1599_v63  ;;  %v818_v19 = vmul.f32 %v6219_v47, %v730_v17 }
 0x1d8   : > { %v993_v20 = vld [vmem:[#allocation2 + $0x150] sm:$0xff] }
 0x1d9   : > { %v937_v22 = vld [vmem:[#allocation2 + $0x14f] sm:$0xff]  ;;  %881 = vst.msk [vmem:[#allocation2 + $0x158] sm:$0xff] %vm833_vm1, %v818_v19  ;;  %5530 = vmatmul.msk.f32.gmra.mxu1 %vm833_vm1, %v993_v20 }
 0x1da   : > { %v1731_v23 = vld [vmem:[#allocation2 + $0x149] sm:$0xff]  ;;  %5584 = vmatmul.msk.f32.gmra.mxu2 %vm833_vm1, %v937_v22  ;;  %v649_v24 = vpop.f32.mrf.mxu0 }
 0x1db   : > { %5639 = vmatmul.msk.f32.gmra.mxu3 %vm833_vm1, %v1731_v23  ;;  %v650_v27 = vadd.f32 %v6535_v15, %v649_v24 }
 0x1dd   : > { %v1604_v28 = vpop.f32.mrf.mxu2  ;;  %v731_v30 = vmax.f32 %v650_v27, 0.0  ;;  %5491 = vmatmul.msk.f32.gmra.mxu0 %vm833_vm1, %v954_v25 }
 0x1de   : > { %v1605_v31 = vadd.f32 %v1604_v28, %v1263_v18  ;;  %v1999_v32 = vpop.f32.mrf.mxu3  ;;  %v1266_v34 = vpop.f32.mrf.mxu1  ;;  %v6590_v28 = vld [vmem:[#allocation2 + $0x38] sm:$0xff] }
 0x1df   : > { %v6548_v33 = vadd.f32 %v1999_v32, %v1602_v12  ;;  %882 = vst.msk [vmem:[#allocation2 + $0x160] sm:$0xff] %vm833_vm1, %v731_v30 }
 0x1e0   : > { %v994_v35 = vld [vmem:[#allocation2 + $0x158] sm:$0xff] }
 0x1e1   : > { %v938_v37 = vld [vmem:[#allocation2 + $0x157] sm:$0xff]  ;;  %5531 = vmatmul.msk.f32.gmra.mxu1 %vm833_vm1, %v994_v35 }
 0x1e2   : > { %v1732_v38 = vld [vmem:[#allocation2 + $0x151] sm:$0xff]  ;;  %5585 = vmatmul.msk.f32.gmra.mxu2 %vm833_vm1, %v938_v37  ;;  %v652_v39 = vpop.f32.mrf.mxu0 }
 0x1e3   : > { %5640 = vmatmul.msk.f32.gmra.mxu3 %vm833_vm1, %v1732_v38  ;;  %v653_v40 = vadd.f32 %v6535_v15, %v652_v39 }
 0x1e5   : > { %v1607_v42 = vpop.f32.mrf.mxu2  ;;  %v732_v44 = vmax.f32 %v653_v40, 0.0  ;;  %5492 = vmatmul.msk.f32.gmra.mxu0 %vm833_vm1, %v6555_v43 }
 0x1e6   : > { %v1608_v45 = vadd.f32 %v1607_v42, %v1266_v34  ;;  %v2002_v46 = vpop.f32.mrf.mxu3  ;;  %v1269_v49 = vpop.f32.mrf.mxu1  ;;  %v995_v52 = vld [vmem:[#allocation2 + $0x160] sm:$0xff] }
 0x1e7   : > { %v6559_v48 = vadd.f32 %v2002_v46, %v1605_v31  ;;  %v820_v50 = vmul.f32 %v6230_v58, %v732_v44  ;;  %v939_v53 = vld [vmem:[#allocation2 + $0x15f] sm:$0xff] }
 0x1e8   : > { %v1733_v54 = vld [vmem:[#allocation2 + $0x159] sm:$0xff] }
 0x1e9   : > { %883 = vst.msk [vmem:[#allocation2 + $0x168] sm:$0xff] %vm833_vm1, %v820_v50  ;;  %5532 = vmatmul.msk.f32.gmra.mxu1 %vm833_vm1, %v995_v52  ;;  %v6602_v46 = vld [vmem:[#allocation2 + $0x40] sm:$0xff] }
 0x1ea   : > { %5586 = vmatmul.msk.f32.gmra.mxu2 %vm833_vm1, %v939_v53  ;;  %v655_v56 = vpop.f32.mrf.mxu0 }
 0x1eb   : > { %5641 = vmatmul.msk.f32.gmra.mxu3 %vm833_vm1, %v1733_v54  ;;  %v656_v57 = vadd.f32 %v6535_v15, %v655_v56 }
 0x1ed   : > { %v1610_v59 = vpop.f32.mrf.mxu2  ;;  %v733_v61 = vmax.f32 %v656_v57, 0.0  ;;  %5493 = vmatmul.msk.f32.gmra.mxu0 %vm833_vm1, %v6567_v60  ;;  %v5765_v57 = vld [vmem:[%s8193_s3 + $0x50] sm:$0xff] }
 0x1ee   : > { %v1611_v62 = vadd.f32 %v1610_v59, %v1269_v49  ;;  %v2005_v63 = vpop.f32.mrf.mxu3  ;;  %v1272_v3 = vpop.f32.mrf.mxu1  ;;  %3281 = vmatpush.msrb.mxu3 %v5765_v57 }
 0x1ef   : > { %v6571_v1 = vadd.f32 %v2005_v63, %v1608_v45  ;;  %v821_v4 = vmul.f32 %v6219_v47, %v733_v61 }
 0x1f0   : > { %v996_v5 = vld [vmem:[#allocation2 + $0x168] sm:$0xff] }
 0x1f1   : > { %v940_v7 = vld [vmem:[#allocation2 + $0x167] sm:$0xff]  ;;  %884 = vst.msk [vmem:[#allocation2 + $0x170] sm:$0xff] %vm833_vm1, %v821_v4  ;;  %5533 = vmatmul.msk.f32.gmra.mxu1 %vm833_vm1, %v996_v5 }
 0x1f2   : > { %v1734_v26 = vld [vmem:[#allocation2 + $0x161] sm:$0xff]  ;;  %5587 = vmatmul.msk.f32.gmra.mxu2 %vm833_vm1, %v940_v7  ;;  %v658_v8 = vpop.f32.mrf.mxu0 }
 0x1f3   : > { %5642 = vmatmul.msk.f32.gmra.mxu3 %vm833_vm1, %v1734_v26  ;;  %v659_v9 = vadd.f32 %v6535_v15, %v658_v8  ;;  %v6617_v5 = vld [vmem:[#allocation2 + $0x48] sm:$0xff] }
 0x1f5   : > { %v1613_v10 = vpop.f32.mrf.mxu2  ;;  %v734_v17 = vmax.f32 %v659_v9, 0.0  ;;  %5494 = vmatmul.msk.f32.gmra.mxu0 %vm833_vm1, %v6579_v11 }
 0x1f6   : > { %v1614_v12 = vadd.f32 %v1613_v10, %v1272_v3  ;;  %v2008_v14 = vpop.f32.mrf.mxu3  ;;  %v1275_v19 = vpop.f32.mrf.mxu1 }
 0x1f7   : > { %v6583_v18 = vadd.f32 %v2008_v14, %v1611_v62  ;;  %885 = vst.msk [vmem:[#allocation2 + $0x178] sm:$0xff] %vm833_vm1, %v734_v17 }
 0x1f8   : > { %v997_v20 = vld [vmem:[#allocation2 + $0x170] sm:$0xff] }
 0x1f9   : > { %v941_v22 = vld [vmem:[#allocation2 + $0x16f] sm:$0xff]  ;;  %5534 = vmatmul.msk.f32.gmra.mxu1 %vm833_vm1, %v997_v20 }
 0x1fa   : > { %v1735_v23 = vld [vmem:[#allocation2 + $0x169] sm:$0xff]  ;;  %5588 = vmatmul.msk.f32.gmra.mxu2 %vm833_vm1, %v941_v22  ;;  %v661_v24 = vpop.f32.mrf.mxu0 }
 0x1fb   : > { %5643 = vmatmul.msk.f32.gmra.mxu3 %vm833_vm1, %v1735_v23  ;;  %v662_v25 = vadd.f32 %v6535_v15, %v661_v24  ;;  %v6628_v23 = vld [vmem:[#allocation2 + $0x50] sm:$0xff] }
 0x1fd   : > { %v1616_v27 = vpop.f32.mrf.mxu2  ;;  %v735_v30 = vmax.f32 %v662_v25, 0.0  ;;  %5495 = vmatmul.msk.f32.gmra.mxu0 %vm833_vm1, %v6590_v28 }
 0x1fe   : > { %v1617_v31 = vadd.f32 %v1616_v27, %v1275_v19  ;;  %v2011_v32 = vpop.f32.mrf.mxu3  ;;  %v1278_v35 = vpop.f32.mrf.mxu1  ;;  %v998_v38 = vld [vmem:[#allocation2 + $0x178] sm:$0xff] }
 0x1ff   : > { %v6594_v34 = vadd.f32 %v2011_v32, %v1614_v12  ;;  %v823_v37 = vmul.f32 %v6230_v58, %v735_v30  ;;  %v942_v39 = vld [vmem:[#allocation2 + $0x177] sm:$0xff] }
 0x200   : > { %v1736_v40 = vld [vmem:[#allocation2 + $0x171] sm:$0xff] }
 0x201   : > { %886 = vst.msk [vmem:[#allocation2 + $0x180] sm:$0xff] %vm833_vm1, %v823_v37  ;;  %5535 = vmatmul.msk.f32.gmra.mxu1 %vm833_vm1, %v998_v38 }
 0x202   : > { %5589 = vmatmul.msk.f32.gmra.mxu2 %vm833_vm1, %v942_v39  ;;  %v664_v42 = vpop.f32.mrf.mxu0 }
 0x203   : > { %5644 = vmatmul.msk.f32.gmra.mxu3 %vm833_vm1, %v1736_v40  ;;  %v665_v44 = vadd.f32 %v6535_v15, %v664_v42 }
 0x205   : > { %v1619_v45 = vpop.f32.mrf.mxu2  ;;  %v736_v49 = vmax.f32 %v665_v44, 0.0  ;;  %5496 = vmatmul.msk.f32.gmra.mxu0 %vm833_vm1, %v6602_v46  ;;  %v6640_v44 = vld [vmem:[#allocation2 + $0x58] sm:$0xff] }
 0x206   : > { %v1620_v50 = vadd.f32 %v1619_v45, %v1278_v35  ;;  %v2014_v52 = vpop.f32.mrf.mxu3  ;;  %v1281_v54 = vpop.f32.mrf.mxu1 }
 0x207   : > { %v6606_v53 = vadd.f32 %v2014_v52, %v1617_v31  ;;  %v824_v56 = vmul.f32 %v6219_v47, %v736_v49 }
 0x208   : > { %v999_v59 = vld [vmem:[#allocation2 + $0x180] sm:$0xff] }
 0x209   : > { %v943_v61 = vld [vmem:[#allocation2 + $0x17f] sm:$0xff]  ;;  %887 = vst.msk [vmem:[#allocation2 + $0x188] sm:$0xff] %vm833_vm1, %v824_v56  ;;  %5536 = vmatmul.msk.f32.gmra.mxu1 %vm833_vm1, %v999_v59 }
 0x20a   : > { %v1737_v62 = vld [vmem:[#allocation2 + $0x179] sm:$0xff]  ;;  %5590 = vmatmul.msk.f32.gmra.mxu2 %vm833_vm1, %v943_v61  ;;  %v667_v63 = vpop.f32.mrf.mxu0 }
 0x20b   : > { %5645 = vmatmul.msk.f32.gmra.mxu3 %vm833_vm1, %v1737_v62  ;;  %v668_v3 = vadd.f32 %v6535_v15, %v667_v63  ;;  %v5934_v63 = vld [vmem:[%s8193_s3 + $0x88] sm:$0xff] }
 0x20c   : > { %4636 = vmatpush.msra.mxu2 %v5934_v63 }
 0x20d   : > { %v1622_v4 = vpop.f32.mrf.mxu2  ;;  %v737_v7 = vmax.f32 %v668_v3, 0.0  ;;  %5497 = vmatmul.msk.f32.gmra.mxu0 %vm833_vm1, %v6617_v5 }
 0x20e   : > { %v1623_v26 = vadd.f32 %v1622_v4, %v1281_v54  ;;  %v2017_v8 = vpop.f32.mrf.mxu3  ;;  %v1284_v10 = vpop.f32.mrf.mxu1  ;;  %v6655_v4 = vld [vmem:[#allocation2 + $0x60] sm:$0xff] }
 0x20f   : > { %v6621_v9 = vadd.f32 %v2017_v8, %v1620_v50  ;;  %888 = vst.msk [vmem:[#allocation2 + $0x190] sm:$0xff] %vm833_vm1, %v737_v7 }
 0x210   : > { %v1000_v17 = vld [vmem:[#allocation2 + $0x188] sm:$0xff] }
 0x211   : > { %v944_v12 = vld [vmem:[#allocation2 + $0x187] sm:$0xff]  ;;  %5537 = vmatmul.msk.f32.gmra.mxu1 %vm833_vm1, %v1000_v17 }
 0x212   : > { %v1738_v14 = vld [vmem:[#allocation2 + $0x181] sm:$0xff]  ;;  %5591 = vmatmul.msk.f32.gmra.mxu2 %vm833_vm1, %v944_v12  ;;  %v670_v19 = vpop.f32.mrf.mxu0 }
 0x213   : > { %5646 = vmatmul.msk.f32.gmra.mxu3 %vm833_vm1, %v1738_v14  ;;  %v671_v20 = vadd.f32 %v6535_v15, %v670_v19 }
 0x215   : > { %v1625_v22 = vpop.f32.mrf.mxu2  ;;  %v738_v24 = vmax.f32 %v671_v20, 0.0  ;;  %5498 = vmatmul.msk.f32.gmra.mxu0 %vm833_vm1, %v6628_v23  ;;  %v5878_v20 = vld [vmem:[%s8193_s3 + $0x78] sm:$0xff] }
 0x216   : > { %v1626_v25 = vadd.f32 %v1625_v22, %v1284_v10  ;;  %v2020_v27 = vpop.f32.mrf.mxu3  ;;  %v1287_v31 = vpop.f32.mrf.mxu1  ;;  %v1001_v35 = vld [vmem:[#allocation2 + $0x190] sm:$0xff]  ;;  %4184 = vmatpush.msra.mxu1 %v5878_v20 }
 0x217   : > { %v6632_v30 = vadd.f32 %v2020_v27, %v1623_v26  ;;  %v826_v32 = vmul.f32 %v6230_v58, %v738_v24  ;;  %v945_v37 = vld [vmem:[#allocation2 + $0x18f] sm:$0xff] }
 0x218   : > { %v1739_v38 = vld [vmem:[#allocation2 + $0x189] sm:$0xff] }
 0x219   : > { %889 = vst.msk [vmem:[#allocation2 + $0x198] sm:$0xff] %vm833_vm1, %v826_v32  ;;  %5538 = vmatmul.msk.f32.gmra.mxu1 %vm833_vm1, %v1001_v35  ;;  %v6669_v27 = vld [vmem:[#allocation2 + $0x68] sm:$0xff] }
 0x21a   : > { %5592 = vmatmul.msk.f32.gmra.mxu2 %vm833_vm1, %v945_v37  ;;  %v673_v39 = vpop.f32.mrf.mxu0 }
 0x21b   : > { %5647 = vmatmul.msk.f32.gmra.mxu3 %vm833_vm1, %v1739_v38  ;;  %v674_v40 = vadd.f32 %v6535_v15, %v673_v39 }
 0x21d   : > { %v1628_v42 = vpop.f32.mrf.mxu2  ;;  %v739_v45 = vmax.f32 %v674_v40, 0.0  ;;  %5499 = vmatmul.msk.f32.gmra.mxu0 %vm833_vm1, %v6640_v44 }
 0x21e   : > { %v1629_v49 = vadd.f32 %v1628_v42, %v1287_v31  ;;  %v2023_v50 = vpop.f32.mrf.mxu3  ;;  %v1290_v54 = vpop.f32.mrf.mxu1 }
 0x21f   : > { %v6644_v52 = vadd.f32 %v2023_v50, %v1626_v25  ;;  %v827_v56 = vmul.f32 %v6219_v47, %v739_v45  ;;  %v896_v50 = vld [vmem:[#allocation2 + $0x7] sm:$0xff] }
 0x220   : > { %v1002_v57 = vld [vmem:[#allocation2 + $0x198] sm:$0xff] }
 0x221   : > { %v946_v59 = vld [vmem:[#allocation2 + $0x197] sm:$0xff]  ;;  %890 = vst.msk [vmem:[#allocation2 + $0x1a0] sm:$0xff] %vm833_vm1, %v827_v56  ;;  %5539 = vmatmul.msk.f32.gmra.mxu1 %vm833_vm1, %v1002_v57 }
 0x222   : > { %v1740_v61 = vld [vmem:[#allocation2 + $0x191] sm:$0xff]  ;;  %5593 = vmatmul.msk.f32.gmra.mxu2 %vm833_vm1, %v946_v59  ;;  %v676_v62 = vpop.f32.mrf.mxu0 }
 0x223   : > { %5648 = vmatmul.msk.f32.gmra.mxu3 %vm833_vm1, %v1740_v61  ;;  %v677_v3 = vadd.f32 %v6535_v15, %v676_v62 }
 0x225   : > { %v1631_v47 = vpop.f32.mrf.mxu2  ;;  %v740_v7 = vmax.f32 %v677_v3, 0.0  ;;  %5500 = vmatmul.msk.f32.gmra.mxu0 %vm833_vm1, %v6655_v4 }
 0x226   : > { %v1632_v26 = vadd.f32 %v1631_v47, %v1290_v54  ;;  %v2026_v8 = vpop.f32.mrf.mxu3  ;;  %v1293_v17 = vpop.f32.mrf.mxu1 }
 0x227   : > { %v6659_v10 = vadd.f32 %v2026_v8, %v1629_v49  ;;  %891 = vst.msk [vmem:[#allocation2 + $0x1a8] sm:$0xff] %vm833_vm1, %v740_v7  ;;  %v897_v8 = vld [vmem:[#allocation2 + $0xf] sm:$0xff] }
 0x228   : > { %v1003_v12 = vld [vmem:[#allocation2 + $0x1a0] sm:$0xff] }
 0x229   : > { %v947_v14 = vld [vmem:[#allocation2 + $0x19f] sm:$0xff]  ;;  %5540 = vmatmul.msk.f32.gmra.mxu1 %vm833_vm1, %v1003_v12 }
 0x22a   : > { %v1741_v19 = vld [vmem:[#allocation2 + $0x199] sm:$0xff]  ;;  %5594 = vmatmul.msk.f32.gmra.mxu2 %vm833_vm1, %v947_v14  ;;  %v679_v22 = vpop.f32.mrf.mxu0 }
 0x22b   : > { %5649 = vmatmul.msk.f32.gmra.mxu3 %vm833_vm1, %v1741_v19  ;;  %v680_v24 = vadd.f32 %v6535_v15, %v679_v22 }
 0x22d   : > { %v1634_v25 = vpop.f32.mrf.mxu2  ;;  %v741_v31 = vmax.f32 %v680_v24, 0.0  ;;  %5501 = vmatmul.msk.f32.gmra.mxu0 %vm833_vm1, %v6669_v27 }
 0x22e   : > { %v1635_v32 = vadd.f32 %v1634_v25, %v1293_v17  ;;  %v2029_v35 = vpop.f32.mrf.mxu3  ;;  %v1296_v38 = vpop.f32.mrf.mxu1  ;;  %v1004_v40 = vld [vmem:[#allocation2 + $0x1a8] sm:$0xff] }
 0x22f   : > { %v6673_v37 = vadd.f32 %v2029_v35, %v1632_v26  ;;  %v829_v39 = vmul.f32 %v6230_v58, %v741_v31  ;;  %v948_v42 = vld [vmem:[#allocation2 + $0x1a7] sm:$0xff] }
 0x230   : > { %v1742_v45 = vld [vmem:[#allocation2 + $0x1a1] sm:$0xff] }
 0x231   : > { %892 = vst.msk [vmem:[#allocation2 + $0x1b0] sm:$0xff] %vm833_vm1, %v829_v39  ;;  %5541 = vmatmul.msk.f32.gmra.mxu1 %vm833_vm1, %v1004_v40 }
 0x232   : > { %5595 = vmatmul.msk.f32.gmra.mxu2 %vm833_vm1, %v948_v42  ;;  %v682_v49 = vpop.f32.mrf.mxu0 }
 0x233   : > { %5650 = vmatmul.msk.f32.gmra.mxu3 %vm833_vm1, %v1742_v45  ;;  %v683_v54 = vadd.f32 %v6535_v15, %v682_v49 }
 0x235   : > { %v1637_v56 = vpop.f32.mrf.mxu2  ;;  %v742_v57 = vmax.f32 %v683_v54, 0.0  ;;  %5543 = vmatmul.msk.f32.vlgmr.msra.gmra.mxu0 %vm833_vm1, %v896_v50 }
 0x236   : > { %v1638_v59 = vadd.f32 %v1637_v56, %v1296_v38  ;;  %v2032_v61 = vpop.f32.mrf.mxu3  ;;  %v1299_v62 = vpop.f32.mrf.mxu1  ;;  %v898_v38 = vld [vmem:[#allocation2 + $0x17] sm:$0xff] }
 0x237   : > { %v6682_v58 = vadd.f32 %v2032_v61, %v1635_v32  ;;  %v830_v63 = vmul.f32 0.0, %v742_v57  ;;  %v2143_v32 = vld [vmem:[#allocation2 + $0x1f] sm:$0xff]  ;;  %v2144_v57 = vld [vmem:[#allocation2 + $0x27] sm:$0xff] }
 0x238   : > { %v1005_v3 = vld [vmem:[#allocation2 + $0x1b0] sm:$0xff] }
 0x239   : > { %v949_v47 = vld [vmem:[#allocation2 + $0x1af] sm:$0xff]  ;;  %893 = vst.msk [vmem:[#allocation2 + $0x1b8] sm:$0xff] %vm833_vm1, %v830_v63  ;;  %5542 = vmatmul.msk.f32.gmra.mxu1 %vm833_vm1, %v1005_v3 }
 0x23a   : > { %v1743_v7 = vld [vmem:[#allocation2 + $0x1a9] sm:$0xff]  ;;  %5596 = vmatmul.msk.f32.gmra.mxu2 %vm833_vm1, %v949_v47  ;;  %v685_v26 = vpop.f32.mrf.mxu0 }
 0x23b   : > { %5651 = vmatmul.msk.f32.gmra.mxu3 %vm833_vm1, %v1743_v7  ;;  %v686_v17 = vadd.f32 %v6535_v15, %v685_v26  ;;  %v2145_v47 = vld [vmem:[#allocation2 + $0x2f] sm:$0xff] }
 0x23d   : > { %v1640_v12 = vpop.f32.mrf.mxu2  ;;  %v743_v14 = vmax.f32 %v686_v17, 0.0  ;;  %5544 = vmatmul.msk.f32.gmra.mxu0 %vm833_vm1, %v897_v8 }
 0x23e   : > { %v1641_v19 = vadd.f32 %v1640_v12, %v1299_v62  ;;  %v2035_v20 = vpop.f32.mrf.mxu3  ;;  %v1302_v24 = vpop.f32.mrf.mxu1 }
 0x23f   : > { %v6690_v22 = vadd.f32 %v2035_v20, %v1638_v59  ;;  %v831_v25 = vmul.f32 0.0, %v743_v14 }
 0x240   : > { %v1744_v31 = vld [vmem:[#allocation2 + $0x1b1] sm:$0xff] }
 0x241   : > { %894 = vst.msk [vmem:[#allocation2 + $0x1c0] sm:$0xff] %vm833_vm1, %v831_v25  ;;  %5655 = vmatmul.msk.f32.vlgmr.msrb.gmra.mxu1 %vm833_vm1, %v2143_v32 }
 0x242   : > { %5711 = vmatmul.msk.f32.vlgmr.msrb.gmra.mxu2 %vm833_vm1, %v6555_v43  ;;  %v688_v35 = vpop.f32.mrf.mxu0  ;;  %v6705_v43 = vld [vmem:[#allocation2 + $0x21] sm:$0xff] }
 0x243   : > { %5652 = vmatmul.msk.f32.gmra.mxu3 %vm833_vm1, %v1744_v31  ;;  %v689_v39 = vadd.f32 %v6535_v15, %v688_v35 }
 0x245   : > { %v1643_v40 = vpop.f32.mrf.mxu2  ;;  %v744_v42 = vmax.f32 %v689_v39, 0.0  ;;  %5545 = vmatmul.msk.f32.gmra.mxu0 %vm833_vm1, %v898_v38  ;;  %v6741_v38 = vld [vmem:[#allocation2 + $0x3f] sm:$0xff] }
 0x246   : > { %v1644_v45 = vadd.f32 %v1643_v40, %v1302_v24  ;;  %v2038_v49 = vpop.f32.mrf.mxu3  ;;  %v1305_v54 = vpop.f32.mrf.mxu1 }
 0x247   : > { %v6699_v50 = vadd.f32 %v2038_v49, %v1641_v19  ;;  %v832_v56 = vmul.f32 0.0, %v744_v42  ;;  %v6726_v19 = vld [vmem:[#allocation2 + $0x37] sm:$0xff] }
 0x249   : > { %895 = vst.msk [vmem:[#allocation2 + $0x1c8] sm:$0xff] %vm833_vm1, %v832_v56  ;;  %5656 = vmatmul.msk.f32.gmra.mxu1 %vm833_vm1, %v2144_v57  ;;  %v6757_v56 = vld [vmem:[#allocation2 + $0x47] sm:$0xff] }
 0x24a   : > { %5712 = vmatmul.msk.f32.gmra.mxu2 %vm833_vm1, %v6567_v60  ;;  %v6709_v15 = vpop.f32.mrf.mxu0  ;;  %v6717_v60 = vld [vmem:[#allocation2 + $0x29] sm:$0xff] }
 0x24b   : > { %5767 = vmatmul.msk.f32.vlgmr.msrb.gmra.mxu3 %vm833_vm1, %v6705_v43  ;;  %8198 = vst [vmem:[#allocation3_spill] sm:$0xff] %v6709_v15 }
 0x24d   : > { %v1646_v59 = vpop.f32.mrf.mxu2  ;;  %5546 = vmatmul.msk.f32.gmra.mxu0 %vm833_vm1, %v2143_v32 }
 0x24e   : > { %v1647_v61 = vadd.f32 %v1646_v59, %v1305_v54  ;;  %v2041_v62 = vpop.f32.mrf.mxu3  ;;  %v1308_v3 = vpop.f32.mrf.mxu1 }
 0x24f   : > { %v6712_v63 = vadd.f32 %v2041_v62, %v1644_v45 }
 0x251   : > { %5657 = vmatmul.msk.f32.gmra.mxu1 %vm833_vm1, %v2145_v47 }
 0x252   : > { %5713 = vmatmul.msk.f32.gmra.mxu2 %vm833_vm1, %v6579_v11  ;;  %v6721_v7 = vpop.f32.mrf.mxu0  ;;  %v6732_v11 = vld [vmem:[#allocation2 + $0x31] sm:$0xff] }
 0x253   : > { %5768 = vmatmul.msk.f32.gmra.mxu3 %vm833_vm1, %v6717_v60  ;;  %8199 = vst [vmem:[#allocation4_spill] sm:$0xff] %v6721_v7  ;;  %v2606_v7 = vld [vmem:[#allocation2 + $0x78] sm:$0xff] }
 0x255   : > { %v1649_v26 = vpop.f32.mrf.mxu2  ;;  %5547 = vmatmul.msk.f32.gmra.mxu0 %vm833_vm1, %v2144_v57 }
 0x256   : > { %v1650_v8 = vadd.f32 %v1649_v26, %v1308_v3  ;;  %v2044_v17 = vpop.f32.mrf.mxu3  ;;  %v1311_v14 = vpop.f32.mrf.mxu1  ;;  %v6773_v26 = vld [vmem:[#allocation2 + $0x4f] sm:$0xff] }
 0x257   : > { %v6724_v12 = vadd.f32 %v2044_v17, %v1647_v61 }
 0x259   : > { %5658 = vmatmul.msk.f32.gmra.mxu1 %vm833_vm1, %v6726_v19 }
 0x25a   : > { %5714 = vmatmul.msk.f32.gmra.mxu2 %vm833_vm1, %v6590_v28  ;;  %v6736_v20 = vpop.f32.mrf.mxu0  ;;  %v6747_v28 = vld [vmem:[#allocation2 + $0x39] sm:$0xff] }
 0x25b   : > { %5769 = vmatmul.msk.f32.gmra.mxu3 %vm833_vm1, %v6732_v11  ;;  %8200 = vst [vmem:[#allocation5_spill] sm:$0xff] %v6736_v20  ;;  %v6852_v20 = vld [vmem:[#allocation2 + $0x77] sm:$0xff] }
 0x25d   : > { %v1652_v24 = vpop.f32.mrf.mxu2  ;;  %5548 = vmatmul.msk.f32.gmra.mxu0 %vm833_vm1, %v2145_v47 }
 0x25e   : > { %v1653_v25 = vadd.f32 %v1652_v24, %v1311_v14  ;;  %v2047_v31 = vpop.f32.mrf.mxu3  ;;  %v1314_v35 = vpop.f32.mrf.mxu1 }
 0x25f   : > { %v6739_v32 = vadd.f32 %v2047_v31, %v1650_v8 }
 0x261   : > { %5659 = vmatmul.msk.f32.gmra.mxu1 %vm833_vm1, %v6741_v38 }
 0x262   : > { %5715 = vmatmul.msk.f32.gmra.mxu2 %vm833_vm1, %v6602_v46  ;;  %v6751_v39 = vpop.f32.mrf.mxu0  ;;  %v6763_v46 = vld [vmem:[#allocation2 + $0x41] sm:$0xff] }
 0x263   : > { %5770 = vmatmul.msk.f32.gmra.mxu3 %vm833_vm1, %v6747_v28  ;;  %8201 = vst [vmem:[#allocation6_spill] sm:$0xff] %v6751_v39 }
 0x265   : > { %v1655_v40 = vpop.f32.mrf.mxu2  ;;  %5549 = vmatmul.msk.f32.gmra.mxu0 %vm833_vm1, %v6726_v19 }
 0x266   : > { %v1656_v42 = vadd.f32 %v1655_v40, %v1314_v35  ;;  %v2050_v45 = vpop.f32.mrf.mxu3  ;;  %v1317_v54 = vpop.f32.mrf.mxu1  ;;  %v6789_v35 = vld [vmem:[#allocation2 + $0x57] sm:$0xff] }
 0x267   : > { %v6755_v49 = vadd.f32 %v2050_v45, %v1653_v25 }
 0x269   : > { %5660 = vmatmul.msk.f32.gmra.mxu1 %vm833_vm1, %v6757_v56 }
 0x26a   : > { %5716 = vmatmul.msk.f32.gmra.mxu2 %vm833_vm1, %v6617_v5  ;;  %v6767_v57 = vpop.f32.mrf.mxu0  ;;  %v6779_v5 = vld [vmem:[#allocation2 + $0x49] sm:$0xff] }
 0x26b   : > { %5771 = vmatmul.msk.f32.gmra.mxu3 %vm833_vm1, %v6763_v46  ;;  %8202 = vst [vmem:[#allocation7_spill] sm:$0xff] %v6767_v57  ;;  %v2605_v57 = vld [vmem:[#allocation2 + $0x70] sm:$0xff] }
 0x26d   : > { %v1658_v59 = vpop.f32.mrf.mxu2  ;;  %5550 = vmatmul.msk.f32.gmra.mxu0 %vm833_vm1, %v6741_v38 }
 0x26e   : > { %v1659_v61 = vadd.f32 %v1658_v59, %v1317_v54  ;;  %v2053_v62 = vpop.f32.mrf.mxu3  ;;  %v1320_v47 = vpop.f32.mrf.mxu1 }
 0x26f   : > { %v6771_v3 = vadd.f32 %v2053_v62, %v1656_v42  ;;  %v6805_v62 = vld [vmem:[#allocation2 + $0x5f] sm:$0xff] }
 0x271   : > { %5661 = vmatmul.msk.f32.gmra.mxu1 %vm833_vm1, %v6773_v26 }
 0x272   : > { %5717 = vmatmul.msk.f32.gmra.mxu2 %vm833_vm1, %v6628_v23  ;;  %v6783_v8 = vpop.f32.mrf.mxu0  ;;  %v6795_v23 = vld [vmem:[#allocation2 + $0x51] sm:$0xff] }
 0x273   : > { %5772 = vmatmul.msk.f32.gmra.mxu3 %vm833_vm1, %v6779_v5  ;;  %8203 = vst [vmem:[#allocation8_spill] sm:$0xff] %v6783_v8  ;;  %v6837_v8 = vld [vmem:[#allocation2 + $0x6f] sm:$0xff] }
 0x275   : > { %v1661_v17 = vpop.f32.mrf.mxu2  ;;  %5551 = vmatmul.msk.f32.gmra.mxu0 %vm833_vm1, %v6757_v56 }
 0x276   : > { %v1662_v14 = vadd.f32 %v1661_v17, %v1320_v47  ;;  %v2056_v24 = vpop.f32.mrf.mxu3  ;;  %v1323_v31 = vpop.f32.mrf.mxu1 }
 0x277   : > { %v6787_v25 = vadd.f32 %v2056_v24, %v1659_v61 }
 0x279   : > { %8204 = vst [vmem:[#allocation9_spill] sm:$0xff] %v6787_v25  ;;  %5662 = vmatmul.msk.f32.gmra.mxu1 %vm833_vm1, %v6789_v35  ;;  %v2609_v25 = vld [vmem:[#allocation2 + $0x90] sm:$0xff] }
 0x27a   : > { %5718 = vmatmul.msk.f32.gmra.mxu2 %vm833_vm1, %v6640_v44  ;;  %v6799_v40 = vpop.f32.mrf.mxu0  ;;  %v6811_v44 = vld [vmem:[#allocation2 + $0x59] sm:$0xff] }
 0x27b   : > { %5773 = vmatmul.msk.f32.gmra.mxu3 %vm833_vm1, %v6795_v23  ;;  %8205 = vst [vmem:[#allocation10_spill] sm:$0xff] %v6799_v40 }
 0x27d   : > { %v1664_v42 = vpop.f32.mrf.mxu2  ;;  %5552 = vmatmul.msk.f32.gmra.mxu0 %vm833_vm1, %v6773_v26 }
 0x27e   : > { %v1665_v45 = vadd.f32 %v1664_v42, %v1323_v31  ;;  %v2059_v54 = vpop.f32.mrf.mxu3  ;;  %v1326_v61 = vpop.f32.mrf.mxu1 }
 0x27f   : > { %v6803_v59 = vadd.f32 %v2059_v54, %v1662_v14  ;;  %v6821_v54 = vld [vmem:[#allocation2 + $0x67] sm:$0xff] }
 0x281   : > { %8206 = vst [vmem:[#allocation11_spill] sm:$0xff] %v6803_v59  ;;  %5663 = vmatmul.msk.f32.gmra.mxu1 %vm833_vm1, %v6805_v62  ;;  %v2608_v59 = vld [vmem:[#allocation2 + $0x88] sm:$0xff] }
 0x282   : > { %5719 = vmatmul.msk.f32.gmra.mxu2 %vm833_vm1, %v6655_v4  ;;  %v6815_v47 = vpop.f32.mrf.mxu0  ;;  %v6827_v4 = vld [vmem:[#allocation2 + $0x61] sm:$0xff] }
 0x283   : > { %5774 = vmatmul.msk.f32.gmra.mxu3 %vm833_vm1, %v6811_v44  ;;  %8207 = vst [vmem:[#allocation12_spill] sm:$0xff] %v6815_v47 }
 0x285   : > { %v1667_v17 = vpop.f32.mrf.mxu2  ;;  %5553 = vmatmul.msk.f32.gmra.mxu0 %vm833_vm1, %v6789_v35 }
 0x286   : > { %v1668_v24 = vadd.f32 %v1667_v17, %v1326_v61  ;;  %v2062_v14 = vpop.f32.mrf.mxu3  ;;  %v1329_v42 = vpop.f32.mrf.mxu1 }
 0x287   : > { %v6819_v31 = vadd.f32 %v2062_v14, %v1665_v45 }
 0x289   : > { %8208 = vst [vmem:[#allocation13_spill] sm:$0xff] %v6819_v31  ;;  %5664 = vmatmul.msk.f32.gmra.mxu1 %vm833_vm1, %v6821_v54  ;;  %v2607_v31 = vld [vmem:[#allocation2 + $0x80] sm:$0xff] }
 0x28a   : > { %5720 = vmatmul.msk.f32.gmra.mxu2 %vm833_vm1, %v6669_v27  ;;  %v6831_v61 = vpop.f32.mrf.mxu0  ;;  %v6842_v27 = vld [vmem:[#allocation2 + $0x69] sm:$0xff] }
 0x28b   : > { %5775 = vmatmul.msk.f32.gmra.mxu3 %vm833_vm1, %v6827_v4  ;;  %8209 = vst [vmem:[#allocation14_spill] sm:$0xff] %v6831_v61 }
 0x28d   : > { %v1670_v17 = vpop.f32.mrf.mxu2  ;;  %5554 = vmatmul.msk.f32.gmra.mxu0 %vm833_vm1, %v6805_v62 }
 0x28e   : > { %v1671_v47 = vadd.f32 %v1670_v17, %v1329_v42  ;;  %v2065_v45 = vpop.f32.mrf.mxu3  ;;  %v1332_v40 = vpop.f32.mrf.mxu1 }
 0x28f   : > { %v6835_v14 = vadd.f32 %v2065_v45, %v1668_v24 }
 0x291   : > { %8210 = vst [vmem:[#allocation15_spill] sm:$0xff] %v6835_v14  ;;  %5665 = vmatmul.msk.f32.gmra.mxu1 %vm833_vm1, %v6837_v8 }
 0x292   : > { %5721 = vmatmul.msk.f32.gmra.mxu2 %vm833_vm1, %v2605_v57  ;;  %v6846_v42 = vpop.f32.mrf.mxu0  ;;  %v3057_v57 = vld [vmem:[#allocation2 + $0x71] sm:$0xff] }
 0x293   : > { %5776 = vmatmul.msk.f32.gmra.mxu3 %vm833_vm1, %v6842_v27  ;;  %8211 = vst [vmem:[#allocation16_spill] sm:$0xff] %v6846_v42 }
 0x295   : > { %v1673_v17 = vpop.f32.mrf.mxu2  ;;  %5555 = vmatmul.msk.f32.gmra.mxu0 %vm833_vm1, %v6821_v54 }
 0x296   : > { %v1674_v61 = vadd.f32 %v1673_v17, %v1332_v40  ;;  %v2068_v24 = vpop.f32.mrf.mxu3  ;;  %v1335_v39 = vpop.f32.mrf.mxu1  ;;  %v1691_v40 = vld [vmem:[#allocation2 + $0x9] sm:$0xff] }
 0x297   : > { %v6850_v45 = vadd.f32 %v2068_v24, %v1671_v47 }
 0x299   : > { %8212 = vst [vmem:[#allocation17_spill] sm:$0xff] %v6850_v45  ;;  %5666 = vmatmul.msk.f32.gmra.mxu1 %vm833_vm1, %v6852_v20  ;;  %v6863_v45 = vld [vmem:[#allocation2 + $0x7f] sm:$0xff] }
 0x29a   : > { %5722 = vmatmul.msk.f32.gmra.mxu2 %vm833_vm1, %v2606_v7  ;;  %v6858_v42 = vpop.f32.mrf.mxu0  ;;  %v3058_v7 = vld [vmem:[#allocation2 + $0x79] sm:$0xff] }
 0x29b   : > { %5777 = vmatmul.msk.f32.gmra.mxu3 %vm833_vm1, %v3057_v57  ;;  %8213 = vst [vmem:[#allocation18_spill] sm:$0xff] %v6858_v42 }
 0x29d   : > { %v1676_v17 = vpop.f32.mrf.mxu2  ;;  %5599 = vmatmul.msk.f32.vlgmr.msrb.gmra.mxu0 %vm833_vm1, %v1691_v40 }
 0x29e   : > { %v1677_v15 = vadd.f32 %v1676_v17, %v1335_v39  ;;  %v2071_v14 = vpop.f32.mrf.mxu3  ;;  %v1338_v24 = vpop.f32.mrf.mxu1  ;;  %v1692_v39 = vld [vmem:[#allocation2 + $0x11] sm:$0xff] }
 0x29f   : > { %v6861_v47 = vadd.f32 %v2071_v14, %v1674_v61 }
 0x2a1   : > { %8214 = vst [vmem:[#allocation19_spill] sm:$0xff] %v6861_v47  ;;  %5667 = vmatmul.msk.f32.gmra.mxu1 %vm833_vm1, %v6863_v45  ;;  %v6874_v47 = vld [vmem:[#allocation2 + $0x87] sm:$0xff] }
 0x2a2   : > { %5723 = vmatmul.msk.f32.gmra.mxu2 %vm833_vm1, %v2607_v31  ;;  %v6869_v57 = vpop.f32.mrf.mxu0  ;;  %v3059_v31 = vld [vmem:[#allocation2 + $0x81] sm:$0xff] }
 0x2a3   : > { %5778 = vmatmul.msk.f32.gmra.mxu3 %vm833_vm1, %v3058_v7  ;;  %8215 = vst [vmem:[#allocation20_spill] sm:$0xff] %v6869_v57 }
 0x2a5   : > { %v1679_v17 = vpop.f32.mrf.mxu2  ;;  %5600 = vmatmul.msk.f32.gmra.mxu0 %vm833_vm1, %v1692_v39  ;;  %v1693_v39 = vld [vmem:[#allocation2 + $0x19] sm:$0xff] }
 0x2a6   : > { %v1680_v42 = vadd.f32 %v1679_v17, %v1338_v24  ;;  %v2074_v40 = vpop.f32.mrf.mxu3  ;;  %v1341_v14 = vpop.f32.mrf.mxu1  ;;  %v4968_v24 = vld [vmem:[%s8195_s5 + $0x8] sm:$0xff] }
 0x2a7   : > { %v6872_v61 = vadd.f32 %v2074_v40, %v1677_v15  ;;  %5149 = vmatpush.msra.mxu3 %v4968_v24 }
 0x2a9   : > { %8216 = vst [vmem:[#allocation21_spill] sm:$0xff] %v6872_v61  ;;  %5668 = vmatmul.msk.f32.gmra.mxu1 %vm833_vm1, %v6874_v47 }
 0x2aa   : > { %5724 = vmatmul.msk.f32.gmra.mxu2 %vm833_vm1, %v2608_v59  ;;  %v6880_v7 = vpop.f32.mrf.mxu0  ;;  %v6888_v59 = vld [vmem:[#allocation2 + $0x8f] sm:$0xff] }
 0x2ab   : > { %5779 = vmatmul.msk.f32.gmra.mxu3 %vm833_vm1, %v3059_v31  ;;  %8217 = vst [vmem:[#allocation22_spill] sm:$0xff] %v6880_v7  ;;  %v3060_v31 = vld [vmem:[#allocation2 + $0x89] sm:$0xff] }
 0x2ad   : > { %v1682_v15 = vpop.f32.mrf.mxu2  ;;  %5601 = vmatmul.msk.f32.gmra.mxu0 %vm833_vm1, %v1693_v39 }
 0x2ae   : > { %v1683_v17 = vadd.f32 %v1682_v15, %v1341_v14  ;;  %v2077_v40 = vpop.f32.mrf.mxu3  ;;  %v1344_v61 = vpop.f32.mrf.mxu1 }
 0x2af   : > { %v6886_v57 = vadd.f32 %v2077_v40, %v1680_v42  ;;  %v6900_v40 = vld [vmem:[#allocation2 + $0x97] sm:$0xff] }
 0x2b1   : > { %8218 = vst [vmem:[#allocation23_spill] sm:$0xff] %v6886_v57  ;;  %5669 = vmatmul.msk.f32.gmra.mxu1 %vm833_vm1, %v6888_v59  ;;  %v2610_v57 = vld [vmem:[#allocation2 + $0x98] sm:$0xff] }
 0x2b2   : > { %5725 = vmatmul.msk.f32.gmra.mxu2 %vm833_vm1, %v2609_v25  ;;  %v6894_v7 = vpop.f32.mrf.mxu0  ;;  %v3061_v25 = vld [vmem:[#allocation2 + $0x91] sm:$0xff] }
 0x2b3   : > { %5780 = vmatmul.msk.f32.gmra.mxu3 %vm833_vm1, %v3060_v31  ;;  %8219 = vst [vmem:[#allocation24_spill] sm:$0xff] %v6894_v7 }
 0x2b5   : > { %v1685_v14 = vpop.f32.mrf.mxu2  ;;  %5602 = vmatmul.msk.f32.gmra.mxu0 %vm833_vm1, %v6705_v43 }
 0x2b6   : > { %v1686_v24 = vadd.f32 %v1685_v14, %v1344_v61  ;;  %v2080_v15 = vpop.f32.mrf.mxu3  ;;  %v1347_v39 = vpop.f32.mrf.mxu1 }
 0x2b7   : > { %v6898_v42 = vadd.f32 %v2080_v15, %v1683_v17  ;;  %v6914_v15 = vld [vmem:[#allocation2 + $0x9f] sm:$0xff] }
 0x2b9   : > { %8220 = vst [vmem:[#allocation25_spill] sm:$0xff] %v6898_v42  ;;  %5670 = vmatmul.msk.f32.gmra.mxu1 %vm833_vm1, %v6900_v40  ;;  %v2611_v42 = vld [vmem:[#allocation2 + $0xa0] sm:$0xff] }
 0x2ba   : > { %5726 = vmatmul.msk.f32.gmra.mxu2 %vm833_vm1, %v2610_v57  ;;  %v6906_v31 = vpop.f32.mrf.mxu0  ;;  %v3062_v57 = vld [vmem:[#allocation2 + $0x99] sm:$0xff] }
 0x2bb   : > { %5781 = vmatmul.msk.f32.gmra.mxu3 %vm833_vm1, %v3061_v25  ;;  %8221 = vst [vmem:[#allocation26_spill] sm:$0xff] %v6906_v31  ;;  %v7145_v31 = vld [vmem:[#allocation2 + $0x10f] sm:$0xff] }
 0x2bd   : > { %v1688_v61 = vpop.f32.mrf.mxu2  ;;  %5603 = vmatmul.msk.f32.gmra.mxu0 %vm833_vm1, %v6717_v60 }
 0x2be   : > { %v1689_v14 = vadd.f32 %v1688_v61, %v1347_v39  ;;  %v2083_v7 = vpop.f32.mrf.mxu3  ;;  %v6912_v17 = vpop.f32.mrf.mxu1  ;;  %v6930_v61 = vld [vmem:[#allocation2 + $0xa7] sm:$0xff] }
 0x2bf   : > { %v6910_v43 = vadd.f32 %v2083_v7, %v1686_v24  ;;  %8223 = vst [vmem:[#allocation28_spill] sm:$0xff] %v6912_v17  ;;  %v2612_v17 = vld [vmem:[#allocation2 + $0xa8] sm:$0xff] }
 0x2c1   : > { %8222 = vst [vmem:[#allocation27_spill] sm:$0xff] %v6910_v43  ;;  %5671 = vmatmul.msk.f32.gmra.mxu1 %vm833_vm1, %v6914_v15  ;;  %v2625_v43 = vld [vmem:[#allocation2 + $0x110] sm:$0xff] }
 0x2c2   : > { %5727 = vmatmul.msk.f32.gmra.mxu2 %vm833_vm1, %v2611_v42  ;;  %v6920_v39 = vpop.f32.mrf.mxu0  ;;  %v3063_v42 = vld [vmem:[#allocation2 + $0xa1] sm:$0xff] }
 0x2c3   : > { %5782 = vmatmul.msk.f32.gmra.mxu3 %vm833_vm1, %v3062_v57  ;;  %8224 = vst [vmem:[#allocation29_spill] sm:$0xff] %v6920_v39 }
 0x2c5   : > { %v6922_v25 = vpop.f32.mrf.mxu2  ;;  %5604 = vmatmul.msk.f32.gmra.mxu0 %vm833_vm1, %v6732_v11 }
 0x2c6   : > { %8225 = vst [vmem:[#allocation30_spill] sm:$0xff] %v6922_v25  ;;  %v2086_v60 = vpop.f32.mrf.mxu3  ;;  %v6928_v24 = vpop.f32.mrf.mxu1 }
 0x2c7   : > { %v6926_v7 = vadd.f32 %v2086_v60, %v1689_v14  ;;  %8227 = vst [vmem:[#allocation32_spill] sm:$0xff] %v6928_v24  ;;  %v6946_v60 = vld [vmem:[#allocation2 + $0xaf] sm:$0xff] }
 0x2c8   : > { %v2613_v24 = vld [vmem:[#allocation2 + $0xb0] sm:$0xff] }
 0x2c9   : > { %8226 = vst [vmem:[#allocation31_spill] sm:$0xff] %v6926_v7  ;;  %5672 = vmatmul.msk.f32.gmra.mxu1 %vm833_vm1, %v6930_v61  ;;  %v2624_v7 = vld [vmem:[#allocation2 + $0x108] sm:$0xff] }
 0x2ca   : > { %5728 = vmatmul.msk.f32.gmra.mxu2 %vm833_vm1, %v2612_v17  ;;  %v6936_v57 = vpop.f32.mrf.mxu0  ;;  %v3064_v17 = vld [vmem:[#allocation2 + $0xa9] sm:$0xff] }
 0x2cb   : > { %5783 = vmatmul.msk.f32.gmra.mxu3 %vm833_vm1, %v3063_v42  ;;  %8228 = vst [vmem:[#allocation33_spill] sm:$0xff] %v6936_v57 }
 0x2cd   : > { %v6938_v39 = vpop.f32.mrf.mxu2  ;;  %5605 = vmatmul.msk.f32.gmra.mxu0 %vm833_vm1, %v6747_v28 }
 0x2ce   : > { %8229 = vst [vmem:[#allocation34_spill] sm:$0xff] %v6938_v39  ;;  %v6940_v11 = vpop.f32.mrf.mxu3  ;;  %v6944_v14 = vpop.f32.mrf.mxu1 }
 0x2cf   : > { %8230 = vst [vmem:[#allocation35_spill] sm:$0xff] %v6940_v11  ;;  %v2614_v11 = vld [vmem:[#allocation2 + $0xb8] sm:$0xff] }
 0x2d0   : > { %8231 = vst [vmem:[#allocation36_spill] sm:$0xff] %v6944_v14  ;;  %v6962_v14 = vld [vmem:[#allocation2 + $0xb7] sm:$0xff] }
 0x2d1   : > { %5673 = vmatmul.msk.f32.gmra.mxu1 %vm833_vm1, %v6946_v60 }
 0x2d2   : > { %5729 = vmatmul.msk.f32.gmra.mxu2 %vm833_vm1, %v2613_v24  ;;  %v6952_v42 = vpop.f32.mrf.mxu0  ;;  %v3065_v24 = vld [vmem:[#allocation2 + $0xb1] sm:$0xff] }
 0x2d3   : > { %5784 = vmatmul.msk.f32.gmra.mxu3 %vm833_vm1, %v3064_v17  ;;  %8232 = vst [vmem:[#allocation37_spill] sm:$0xff] %v6952_v42 }
 0x2d5   : > { %v6954_v57 = vpop.f32.mrf.mxu2  ;;  %5606 = vmatmul.msk.f32.gmra.mxu0 %vm833_vm1, %v6763_v46 }
 0x2d6   : > { %8233 = vst [vmem:[#allocation38_spill] sm:$0xff] %v6954_v57  ;;  %v6956_v39 = vpop.f32.mrf.mxu3  ;;  %v6960_v28 = vpop.f32.mrf.mxu1 }
 0x2d7   : > { %8234 = vst [vmem:[#allocation39_spill] sm:$0xff] %v6956_v39  ;;  %v2615_v39 = vld [vmem:[#allocation2 + $0xc0] sm:$0xff] }
 0x2d8   : > { %8235 = vst [vmem:[#allocation40_spill] sm:$0xff] %v6960_v28  ;;  %v6978_v28 = vld [vmem:[#allocation2 + $0xbf] sm:$0xff] }
 0x2d9   : > { %5674 = vmatmul.msk.f32.gmra.mxu1 %vm833_vm1, %v6962_v14 }
 0x2da   : > { %5730 = vmatmul.msk.f32.gmra.mxu2 %vm833_vm1, %v2614_v11  ;;  %v6968_v17 = vpop.f32.mrf.mxu0  ;;  %v3066_v11 = vld [vmem:[#allocation2 + $0xb9] sm:$0xff] }
 0x2db   : > { %5785 = vmatmul.msk.f32.gmra.mxu3 %vm833_vm1, %v3065_v24  ;;  %8236 = vst [vmem:[#allocation41_spill] sm:$0xff] %v6968_v17  ;;  %v5822_v17 = vld [vmem:[%s8193_s3 + $0x68] sm:$0xff] }
 0x2dc   : > { %3732 = vmatpush.msra.mxu0 %v5822_v17  ;;  %v3067_v17 = vld [vmem:[#allocation2 + $0xc1] sm:$0xff] }
 0x2dd   : > { %v6970_v42 = vpop.f32.mrf.mxu2  ;;  %5607 = vmatmul.msk.f32.gmra.mxu0 %vm833_vm1, %v6779_v5 }
 0x2de   : > { %8237 = vst [vmem:[#allocation42_spill] sm:$0xff] %v6970_v42  ;;  %v6972_v57 = vpop.f32.mrf.mxu3  ;;  %v6976_v46 = vpop.f32.mrf.mxu1 }
 0x2df   : > { %8238 = vst [vmem:[#allocation43_spill] sm:$0xff] %v6972_v57  ;;  %v2617_v57 = vld [vmem:[#allocation2 + $0xd0] sm:$0xff] }
 0x2e0   : > { %8239 = vst [vmem:[#allocation44_spill] sm:$0xff] %v6976_v46 }
 0x2e1   : > { %5675 = vmatmul.msk.f32.gmra.mxu1 %vm833_vm1, %v6978_v28 }
 0x2e2   : > { %5731 = vmatmul.msk.f32.gmra.mxu2 %vm833_vm1, %v2615_v39  ;;  %v6984_v24 = vpop.f32.mrf.mxu0  ;;  %v5821_v39 = vld [vmem:[%s8193_s3 + $0x60] sm:$0xff] }
 0x2e3   : > { %5786 = vmatmul.msk.f32.gmra.mxu3 %vm833_vm1, %v3066_v11  ;;  %8240 = vst [vmem:[#allocation45_spill] sm:$0xff] %v6984_v24  ;;  %3733 = vmatpush.msra.mxu0 %v5821_v39  ;;  %v7000_v11 = vld [vmem:[#allocation2 + $0xc7] sm:$0xff] }
 0x2e4   : > { %v2616_v24 = vld [vmem:[#allocation2 + $0xc8] sm:$0xff] }
 0x2e5   : > { %v6989_v5 = vpop.f32.mrf.mxu2  ;;  %5608 = vmatmul.msk.f32.gmra.mxu0 %vm833_vm1, %v6795_v23 }
 0x2e6   : > { %8241 = vst [vmem:[#allocation46_spill] sm:$0xff] %v6989_v5  ;;  %v6991_v46 = vpop.f32.mrf.mxu3  ;;  %v6998_v42 = vpop.f32.mrf.mxu1 }
 0x2e7   : > { %8242 = vst [vmem:[#allocation47_spill] sm:$0xff] %v6991_v46 }
 0x2e8   : > { %8243 = vst [vmem:[#allocation48_spill] sm:$0xff] %v6998_v42  ;;  %v7016_v42 = vld [vmem:[#allocation2 + $0xcf] sm:$0xff] }
 0x2e9   : > { %5676 = vmatmul.msk.f32.gmra.mxu1 %vm833_vm1, %v7000_v11 }
 0x2ea   : > { %5732 = vmatmul.msk.f32.gmra.mxu2 %vm833_vm1, %v2616_v24  ;;  %v7006_v5 = vpop.f32.mrf.mxu0  ;;  %v3068_v24 = vld [vmem:[#allocation2 + $0xc9] sm:$0xff] }
 0x2eb   : > { %5787 = vmatmul.msk.f32.gmra.mxu3 %vm833_vm1, %v3067_v17  ;;  %8244 = vst [vmem:[#allocation49_spill] sm:$0xff] %v7006_v5 }
 0x2ed   : > { %v7008_v23 = vpop.f32.mrf.mxu2  ;;  %5609 = vmatmul.msk.f32.gmra.mxu0 %vm833_vm1, %v6811_v44 }
 0x2ee   : > { %8245 = vst [vmem:[#allocation50_spill] sm:$0xff] %v7008_v23  ;;  %v7010_v46 = vpop.f32.mrf.mxu3  ;;  %v7014_v39 = vpop.f32.mrf.mxu1 }
 0x2ef   : > { %8246 = vst [vmem:[#allocation51_spill] sm:$0xff] %v7010_v46  ;;  %v2618_v46 = vld [vmem:[#allocation2 + $0xd8] sm:$0xff] }
 0x2f0   : > { %8247 = vst [vmem:[#allocation52_spill] sm:$0xff] %v7014_v39  ;;  %v7032_v39 = vld [vmem:[#allocation2 + $0xd7] sm:$0xff] }
 0x2f1   : > { %5677 = vmatmul.msk.f32.gmra.mxu1 %vm833_vm1, %v7016_v42 }
 0x2f2   : > { %5733 = vmatmul.msk.f32.gmra.mxu2 %vm833_vm1, %v2617_v57  ;;  %v7022_v17 = vpop.f32.mrf.mxu0  ;;  %v3069_v57 = vld [vmem:[#allocation2 + $0xd1] sm:$0xff] }
 0x2f3   : > { %5788 = vmatmul.msk.f32.gmra.mxu3 %vm833_vm1, %v3068_v24  ;;  %8248 = vst [vmem:[#allocation53_spill] sm:$0xff] %v7022_v17  ;;  %v5933_v17 = vld [vmem:[%s8193_s3 + $0x80] sm:$0xff] }
 0x2f4   : > { %4637 = vmatpush.msra.mxu2 %v5933_v17  ;;  %v3070_v17 = vld [vmem:[#allocation2 + $0xd9] sm:$0xff] }
 0x2f5   : > { %v7024_v5 = vpop.f32.mrf.mxu2  ;;  %5610 = vmatmul.msk.f32.gmra.mxu0 %vm833_vm1, %v6827_v4 }
 0x2f6   : > { %8249 = vst [vmem:[#allocation54_spill] sm:$0xff] %v7024_v5  ;;  %v7026_v23 = vpop.f32.mrf.mxu3  ;;  %v7030_v44 = vpop.f32.mrf.mxu1 }
 0x2f7   : > { %8250 = vst [vmem:[#allocation55_spill] sm:$0xff] %v7026_v23  ;;  %v2620_v23 = vld [vmem:[#allocation2 + $0xe8] sm:$0xff] }
 0x2f8   : > { %8251 = vst [vmem:[#allocation56_spill] sm:$0xff] %v7030_v44 }
 0x2f9   : > { %5678 = vmatmul.msk.f32.gmra.mxu1 %vm833_vm1, %v7032_v39 }
 0x2fa   : > { %5734 = vmatmul.msk.f32.gmra.mxu2 %vm833_vm1, %v2618_v46  ;;  %v7038_v24 = vpop.f32.mrf.mxu0  ;;  %v5877_v46 = vld [vmem:[%s8193_s3 + $0x70] sm:$0xff] }
 0x2fb   : > { %5789 = vmatmul.msk.f32.gmra.mxu3 %vm833_vm1, %v3069_v57  ;;  %8252 = vst [vmem:[#allocation57_spill] sm:$0xff] %v7038_v24  ;;  %4185 = vmatpush.msra.mxu1 %v5877_v46  ;;  %v7054_v57 = vld [vmem:[#allocation2 + $0xdf] sm:$0xff] }
 0x2fc   : > { %v2619_v24 = vld [vmem:[#allocation2 + $0xe0] sm:$0xff] }
 0x2fd   : > { %v7043_v4 = vpop.f32.mrf.mxu2  ;;  %5611 = vmatmul.msk.f32.gmra.mxu0 %vm833_vm1, %v6842_v27 }
 0x2fe   : > { %8253 = vst [vmem:[#allocation58_spill] sm:$0xff] %v7043_v4  ;;  %v7045_v44 = vpop.f32.mrf.mxu3  ;;  %v7052_v5 = vpop.f32.mrf.mxu1 }
 0x2ff   : > { %8254 = vst [vmem:[#allocation59_spill] sm:$0xff] %v7045_v44 }
 0x300   : > { %8255 = vst [vmem:[#allocation60_spill] sm:$0xff] %v7052_v5  ;;  %v7070_v5 = vld [vmem:[#allocation2 + $0xe7] sm:$0xff] }
 0x301   : > { %5679 = vmatmul.msk.f32.gmra.mxu1 %vm833_vm1, %v7054_v57 }
 0x302   : > { %5735 = vmatmul.msk.f32.gmra.mxu2 %vm833_vm1, %v2619_v24  ;;  %v7060_v4 = vpop.f32.mrf.mxu0  ;;  %v3071_v24 = vld [vmem:[#allocation2 + $0xe1] sm:$0xff] }
 0x303   : > { %5790 = vmatmul.msk.f32.gmra.mxu3 %vm833_vm1, %v3070_v17  ;;  %8256 = vst [vmem:[#allocation61_spill] sm:$0xff] %v7060_v4 }
 0x305   : > { %v7062_v27 = vpop.f32.mrf.mxu2  ;;  %5823 = vmatmul.msk.f32.vlgmr.msra.gmra.mxu0 %vm833_vm1, %v6726_v19 }
 0x306   : > { %8257 = vst [vmem:[#allocation62_spill] sm:$0xff] %v7062_v27  ;;  %v7064_v44 = vpop.f32.mrf.mxu3  ;;  %v7068_v46 = vpop.f32.mrf.mxu1 }
 0x307   : > { %8258 = vst [vmem:[#allocation63_spill] sm:$0xff] %v7064_v44  ;;  %v2621_v44 = vld [vmem:[#allocation2 + $0xf0] sm:$0xff] }
 0x308   : > { %8259 = vst [vmem:[#allocation64_spill] sm:$0xff] %v7068_v46  ;;  %v7086_v46 = vld [vmem:[#allocation2 + $0xef] sm:$0xff] }
 0x309   : > { %5680 = vmatmul.msk.f32.gmra.mxu1 %vm833_vm1, %v7070_v5 }
 0x30a   : > { %5736 = vmatmul.msk.f32.gmra.mxu2 %vm833_vm1, %v2620_v23  ;;  %v7076_v17 = vpop.f32.mrf.mxu0  ;;  %v3072_v23 = vld [vmem:[#allocation2 + $0xe9] sm:$0xff] }
 0x30b   : > { %5791 = vmatmul.msk.f32.gmra.mxu3 %vm833_vm1, %v3071_v24  ;;  %8260 = vst [vmem:[#allocation65_spill] sm:$0xff] %v7076_v17 }
 0x30d   : > { %v7078_v4 = vpop.f32.mrf.mxu2  ;;  %5824 = vmatmul.msk.f32.gmra.mxu0 %vm833_vm1, %v6741_v38 }
 0x30e   : > { %8261 = vst [vmem:[#allocation66_spill] sm:$0xff] %v7078_v4  ;;  %v7080_v27 = vpop.f32.mrf.mxu3  ;;  %v7084_v19 = vpop.f32.mrf.mxu1 }
 0x30f   : > { %8262 = vst [vmem:[#allocation67_spill] sm:$0xff] %v7080_v27  ;;  %v2622_v27 = vld [vmem:[#allocation2 + $0xf8] sm:$0xff] }
 0x310   : > { %8263 = vst [vmem:[#allocation68_spill] sm:$0xff] %v7084_v19  ;;  %v7102_v19 = vld [vmem:[#allocation2 + $0xf7] sm:$0xff] }
 0x311   : > { %5681 = vmatmul.msk.f32.gmra.mxu1 %vm833_vm1, %v7086_v46 }
 0x312   : > { %5737 = vmatmul.msk.f32.gmra.mxu2 %vm833_vm1, %v2621_v44  ;;  %v7092_v24 = vpop.f32.mrf.mxu0  ;;  %v3073_v44 = vld [vmem:[#allocation2 + $0xf1] sm:$0xff] }
 0x313   : > { %5792 = vmatmul.msk.f32.gmra.mxu3 %vm833_vm1, %v3072_v23  ;;  %8264 = vst [vmem:[#allocation69_spill] sm:$0xff] %v7092_v24 }
 0x315   : > { %v7094_v17 = vpop.f32.mrf.mxu2  ;;  %5825 = vmatmul.msk.f32.gmra.mxu0 %vm833_vm1, %v6757_v56 }
 0x316   : > { %8265 = vst [vmem:[#allocation70_spill] sm:$0xff] %v7094_v17  ;;  %v7096_v4 = vpop.f32.mrf.mxu3  ;;  %v7100_v38 = vpop.f32.mrf.mxu1 }
 0x317   : > { %8266 = vst [vmem:[#allocation71_spill] sm:$0xff] %v7096_v4  ;;  %v2623_v4 = vld [vmem:[#allocation2 + $0x100] sm:$0xff] }
 0x318   : > { %8267 = vst [vmem:[#allocation72_spill] sm:$0xff] %v7100_v38  ;;  %v7118_v38 = vld [vmem:[#allocation2 + $0xff] sm:$0xff] }
 0x319   : > { %5682 = vmatmul.msk.f32.gmra.mxu1 %vm833_vm1, %v7102_v19 }
 0x31a   : > { %5738 = vmatmul.msk.f32.gmra.mxu2 %vm833_vm1, %v2622_v27  ;;  %v7108_v23 = vpop.f32.mrf.mxu0  ;;  %v3074_v27 = vld [vmem:[#allocation2 + $0xf9] sm:$0xff] }
 0x31b   : > { %5793 = vmatmul.msk.f32.gmra.mxu3 %vm833_vm1, %v3073_v44  ;;  %8268 = vst [vmem:[#allocation73_spill] sm:$0xff] %v7108_v23  ;;  %v2626_v23 = vld [vmem:[#allocation2 + $0x118] sm:$0xff] }
 0x31d   : > { %v7110_v24 = vpop.f32.mrf.mxu2  ;;  %5826 = vmatmul.msk.f32.gmra.mxu0 %vm833_vm1, %v6773_v26 }
 0x31e   : > { %8269 = vst [vmem:[#allocation74_spill] sm:$0xff] %v7110_v24  ;;  %v7112_v17 = vpop.f32.mrf.mxu3  ;;  %v7116_v56 = vpop.f32.mrf.mxu1 }
 0x31f   : > { %8270 = vst [vmem:[#allocation75_spill] sm:$0xff] %v7112_v17 }
 0x320   : > { %8271 = vst [vmem:[#allocation76_spill] sm:$0xff] %v7116_v56  ;;  %v7132_v56 = vld [vmem:[#allocation2 + $0x107] sm:$0xff] }
 0x321   : > { %5683 = vmatmul.msk.f32.gmra.mxu1 %vm833_vm1, %v7118_v38 }
 0x322   : > { %5739 = vmatmul.msk.f32.gmra.mxu2 %vm833_vm1, %v2623_v4  ;;  %v7124_v44 = vpop.f32.mrf.mxu0  ;;  %v3075_v4 = vld [vmem:[#allocation2 + $0x101] sm:$0xff] }
 0x323   : > { %5794 = vmatmul.msk.f32.gmra.mxu3 %vm833_vm1, %v3074_v27  ;;  %8272 = vst [vmem:[#allocation77_spill] sm:$0xff] %v7124_v44 }
 0x325   : > { %v7126_v24 = vpop.f32.mrf.mxu2  ;;  %5827 = vmatmul.msk.f32.gmra.mxu0 %vm833_vm1, %v6789_v35 }
 0x326   : > { %8273 = vst [vmem:[#allocation78_spill] sm:$0xff] %v7126_v24  ;;  %v7128_v17 = vpop.f32.mrf.mxu3  ;;  %v2418_v26 = vpop.f32.mrf.mxu1 }
 0x327   : > { %8274 = vst [vmem:[#allocation79_spill] sm:$0xff] %v7128_v17  ;;  %v2554_v24 = vadd.f32 %v2418_v26, %v6437_v0 }
 0x329   : > { %5684 = vmatmul.msk.f32.gmra.mxu1 %vm833_vm1, %v7132_v56 }
 0x32a   : > { %5740 = vmatmul.msk.f32.gmra.mxu2 %vm833_vm1, %v2624_v7  ;;  %v7138_v27 = vpop.f32.mrf.mxu0  ;;  %v3076_v7 = vld [vmem:[#allocation2 + $0x109] sm:$0xff] }
 0x32b   : > { %5795 = vmatmul.msk.f32.gmra.mxu3 %vm833_vm1, %v3075_v4  ;;  %8275 = vst [vmem:[#allocation80_spill] sm:$0xff] %v7138_v27  ;;  %v7158_v27 = vld [vmem:[#allocation2 + $0x117] sm:$0xff] }
 0x32d   : > { %v2870_v17 = vpop.f32.mrf.mxu2  ;;  %5828 = vmatmul.msk.f32.gmra.mxu0 %vm833_vm1, %v6805_v62 }
 0x32e   : > { %v3006_v25 = vadd.f32 %v2870_v17, %v2554_v24  ;;  %v7141_v44 = vpop.f32.mrf.mxu3  ;;  %v2421_v35 = vpop.f32.mrf.mxu1 }
 0x32f   : > { %8276 = vst [vmem:[#allocation81_spill] sm:$0xff] %v7141_v44  ;;  %v2555_v17 = vadd.f32 %v2421_v35, %v6447_v13 }
 0x331   : > { %5685 = vmatmul.msk.f32.gmra.mxu1 %vm833_vm1, %v7145_v31 }
 0x332   : > { %5741 = vmatmul.msk.f32.gmra.mxu2 %vm833_vm1, %v2625_v43  ;;  %v7151_v0 = vpop.f32.mrf.mxu0  ;;  %v3077_v43 = vld [vmem:[#allocation2 + $0x111] sm:$0xff] }
 0x333   : > { %5796 = vmatmul.msk.f32.gmra.mxu3 %vm833_vm1, %v3076_v7 }
 0x335   : > { %v2873_v24 = vpop.f32.mrf.mxu2  ;;  %5829 = vmatmul.msk.f32.gmra.mxu0 %vm833_vm1, %v6821_v54 }
 0x336   : > { %v3007_v26 = vadd.f32 %v2873_v24, %v2555_v17  ;;  %v3322_v4 = vpop.f32.mrf.mxu3  ;;  %v2424_v44 = vpop.f32.mrf.mxu1 }
 0x337   : > { %v7156_v62 = vadd.f32 %v3322_v4, %v3006_v25  ;;  %v2556_v35 = vadd.f32 %v2424_v44, %v6457_v29  ;;  %v7171_v4 = vld [vmem:[#allocation2 + $0x11f] sm:$0xff] }
 0x339   : > { %8277 = vst [vmem:[#allocation82_spill] sm:$0xff] %v7156_v62  ;;  %5686 = vmatmul.msk.f32.gmra.mxu1 %vm833_vm1, %v7158_v27  ;;  %v2627_v62 = vld [vmem:[#allocation2 + $0x120] sm:$0xff] }
 0x33a   : > { %5742 = vmatmul.msk.f32.gmra.mxu2 %vm833_vm1, %v2626_v23  ;;  %v7164_v13 = vpop.f32.mrf.mxu0  ;;  %v3078_v23 = vld [vmem:[#allocation2 + $0x119] sm:$0xff] }
 0x33b   : > { %5797 = vmatmul.msk.f32.gmra.mxu3 %vm833_vm1, %v3077_v43 }
 0x33d   : > { %v2876_v7 = vpop.f32.mrf.mxu2  ;;  %5830 = vmatmul.msk.f32.gmra.mxu0 %vm833_vm1, %v6837_v8 }
 0x33e   : > { %v3008_v54 = vadd.f32 %v2876_v7, %v2556_v35  ;;  %v3325_v25 = vpop.f32.mrf.mxu3  ;;  %v2427_v24 = vpop.f32.mrf.mxu1 }
 0x33f   : > { %v7169_v17 = vadd.f32 %v3325_v25, %v3007_v26  ;;  %v2557_v44 = vadd.f32 %v2427_v24, %v6466_v41  ;;  %v7184_v25 = vld [vmem:[#allocation2 + $0x127] sm:$0xff] }
 0x341   : > { %8278 = vst [vmem:[#allocation83_spill] sm:$0xff] %v7169_v17  ;;  %5687 = vmatmul.msk.f32.gmra.mxu1 %vm833_vm1, %v7171_v4  ;;  %v2628_v17 = vld [vmem:[#allocation2 + $0x128] sm:$0xff] }
 0x342   : > { %5743 = vmatmul.msk.f32.gmra.mxu2 %vm833_vm1, %v2627_v62  ;;  %v7177_v29 = vpop.f32.mrf.mxu0  ;;  %v3079_v62 = vld [vmem:[#allocation2 + $0x121] sm:$0xff] }
 0x343   : > { %5798 = vmatmul.msk.f32.gmra.mxu3 %vm833_vm1, %v3078_v23 }
 0x345   : > { %v2879_v43 = vpop.f32.mrf.mxu2  ;;  %5831 = vmatmul.msk.f32.gmra.mxu0 %vm833_vm1, %v6852_v20 }
 0x346   : > { %v3009_v8 = vadd.f32 %v2879_v43, %v2557_v44  ;;  %v3328_v26 = vpop.f32.mrf.mxu3  ;;  %v2430_v7 = vpop.f32.mrf.mxu1 }
 0x347   : > { %v7182_v35 = vadd.f32 %v3328_v26, %v3008_v54  ;;  %v2558_v24 = vadd.f32 %v2430_v7, %v6476_v55  ;;  %v7197_v26 = vld [vmem:[#allocation2 + $0x12f] sm:$0xff] }
 0x349   : > { %8279 = vst [vmem:[#allocation84_spill] sm:$0xff] %v7182_v35  ;;  %5688 = vmatmul.msk.f32.gmra.mxu1 %vm833_vm1, %v7184_v25  ;;  %v2629_v35 = vld [vmem:[#allocation2 + $0x130] sm:$0xff] }
 0x34a   : > { %5744 = vmatmul.msk.f32.gmra.mxu2 %vm833_vm1, %v2628_v17  ;;  %v7190_v41 = vpop.f32.mrf.mxu0  ;;  %v3080_v17 = vld [vmem:[#allocation2 + $0x129] sm:$0xff] }
 0x34b   : > { %5799 = vmatmul.msk.f32.gmra.mxu3 %vm833_vm1, %v3079_v62 }
 0x34d   : > { %v2882_v23 = vpop.f32.mrf.mxu2  ;;  %5832 = vmatmul.msk.f32.gmra.mxu0 %vm833_vm1, %v6863_v45 }
 0x34e   : > { %v3010_v20 = vadd.f32 %v2882_v23, %v2558_v24  ;;  %v3331_v54 = vpop.f32.mrf.mxu3  ;;  %v2433_v43 = vpop.f32.mrf.mxu1 }
 0x34f   : > { %v7195_v44 = vadd.f32 %v3331_v54, %v3009_v8  ;;  %v2559_v7 = vadd.f32 %v2433_v43, %v6486_v6  ;;  %v7210_v54 = vld [vmem:[#allocation2 + $0x137] sm:$0xff] }
 0x351   : > { %8280 = vst [vmem:[#allocation85_spill] sm:$0xff] %v7195_v44  ;;  %5689 = vmatmul.msk.f32.gmra.mxu1 %vm833_vm1, %v7197_v26  ;;  %v2630_v44 = vld [vmem:[#allocation2 + $0x138] sm:$0xff] }
 0x352   : > { %5745 = vmatmul.msk.f32.gmra.mxu2 %vm833_vm1, %v2629_v35  ;;  %v7203_v55 = vpop.f32.mrf.mxu0  ;;  %v3081_v35 = vld [vmem:[#allocation2 + $0x131] sm:$0xff] }
 0x353   : > { %5800 = vmatmul.msk.f32.gmra.mxu3 %vm833_vm1, %v3080_v17 }
 0x355   : > { %v2885_v62 = vpop.f32.mrf.mxu2  ;;  %5833 = vmatmul.msk.f32.gmra.mxu0 %vm833_vm1, %v6874_v47 }
 0x356   : > { %v3011_v45 = vadd.f32 %v2885_v62, %v2559_v7  ;;  %v3334_v8 = vpop.f32.mrf.mxu3  ;;  %v2436_v23 = vpop.f32.mrf.mxu1 }
 0x357   : > { %v7208_v24 = vadd.f32 %v3334_v8, %v3010_v20  ;;  %v2560_v43 = vadd.f32 %v2436_v23, %v6495_v21  ;;  %v7223_v8 = vld [vmem:[#allocation2 + $0x13f] sm:$0xff] }
 0x359   : > { %8281 = vst [vmem:[#allocation86_spill] sm:$0xff] %v7208_v24  ;;  %5690 = vmatmul.msk.f32.gmra.mxu1 %vm833_vm1, %v7210_v54  ;;  %v2631_v24 = vld [vmem:[#allocation2 + $0x140] sm:$0xff] }
 0x35a   : > { %5746 = vmatmul.msk.f32.gmra.mxu2 %vm833_vm1, %v2630_v44  ;;  %v7216_v6 = vpop.f32.mrf.mxu0  ;;  %v3082_v44 = vld [vmem:[#allocation2 + $0x139] sm:$0xff] }
 0x35b   : > { %5801 = vmatmul.msk.f32.gmra.mxu3 %vm833_vm1, %v3081_v35 }
 0x35d   : > { %v2888_v17 = vpop.f32.mrf.mxu2  ;;  %5834 = vmatmul.msk.f32.gmra.mxu0 %vm833_vm1, %v6888_v59 }
 0x35e   : > { %v3012_v47 = vadd.f32 %v2888_v17, %v2560_v43  ;;  %v3337_v20 = vpop.f32.mrf.mxu3  ;;  %v2439_v62 = vpop.f32.mrf.mxu1 }
 0x35f   : > { %v7221_v7 = vadd.f32 %v3337_v20, %v3011_v45  ;;  %v2561_v21 = vadd.f32 %v2439_v62, %v6505_v36  ;;  %v7236_v20 = vld [vmem:[#allocation2 + $0x147] sm:$0xff] }
 0x360   : > { %v3083_v36 = vld [vmem:[#allocation2 + $0x141] sm:$0xff] }
 0x361   : > { %8282 = vst [vmem:[#allocation87_spill] sm:$0xff] %v7221_v7  ;;  %5691 = vmatmul.msk.f32.gmra.mxu1 %vm833_vm1, %v7223_v8  ;;  %v2632_v7 = vld [vmem:[#allocation2 + $0x148] sm:$0xff] }
 0x362   : > { %5747 = vmatmul.msk.f32.gmra.mxu2 %vm833_vm1, %v2631_v24  ;;  %v7230_v23 = vpop.f32.mrf.mxu0 }
 0x363   : > { %5802 = vmatmul.msk.f32.gmra.mxu3 %vm833_vm1, %v3082_v44 }
 0x365   : > { %v2891_v35 = vpop.f32.mrf.mxu2  ;;  %5835 = vmatmul.msk.f32.gmra.mxu0 %vm833_vm1, %v6900_v40 }
 0x366   : > { %v3013_v59 = vadd.f32 %v2891_v35, %v2561_v21  ;;  %v3340_v45 = vpop.f32.mrf.mxu3  ;;  %v2442_v17 = vpop.f32.mrf.mxu1 }
 0x367   : > { %v7234_v43 = vadd.f32 %v3340_v45, %v3012_v47  ;;  %v2562_v24 = vadd.f32 %v2442_v17, %v6515_v51  ;;  %v7249_v45 = vld [vmem:[#allocation2 + $0x14f] sm:$0xff] }
 0x368   : > { %v3084_v51 = vld [vmem:[#allocation2 + $0x149] sm:$0xff] }
 0x369   : > { %8283 = vst [vmem:[#allocation88_spill] sm:$0xff] %v7234_v43  ;;  %5692 = vmatmul.msk.f32.gmra.mxu1 %vm833_vm1, %v7236_v20  ;;  %v2633_v43 = vld [vmem:[#allocation2 + $0x150] sm:$0xff] }
 0x36a   : > { %5748 = vmatmul.msk.f32.gmra.mxu2 %vm833_vm1, %v2632_v7  ;;  %v7243_v44 = vpop.f32.mrf.mxu0 }
 0x36b   : > { %5803 = vmatmul.msk.f32.gmra.mxu3 %vm833_vm1, %v3083_v36 }
 0x36d   : > { %v2894_v62 = vpop.f32.mrf.mxu2  ;;  %5836 = vmatmul.msk.f32.gmra.mxu0 %vm833_vm1, %v6914_v15 }
 0x36e   : > { %v3014_v40 = vadd.f32 %v2894_v62, %v2562_v24  ;;  %v3343_v47 = vpop.f32.mrf.mxu3  ;;  %v2445_v35 = vpop.f32.mrf.mxu1 }
 0x36f   : > { %v7247_v21 = vadd.f32 %v3343_v47, %v3013_v59  ;;  %v2563_v7 = vadd.f32 %v2445_v35, %v6523_v2  ;;  %v7262_v47 = vld [vmem:[#allocation2 + $0x157] sm:$0xff] }
 0x370   : > { %v3085_v2 = vld [vmem:[#allocation2 + $0x151] sm:$0xff] }
 0x371   : > { %8284 = vst [vmem:[#allocation89_spill] sm:$0xff] %v7247_v21  ;;  %5693 = vmatmul.msk.f32.gmra.mxu1 %vm833_vm1, %v7249_v45  ;;  %v2634_v21 = vld [vmem:[#allocation2 + $0x158] sm:$0xff] }
 0x372   : > { %5749 = vmatmul.msk.f32.gmra.mxu2 %vm833_vm1, %v2633_v43  ;;  %v7260_v62 = vpop.f32.mrf.mxu0 }
 0x373   : > { %5804 = vmatmul.msk.f32.gmra.mxu3 %vm833_vm1, %v3084_v51 }
 0x375   : > { %v2897_v17 = vpop.f32.mrf.mxu2  ;;  %5837 = vmatmul.msk.f32.gmra.mxu0 %vm833_vm1, %v6930_v61 }
 0x376   : > { %v3015_v36 = vadd.f32 %v2897_v17, %v2563_v7  ;;  %v3346_v24 = vpop.f32.mrf.mxu3  ;;  %v2448_v59 = vpop.f32.mrf.mxu1  ;;  %v7273_v17 = vld [vmem:[#allocation2 + $0x15f] sm:$0xff] }
 0x377   : > { %v7258_v15 = vadd.f32 %v3346_v24, %v3014_v40  ;;  %v2564_v43 = vadd.f32 %v2448_v59, %v6539_v16  ;;  %v2635_v24 = vld [vmem:[#allocation2 + $0x160] sm:$0xff] }
 0x378   : > { %v3086_v16 = vld [vmem:[#allocation2 + $0x159] sm:$0xff] }
 0x379   : > { %8285 = vst [vmem:[#allocation90_spill] sm:$0xff] %v7258_v15  ;;  %5694 = vmatmul.msk.f32.gmra.mxu1 %vm833_vm1, %v7262_v47 }
 0x37a   : > { %5750 = vmatmul.msk.f32.gmra.mxu2 %vm833_vm1, %v2634_v21  ;;  %v7275_v15 = vpop.f32.mrf.mxu0 }
 0x37b   : > { %5805 = vmatmul.msk.f32.gmra.mxu3 %vm833_vm1, %v3085_v2 }
 0x37d   : > { %v2900_v35 = vpop.f32.mrf.mxu2  ;;  %5838 = vmatmul.msk.f32.gmra.mxu0 %vm833_vm1, %v6946_v60  ;;  %v4967_v60 = vld [vmem:[%s8195_s5] sm:$0xff] }
 0x37e   : > { %v3016_v61 = vadd.f32 %v2900_v35, %v2564_v43  ;;  %v3349_v40 = vpop.f32.mrf.mxu3  ;;  %v2451_v7 = vpop.f32.mrf.mxu1  ;;  %5150 = vmatpush.msra.mxu3 %v4967_v60 }
 0x37f   : > { %v7271_v51 = vadd.f32 %v3349_v40, %v3015_v36  ;;  %v2565_v21 = vadd.f32 %v2451_v7, %v6548_v33  ;;  %v7289_v40 = vld [vmem:[#allocation2 + $0x167] sm:$0xff] }
 0x380   : > { %v3087_v33 = vld [vmem:[#allocation2 + $0x161] sm:$0xff] }
 0x381   : > { %5695 = vmatmul.msk.f32.gmra.mxu1 %vm833_vm1, %v7273_v17 }
 0x382   : > { %5751 = vmatmul.msk.f32.gmra.mxu2 %vm833_vm1, %v2635_v24  ;;  %v2636_v24 = vld [vmem:[#allocation2 + $0x168] sm:$0xff]  ;;  %v7295_v7 = vpop.f32.mrf.mxu0 }
 0x383   : > { %5806 = vmatmul.msk.f32.gmra.mxu3 %vm833_vm1, %v3086_v16 }
 0x385   : > { %v2903_v36 = vpop.f32.mrf.mxu2  ;;  %5839 = vmatmul.msk.f32.gmra.mxu0 %vm833_vm1, %v6962_v14 }
 0x386   : > { %v3017_v59 = vadd.f32 %v2903_v36, %v2565_v21  ;;  %v3352_v2 = vpop.f32.mrf.mxu3  ;;  %v2454_v35 = vpop.f32.mrf.mxu1 }
 0x387   : > { %v7287_v43 = vadd.f32 %v3352_v2, %v3016_v61  ;;  %v2566_v16 = vadd.f32 %v2454_v35, %v6559_v48  ;;  %v7302_v2 = vld [vmem:[#allocation2 + $0x16f] sm:$0xff] }
 0x389   : > { %8286 = vst [vmem:[#allocation91_spill] sm:$0xff] %v7287_v43  ;;  %5696 = vmatmul.msk.f32.gmra.mxu1 %vm833_vm1, %v7289_v40  ;;  %v2637_v43 = vld [vmem:[#allocation2 + $0x170] sm:$0xff] }
 0x38a   : > { %5752 = vmatmul.msk.f32.gmra.mxu2 %vm833_vm1, %v2636_v24  ;;  %v3088_v24 = vld [vmem:[#allocation2 + $0x169] sm:$0xff] }
 0x38b   : > { %5807 = vmatmul.msk.f32.gmra.mxu3 %vm833_vm1, %v3087_v33  ;;  %v7309_v33 = vpop.f32.mrf.mxu0 }
 0x38d   : > { %v2906_v21 = vpop.f32.mrf.mxu2  ;;  %5840 = vmatmul.msk.f32.gmra.mxu0 %vm833_vm1, %v6978_v28 }
 0x38e   : > { %v3018_v14 = vadd.f32 %v2906_v21, %v2566_v16  ;;  %v3355_v61 = vpop.f32.mrf.mxu3  ;;  %v2457_v36 = vpop.f32.mrf.mxu1 }
 0x38f   : > { %v7300_v60 = vadd.f32 %v3355_v61, %v3017_v59  ;;  %v2567_v48 = vadd.f32 %v2457_v36, %v6571_v1  ;;  %v7315_v61 = vld [vmem:[#allocation2 + $0x177] sm:$0xff] }
 0x390   : > { %v3089_v1 = vld [vmem:[#allocation2 + $0x171] sm:$0xff] }
 0x391   : > { %8287 = vst [vmem:[#allocation92_spill] sm:$0xff] %v7300_v60  ;;  %5697 = vmatmul.msk.f32.gmra.mxu1 %vm833_vm1, %v7302_v2  ;;  %v2638_v60 = vld [vmem:[#allocation2 + $0x178] sm:$0xff] }
 0x392   : > { %5753 = vmatmul.msk.f32.gmra.mxu2 %vm833_vm1, %v2637_v43 }
 0x393   : > { %5808 = vmatmul.msk.f32.gmra.mxu3 %vm833_vm1, %v3088_v24 }
 0x395   : > { %v2909_v35 = vpop.f32.mrf.mxu2  ;;  %5841 = vmatmul.msk.f32.gmra.mxu0 %vm833_vm1, %v7000_v11 }
 0x396   : > { %v3019_v28 = vadd.f32 %v2909_v35, %v2567_v48  ;;  %v3358_v59 = vpop.f32.mrf.mxu3  ;;  %v2460_v21 = vpop.f32.mrf.mxu1 }
 0x397   : > { %v7313_v16 = vadd.f32 %v3358_v59, %v3018_v14  ;;  %v2568_v43 = vadd.f32 %v2460_v21, %v6583_v18  ;;  %v7326_v35 = vpop.f32.mrf.mxu0  ;;  %v7328_v59 = vld [vmem:[#allocation2 + $0x17f] sm:$0xff] }
 0x398   : > { %v3090_v18 = vld [vmem:[#allocation2 + $0x179] sm:$0xff] }
 0x399   : > { %8288 = vst [vmem:[#allocation93_spill] sm:$0xff] %v7313_v16  ;;  %5698 = vmatmul.msk.f32.gmra.mxu1 %vm833_vm1, %v7315_v61  ;;  %v2639_v16 = vld [vmem:[#allocation2 + $0x180] sm:$0xff] }
 0x39a   : > { %5754 = vmatmul.msk.f32.gmra.mxu2 %vm833_vm1, %v2638_v60 }
 0x39b   : > { %5809 = vmatmul.msk.f32.gmra.mxu3 %vm833_vm1, %v3089_v1 }
 0x39d   : > { %v2912_v36 = vpop.f32.mrf.mxu2  ;;  %5842 = vmatmul.msk.f32.gmra.mxu0 %vm833_vm1, %v7016_v42 }
 0x39e   : > { %v3020_v24 = vadd.f32 %v2912_v36, %v2568_v43  ;;  %v3361_v48 = vpop.f32.mrf.mxu3  ;;  %v2463_v14 = vpop.f32.mrf.mxu1  ;;  %v7339_v36 = vld [vmem:[#allocation2 + $0x187] sm:$0xff] }
 0x39f   : > { %v7324_v11 = vadd.f32 %v3361_v48, %v3019_v28  ;;  %v2569_v60 = vadd.f32 %v2463_v14, %v6594_v34  ;;  %v2640_v48 = vld [vmem:[#allocation2 + $0x188] sm:$0xff] }
 0x3a0   : > { %v3091_v34 = vld [vmem:[#allocation2 + $0x181] sm:$0xff] }
 0x3a1   : > { %8289 = vst [vmem:[#allocation94_spill] sm:$0xff] %v7324_v11  ;;  %5699 = vmatmul.msk.f32.gmra.mxu1 %vm833_vm1, %v7328_v59  ;;  %v7341_v11 = vpop.f32.mrf.mxu0 }
 0x3a2   : > { %5755 = vmatmul.msk.f32.gmra.mxu2 %vm833_vm1, %v2639_v16 }
 0x3a3   : > { %5810 = vmatmul.msk.f32.gmra.mxu3 %vm833_vm1, %v3090_v18 }
 0x3a5   : > { %v2915_v21 = vpop.f32.mrf.mxu2  ;;  %5843 = vmatmul.msk.f32.gmra.mxu0 %vm833_vm1, %v7032_v39 }
 0x3a6   : > { %v3021_v42 = vadd.f32 %v2915_v21, %v2569_v60  ;;  %v3364_v28 = vpop.f32.mrf.mxu3  ;;  %v2466_v43 = vpop.f32.mrf.mxu1  ;;  %v7352_v21 = vld [vmem:[#allocation2 + $0x18f] sm:$0xff] }
 0x3a7   : > { %v7337_v1 = vadd.f32 %v3364_v28, %v3020_v24  ;;  %v2570_v16 = vadd.f32 %v2466_v43, %v6606_v53  ;;  %v2641_v28 = vld [vmem:[#allocation2 + $0x190] sm:$0xff] }
 0x3a9   : > { %5700 = vmatmul.msk.f32.gmra.mxu1 %vm833_vm1, %v7339_v36  ;;  %v7358_v53 = vpop.f32.mrf.mxu0 }
 0x3aa   : > { %5756 = vmatmul.msk.f32.gmra.mxu2 %vm833_vm1, %v2640_v48  ;;  %v3092_v48 = vld [vmem:[#allocation2 + $0x189] sm:$0xff] }
 0x3ab   : > { %5811 = vmatmul.msk.f32.gmra.mxu3 %vm833_vm1, %v3091_v34 }
 0x3ad   : > { %v2918_v14 = vpop.f32.mrf.mxu2  ;;  %5844 = vmatmul.msk.f32.gmra.mxu0 %vm833_vm1, %v7054_v57 }
 0x3ae   : > { %v3022_v39 = vadd.f32 %v2918_v14, %v2570_v16  ;;  %v3367_v24 = vpop.f32.mrf.mxu3  ;;  %v2469_v60 = vpop.f32.mrf.mxu1 }
 0x3af   : > { %v7350_v18 = vadd.f32 %v3367_v24, %v3021_v42  ;;  %v2571_v43 = vadd.f32 %v2469_v60, %v6621_v9  ;;  %v7367_v24 = vld [vmem:[#allocation2 + $0x197] sm:$0xff] }
 0x3b1   : > { %5701 = vmatmul.msk.f32.gmra.mxu1 %vm833_vm1, %v7352_v21 }
 0x3b2   : > { %5757 = vmatmul.msk.f32.gmra.mxu2 %vm833_vm1, %v2641_v28  ;;  %v2642_v28 = vld [vmem:[#allocation2 + $0x198] sm:$0xff] }
 0x3b3   : > { %5812 = vmatmul.msk.f32.gmra.mxu3 %vm833_vm1, %v3092_v48  ;;  %v3093_v48 = vld [vmem:[#allocation2 + $0x191] sm:$0xff] }
 0x3b5   : > { %v2921_v34 = vpop.f32.mrf.mxu2  ;;  %5845 = vmatmul.msk.f32.gmra.mxu0 %vm833_vm1, %v7070_v5 }
 0x3b6   : > { %v7361_v57 = vadd.f32 %v2921_v34, %v2571_v43  ;;  %v3370_v42 = vpop.f32.mrf.mxu3  ;;  %v2472_v14 = vpop.f32.mrf.mxu1  ;;  %v7380_v34 = vld [vmem:[#allocation2 + $0x19f] sm:$0xff] }
 0x3b7   : > { %v7365_v16 = vadd.f32 %v3370_v42, %v3022_v39  ;;  %v2572_v9 = vadd.f32 %v2472_v14, %v6632_v30  ;;  %v7374_v43 = vpop.f32.mrf.mxu0  ;;  %v2643_v42 = vld [vmem:[#allocation2 + $0x1a0] sm:$0xff] }
 0x3b9   : > { %5702 = vmatmul.msk.f32.gmra.mxu1 %vm833_vm1, %v7367_v24 }
 0x3ba   : > { %5758 = vmatmul.msk.f32.gmra.mxu2 %vm833_vm1, %v2642_v28  ;;  %v3094_v28 = vld [vmem:[#allocation2 + $0x199] sm:$0xff] }
 0x3bb   : > { %5813 = vmatmul.msk.f32.gmra.mxu3 %vm833_vm1, %v3093_v48 }
 0x3bd   : > { %v2924_v60 = vpop.f32.mrf.mxu2  ;;  %5846 = vmatmul.msk.f32.gmra.mxu0 %vm833_vm1, %v7086_v46 }
 0x3be   : > { %v7376_v5 = vadd.f32 %v2924_v60, %v2572_v9  ;;  %v2475_v39 = vpop.f32.mrf.mxu1  ;;  %v7393_v60 = vld [vmem:[#allocation2 + $0x1a7] sm:$0xff] }
 0x3bf   : > { %v2573_v30 = vadd.f32 %v2475_v39, %v6644_v52  ;;  %v7391_v9 = vpop.f32.mrf.mxu0 }
 0x3c0   : > { %8290 = vst [vmem:[#allocation95_spill] sm:$0xff] %v7376_v5  ;;  %v2644_v5 = vld [vmem:[#allocation2 + $0x1a8] sm:$0xff] }
 0x3c1   : > { %5703 = vmatmul.msk.f32.gmra.mxu1 %vm833_vm1, %v7380_v34 }
 0x3c2   : > { %5759 = vmatmul.msk.f32.gmra.mxu2 %vm833_vm1, %v2643_v42  ;;  %v3095_v42 = vld [vmem:[#allocation2 + $0x1a1] sm:$0xff] }
 0x3c3   : > { %5814 = vmatmul.msk.f32.gmra.mxu3 %vm833_vm1, %v3094_v28 }
 0x3c5   : > { %v2927_v14 = vpop.f32.mrf.mxu2  ;;  %5847 = vmatmul.msk.f32.gmra.mxu0 %vm833_vm1, %v7102_v19 }
 0x3c6   : > { %v7387_v48 = vadd.f32 %v2927_v14, %v2573_v30  ;;  %v2478_v46 = vpop.f32.mrf.mxu1  ;;  %v7404_v30 = vld [vmem:[#allocation2 + $0x1af] sm:$0xff] }
 0x3c7   : > { %v2574_v52 = vadd.f32 %v2478_v46, %v6659_v10  ;;  %v2645_v14 = vld [vmem:[#allocation2 + $0x1b0] sm:$0xff] }
 0x3c8   : > { %8291 = vst [vmem:[#allocation96_spill] sm:$0xff] %v7387_v48  ;;  %v7406_v48 = vpop.f32.mrf.mxu0 }
 0x3c9   : > { %5704 = vmatmul.msk.f32.gmra.mxu1 %vm833_vm1, %v7393_v60 }
 0x3ca   : > { %5760 = vmatmul.msk.f32.gmra.mxu2 %vm833_vm1, %v2644_v5  ;;  %v3096_v5 = vld [vmem:[#allocation2 + $0x1a9] sm:$0xff] }
 0x3cb   : > { %5815 = vmatmul.msk.f32.gmra.mxu3 %vm833_vm1, %v3095_v42 }
 0x3cd   : > { %v2930_v39 = vpop.f32.mrf.mxu2  ;;  %5848 = vmatmul.msk.f32.gmra.mxu0 %vm833_vm1, %v7118_v38 }
 0x3ce   : > { %v7400_v28 = vadd.f32 %v2930_v39, %v2574_v52  ;;  %v2481_v19 = vpop.f32.mrf.mxu1  ;;  %v7417_v52 = vld [vmem:[#allocation2 + $0x1b7] sm:$0xff] }
 0x3cf   : > { %v2575_v10 = vadd.f32 %v2481_v19, %v6673_v37  ;;  %v2646_v39 = vld [vmem:[#allocation2 + $0x1b8] sm:$0xff] }
 0x3d0   : > { %8292 = vst [vmem:[#allocation97_spill] sm:$0xff] %v7400_v28  ;;  %v3100_v28 = vld [vmem:[#allocation2 + $0x1c9] sm:$0xff] }
 0x3d1   : > { %5705 = vmatmul.msk.f32.gmra.mxu1 %vm833_vm1, %v7404_v30 }
 0x3d2   : > { %5761 = vmatmul.msk.f32.gmra.mxu2 %vm833_vm1, %v2645_v14  ;;  %v3097_v14 = vld [vmem:[#allocation2 + $0x1b1] sm:$0xff] }
 0x3d3   : > { %5816 = vmatmul.msk.f32.gmra.mxu3 %vm833_vm1, %v3096_v5  ;;  %v7423_v5 = vpop.f32.mrf.mxu0 }
 0x3d5   : > { %v2933_v46 = vpop.f32.mrf.mxu2  ;;  %5849 = vmatmul.msk.f32.gmra.mxu0 %vm833_vm1, %v7132_v56 }
 0x3d6   : > { %v7413_v42 = vadd.f32 %v2933_v46, %v2575_v10  ;;  %v2484_v38 = vpop.f32.mrf.mxu1  ;;  %v7430_v46 = vld [vmem:[#allocation2 + $0x1bf] sm:$0xff] }
 0x3d7   : > { %v2576_v37 = vadd.f32 %v2484_v38, %v6682_v58 }
 0x3d8   : > { %8293 = vst [vmem:[#allocation98_spill] sm:$0xff] %v7413_v42  ;;  %v2647_v42 = vld [vmem:[#allocation2 + $0x1c0] sm:$0xff] }
 0x3d9   : > { %5706 = vmatmul.msk.f32.gmra.mxu1 %vm833_vm1, %v7417_v52 }
 0x3da   : > { %5762 = vmatmul.msk.f32.gmra.mxu2 %vm833_vm1, %v2646_v39  ;;  %v3098_v39 = vld [vmem:[#allocation2 + $0x1b9] sm:$0xff] }
 0x3db   : > { %5817 = vmatmul.msk.f32.gmra.mxu3 %vm833_vm1, %v3097_v14  ;;  %v7437_v14 = vpop.f32.mrf.mxu0 }
 0x3dd   : > { %v2936_v19 = vpop.f32.mrf.mxu2  ;;  %5850 = vmatmul.msk.f32.gmra.mxu0 %vm833_vm1, %v7145_v31 }
 0x3de   : > { %v7426_v10 = vadd.f32 %v2936_v19, %v2576_v37  ;;  %v2487_v56 = vpop.f32.mrf.mxu1  ;;  %v7443_v19 = vld [vmem:[#allocation2 + $0x1c7] sm:$0xff] }
 0x3df   : > { %v2577_v58 = vadd.f32 %v2487_v56, %v6690_v22 }
 0x3e0   : > { %8294 = vst [vmem:[#allocation99_spill] sm:$0xff] %v7426_v10  ;;  %v2648_v10 = vld [vmem:[#allocation2 + $0x1c8] sm:$0xff] }
 0x3e1   : > { %5707 = vmatmul.msk.f32.gmra.mxu1 %vm833_vm1, %v7430_v46 }
 0x3e2   : > { %5763 = vmatmul.msk.f32.gmra.mxu2 %vm833_vm1, %v2647_v42  ;;  %v3099_v42 = vld [vmem:[#allocation2 + $0x1c1] sm:$0xff] }
 0x3e3   : > { %5818 = vmatmul.msk.f32.gmra.mxu3 %vm833_vm1, %v3098_v39 }
 0x3e5   : > { %v2939_v38 = vpop.f32.mrf.mxu2  ;;  %5851 = vmatmul.msk.f32.gmra.mxu0 %vm833_vm1, %v7158_v27 }
 0x3e6   : > { %v7439_v37 = vadd.f32 %v2939_v38, %v2577_v58  ;;  %v2490_v31 = vpop.f32.mrf.mxu1  ;;  %v7454_v58 = vpop.f32.mrf.mxu0  ;;  %v3951_v38 = vld [vmem:[#allocation2 + $0x38] sm:$0xff] }
 0x3e7   : > { %v2578_v22 = vadd.f32 %v2490_v31, %v6699_v50 }
 0x3e8   : > { %8295 = vst [vmem:[#allocation100_spill] sm:$0xff] %v7439_v37  ;;  %v4403_v37 = vld [vmem:[#allocation2 + $0x39] sm:$0xff] }
 0x3e9   : > { %5708 = vmatmul.msk.f32.gmra.mxu1 %vm833_vm1, %v7443_v19 }
 0x3ea   : > { %5764 = vmatmul.msk.f32.gmra.mxu2 %vm833_vm1, %v2648_v10 }
 0x3eb   : > { %5819 = vmatmul.msk.f32.gmra.mxu3 %vm833_vm1, %v3099_v42  ;;  %v3952_v42 = vld [vmem:[#allocation2 + $0x40] sm:$0xff] }
 0x3ed   : > { %v2942_v56 = vpop.f32.mrf.mxu2  ;;  %5852 = vmatmul.msk.f32.gmra.mxu0 %vm833_vm1, %v7171_v4 }
 0x3ee   : > { %v7450_v39 = vadd.f32 %v2942_v56, %v2578_v22  ;;  %v2493_v27 = vpop.f32.mrf.mxu1  ;;  %v4404_v22 = vld [vmem:[#allocation2 + $0x41] sm:$0xff]  ;;  %v7464_v56 = vpop.f32.mrf.mxu0 }
 0x3ef   : > { %v2579_v50 = vadd.f32 %v2493_v27, %v6712_v63  ;;  %v3953_v27 = vld [vmem:[#allocation2 + $0x48] sm:$0xff] }
 0x3f0   : > { %8296 = vst [vmem:[#allocation101_spill] sm:$0xff] %v7450_v39 }
 0x3f1   : > { %5879 = vmatmul.msk.f32.vlgmr.msra.gmra.mxu1 %vm833_vm1, %v3951_v38 }
 0x3f2   : > { %5935 = vmatmul.msk.f32.vlgmr.msra.gmra.mxu2 %vm833_vm1, %v4403_v37 }
 0x3f3   : > { %5820 = vmatmul.msk.f32.gmra.mxu3 %vm833_vm1, %v3100_v28 }
 0x3f5   : > { %v2945_v10 = vpop.f32.mrf.mxu2  ;;  %5853 = vmatmul.msk.f32.gmra.mxu0 %vm833_vm1, %v7184_v25  ;;  %v4405_v25 = vld [vmem:[#allocation2 + $0x49] sm:$0xff] }
 0x3f6   : > { %v7460_v31 = vadd.f32 %v2945_v10, %v2579_v50  ;;  %v2496_v4 = vpop.f32.mrf.mxu1  ;;  %v7475_v50 = vpop.f32.mrf.mxu0 }
 0x3f7   : > { %v2580_v37 = vadd.f32 %v2496_v4, %v6724_v12  ;;  %v3954_v4 = vld [vmem:[#allocation2 + $0x50] sm:$0xff] }
 0x3f8   : > { %8297 = vst [vmem:[#allocation102_spill] sm:$0xff] %v7460_v31 }
 0x3f9   : > { %5880 = vmatmul.msk.f32.gmra.mxu1 %vm833_vm1, %v3952_v42 }
 0x3fa   : > { %5936 = vmatmul.msk.f32.gmra.mxu2 %vm833_vm1, %v4404_v22 }
 0x3fd   : > { %v2948_v28 = vpop.f32.mrf.mxu2  ;;  %5854 = vmatmul.msk.f32.gmra.mxu0 %vm833_vm1, %v7197_v26  ;;  %v4406_v26 = vld [vmem:[#allocation2 + $0x51] sm:$0xff] }
 0x3fe   : > { %v7469_v38 = vadd.f32 %v2948_v28, %v2580_v37  ;;  %v2499_v63 = vpop.f32.mrf.mxu1 }
 0x3ff   : > { %v2581_v10 = vadd.f32 %v2499_v63, %v6739_v32  ;;  %v7491_v63 = vpop.f32.mrf.mxu3 }
 0x400   : > { %8298 = vst [vmem:[#allocation103_spill] sm:$0xff] %v7469_v38 }
 0x401   : > { %5881 = vmatmul.msk.f32.gmra.mxu1 %vm833_vm1, %v3953_v27  ;;  %v7485_v27 = vpop.f32.mrf.mxu0  ;;  %8301 = vst [vmem:[#allocation106_spill] sm:$0xff] %v7491_v63  ;;  %v3967_v63 = vld [vmem:[#allocation2 + $0xb8] sm:$0xff] }
 0x402   : > { %5937 = vmatmul.msk.f32.gmra.mxu2 %vm833_vm1, %v4405_v25 }
 0x405   : > { %v2951_v42 = vpop.f32.mrf.mxu2  ;;  %5855 = vmatmul.msk.f32.gmra.mxu0 %vm833_vm1, %v7210_v54  ;;  %v3955_v54 = vld [vmem:[#allocation2 + $0x58] sm:$0xff] }
 0x406   : > { %v7478_v22 = vadd.f32 %v2951_v42, %v2581_v10  ;;  %v2502_v12 = vpop.f32.mrf.mxu1  ;;  %v4407_v10 = vld [vmem:[#allocation2 + $0x59] sm:$0xff] }
 0x407   : > { %v2582_v37 = vadd.f32 %v2502_v12, %v6755_v49 }
 0x408   : > { %8299 = vst [vmem:[#allocation104_spill] sm:$0xff] %v7478_v22 }
 0x409   : > { %5882 = vmatmul.msk.f32.gmra.mxu1 %vm833_vm1, %v3954_v4 }
 0x40a   : > { %5938 = vmatmul.msk.f32.gmra.mxu2 %vm833_vm1, %v4406_v26  ;;  %v7500_v26 = vpop.f32.mrf.mxu0 }
 0x40d   : > { %v2954_v28 = vpop.f32.mrf.mxu2  ;;  %5856 = vmatmul.msk.f32.gmra.mxu0 %vm833_vm1, %v7223_v8  ;;  %v3956_v8 = vld [vmem:[#allocation2 + $0x60] sm:$0xff] }
 0x40e   : > { %v7487_v25 = vadd.f32 %v2954_v28, %v2582_v37  ;;  %v2505_v32 = vpop.f32.mrf.mxu1  ;;  %v4408_v37 = vld [vmem:[#allocation2 + $0x61] sm:$0xff]  ;;  %v7504_v28 = vpop.f32.mrf.mxu3 }
 0x40f   : > { %v2583_v42 = vadd.f32 %v2505_v32, %v6771_v3  ;;  %8303 = vst [vmem:[#allocation108_spill] sm:$0xff] %v7504_v28  ;;  %v8344_v28 = vld [vmem:[#allocation35_spill] sm:$0xff] }
 0x410   : > { %8300 = vst [vmem:[#allocation105_spill] sm:$0xff] %v7487_v25 }
 0x411   : > { %5883 = vmatmul.msk.f32.gmra.mxu1 %vm833_vm1, %v3955_v54  ;;  %v8304_v54 = vld [vmem:[#allocation9_spill] sm:$0xff] }
 0x412   : > { %5939 = vmatmul.msk.f32.gmra.mxu2 %vm833_vm1, %v4407_v10 }
 0x415   : > { %v2957_v49 = vpop.f32.mrf.mxu2  ;;  %5857 = vmatmul.msk.f32.gmra.mxu0 %vm833_vm1, %v7236_v20 }
 0x416   : > { %v7496_v12 = vadd.f32 %v2957_v49, %v2583_v42  ;;  %v2508_v4 = vpop.f32.mrf.mxu1  ;;  %v3957_v42 = vld [vmem:[#allocation2 + $0x68] sm:$0xff]  ;;  %v7516_v25 = vpop.f32.mrf.mxu3 }
 0x417   : > { %v2584_v10 = vadd.f32 %v2508_v4, %v8304_v54  ;;  %v4409_v49 = vld [vmem:[#allocation2 + $0x69] sm:$0xff] }
 0x418   : > { %8302 = vst [vmem:[#allocation107_spill] sm:$0xff] %v7496_v12  ;;  %v7511_v12 = vpop.f32.mrf.mxu0 }
 0x419   : > { %5884 = vmatmul.msk.f32.gmra.mxu1 %vm833_vm1, %v3956_v8  ;;  %v8306_v8 = vld [vmem:[#allocation11_spill] sm:$0xff] }
 0x41a   : > { %5940 = vmatmul.msk.f32.gmra.mxu2 %vm833_vm1, %v4408_v37  ;;  %8307 = vst [vmem:[#allocation11_spill] sm:$0xff] %v7516_v25  ;;  %v8343_v25 = vld [vmem:[#allocation32_spill] sm:$0xff] }
 0x41d   : > { %v2960_v3 = vpop.f32.mrf.mxu2  ;;  %5858 = vmatmul.msk.f32.gmra.mxu0 %vm833_vm1, %v7249_v45 }
 0x41e   : > { %v7507_v32 = vadd.f32 %v2960_v3, %v2584_v10  ;;  %v2511_v20 = vpop.f32.mrf.mxu1  ;;  %v3958_v10 = vld [vmem:[#allocation2 + $0x70] sm:$0xff] }
 0x41f   : > { %v2585_v37 = vadd.f32 %v2511_v20, %v8306_v8  ;;  %v4410_v3 = vld [vmem:[#allocation2 + $0x71] sm:$0xff] }
 0x420   : > { %8305 = vst [vmem:[#allocation9_spill] sm:$0xff] %v7507_v32 }
 0x421   : > { %5885 = vmatmul.msk.f32.gmra.mxu1 %vm833_vm1, %v3957_v42  ;;  %v7524_v42 = vpop.f32.mrf.mxu0 }
 0x422   : > { %5941 = vmatmul.msk.f32.gmra.mxu2 %vm833_vm1, %v4409_v49  ;;  %v8309_v49 = vld [vmem:[#allocation13_spill] sm:$0xff] }
 0x425   : > { %v2963_v4 = vpop.f32.mrf.mxu2  ;;  %5859 = vmatmul.msk.f32.gmra.mxu0 %vm833_vm1, %v7262_v47 }
 0x426   : > { %v7518_v54 = vadd.f32 %v2963_v4, %v2585_v37  ;;  %v2514_v45 = vpop.f32.mrf.mxu1  ;;  %v7531_v37 = vpop.f32.mrf.mxu3  ;;  %v3959_v4 = vld [vmem:[#allocation2 + $0x78] sm:$0xff] }
 0x427   : > { %v2586_v32 = vadd.f32 %v2514_v45, %v8309_v49  ;;  %8311 = vst [vmem:[#allocation110_spill] sm:$0xff] %v7531_v37  ;;  %v3960_v49 = vld [vmem:[#allocation2 + $0x80] sm:$0xff] }
 0x428   : > { %8308 = vst [vmem:[#allocation109_spill] sm:$0xff] %v7518_v54  ;;  %v4411_v54 = vld [vmem:[#allocation2 + $0x79] sm:$0xff] }
 0x429   : > { %5886 = vmatmul.msk.f32.gmra.mxu1 %vm833_vm1, %v3958_v10  ;;  %v8312_v10 = vld [vmem:[#allocation15_spill] sm:$0xff]  ;;  %v7536_v38 = vpop.f32.mrf.mxu0 }
 0x42a   : > { %5942 = vmatmul.msk.f32.gmra.mxu2 %vm833_vm1, %v4410_v3 }
 0x42d   : > { %v2966_v20 = vpop.f32.mrf.mxu2  ;;  %5860 = vmatmul.msk.f32.gmra.mxu0 %vm833_vm1, %v7273_v17 }
 0x42e   : > { %v7527_v8 = vadd.f32 %v2966_v20, %v2586_v32  ;;  %v2517_v47 = vpop.f32.mrf.mxu1  ;;  %v7542_v32 = vpop.f32.mrf.mxu3  ;;  %v4412_v20 = vld [vmem:[#allocation2 + $0x81] sm:$0xff] }
 0x42f   : > { %v2587_v3 = vadd.f32 %v2517_v47, %v8312_v10  ;;  %8314 = vst [vmem:[#allocation111_spill] sm:$0xff] %v7542_v32 }
 0x430   : > { %8310 = vst [vmem:[#allocation13_spill] sm:$0xff] %v7527_v8 }
 0x431   : > { %5887 = vmatmul.msk.f32.gmra.mxu1 %vm833_vm1, %v3959_v4 }
 0x432   : > { %5943 = vmatmul.msk.f32.gmra.mxu2 %vm833_vm1, %v4411_v54  ;;  %v8315_v54 = vld [vmem:[#allocation17_spill] sm:$0xff] }
 0x435   : > { %v2969_v22 = vpop.f32.mrf.mxu2  ;;  %5861 = vmatmul.msk.f32.gmra.mxu0 %vm833_vm1, %v7289_v40  ;;  %v3961_v40 = vld [vmem:[#allocation2 + $0x88] sm:$0xff] }
 0x436   : > { %v7538_v45 = vadd.f32 %v2969_v22, %v2587_v3  ;;  %v2520_v17 = vpop.f32.mrf.mxu1  ;;  %v7551_v3 = vpop.f32.mrf.mxu0 }
 0x437   : > { %v2588_v4 = vadd.f32 %v2520_v17, %v8315_v54 }
 0x438   : > { %8313 = vst [vmem:[#allocation15_spill] sm:$0xff] %v7538_v45  ;;  %v4413_v45 = vld [vmem:[#allocation2 + $0x89] sm:$0xff] }
 0x439   : > { %5888 = vmatmul.msk.f32.gmra.mxu1 %vm833_vm1, %v3960_v49  ;;  %v7555_v49 = vpop.f32.mrf.mxu3 }
 0x43a   : > { %5944 = vmatmul.msk.f32.gmra.mxu2 %vm833_vm1, %v4412_v20  ;;  %8317 = vst [vmem:[#allocation112_spill] sm:$0xff] %v7555_v49  ;;  %v8318_v20 = vld [vmem:[#allocation19_spill] sm:$0xff]  ;;  %v8336_v49 = vld [vmem:[#allocation28_spill] sm:$0xff] }
 0x43d   : > { %v2972_v47 = vpop.f32.mrf.mxu2  ;;  %5862 = vmatmul.msk.f32.gmra.mxu0 %vm833_vm1, %v7302_v2 }
 0x43e   : > { %v7547_v10 = vadd.f32 %v2972_v47, %v2588_v4  ;;  %v2523_v22 = vpop.f32.mrf.mxu1  ;;  %v3962_v4 = vld [vmem:[#allocation2 + $0x90] sm:$0xff] }
 0x43f   : > { %v2589_v8 = vadd.f32 %v2523_v22, %v8318_v20  ;;  %v4414_v47 = vld [vmem:[#allocation2 + $0x91] sm:$0xff] }
 0x440   : > { %8316 = vst [vmem:[#allocation17_spill] sm:$0xff] %v7547_v10  ;;  %v7562_v10 = vpop.f32.mrf.mxu0 }
 0x441   : > { %5889 = vmatmul.msk.f32.gmra.mxu1 %vm833_vm1, %v3961_v40  ;;  %v7567_v31 = vpop.f32.mrf.mxu3 }
 0x442   : > { %5945 = vmatmul.msk.f32.gmra.mxu2 %vm833_vm1, %v4413_v45  ;;  %v8320_v45 = vld [vmem:[#allocation21_spill] sm:$0xff] }
 0x443   : > { %8321 = vst [vmem:[#allocation21_spill] sm:$0xff] %v7567_v31 }
 0x445   : > { %v2975_v17 = vpop.f32.mrf.mxu2  ;;  %5863 = vmatmul.msk.f32.gmra.mxu0 %vm833_vm1, %v7315_v61 }
 0x446   : > { %v7558_v54 = vadd.f32 %v2975_v17, %v2589_v8  ;;  %v2526_v2 = vpop.f32.mrf.mxu1  ;;  %v3963_v8 = vld [vmem:[#allocation2 + $0x98] sm:$0xff] }
 0x447   : > { %v2590_v40 = vadd.f32 %v2526_v2, %v8320_v45  ;;  %v4415_v17 = vld [vmem:[#allocation2 + $0x99] sm:$0xff] }
 0x448   : > { %8319 = vst [vmem:[#allocation19_spill] sm:$0xff] %v7558_v54 }
 0x449   : > { %5890 = vmatmul.msk.f32.gmra.mxu1 %vm833_vm1, %v3962_v4  ;;  %v7575_v4 = vpop.f32.mrf.mxu0 }
 0x44a   : > { %5946 = vmatmul.msk.f32.gmra.mxu2 %vm833_vm1, %v4414_v47  ;;  %v8323_v47 = vld [vmem:[#allocation23_spill] sm:$0xff] }
 0x44d   : > { %v2978_v22 = vpop.f32.mrf.mxu2  ;;  %5864 = vmatmul.msk.f32.gmra.mxu0 %vm833_vm1, %v7328_v59 }
 0x44e   : > { %v7569_v20 = vadd.f32 %v2978_v22, %v2590_v40  ;;  %v2529_v61 = vpop.f32.mrf.mxu1  ;;  %v7582_v40 = vpop.f32.mrf.mxu3  ;;  %v3964_v22 = vld [vmem:[#allocation2 + $0xa0] sm:$0xff] }
 0x44f   : > { %v2591_v54 = vadd.f32 %v2529_v61, %v8323_v47  ;;  %8325 = vst [vmem:[#allocation114_spill] sm:$0xff] %v7582_v40  ;;  %v8329_v47 = vld [vmem:[#allocation24_spill] sm:$0xff]  ;;  %v3965_v40 = vld [vmem:[#allocation2 + $0xa8] sm:$0xff] }
 0x450   : > { %8322 = vst [vmem:[#allocation113_spill] sm:$0xff] %v7569_v20  ;;  %v4416_v20 = vld [vmem:[#allocation2 + $0xa1] sm:$0xff] }
 0x451   : > { %5891 = vmatmul.msk.f32.gmra.mxu1 %vm833_vm1, %v3963_v8  ;;  %v8326_v8 = vld [vmem:[#allocation25_spill] sm:$0xff]  ;;  %v7587_v31 = vpop.f32.mrf.mxu0 }
 0x452   : > { %5947 = vmatmul.msk.f32.gmra.mxu2 %vm833_vm1, %v4415_v17 }
 0x455   : > { %v2981_v2 = vpop.f32.mrf.mxu2  ;;  %5865 = vmatmul.msk.f32.gmra.mxu0 %vm833_vm1, %v7339_v36 }
 0x456   : > { %v7578_v45 = vadd.f32 %v2981_v2, %v2591_v54  ;;  %v2532_v59 = vpop.f32.mrf.mxu1  ;;  %v8328_v54 = vld [vmem:[#allocation3_spill] sm:$0xff] }
 0x457   : > { %v2592_v17 = vadd.f32 %v2532_v59, %v8326_v8  ;;  %v1530_v2 = vadd.f32 %v8329_v47, %v8328_v54  ;;  %v8332_v8 = vld [vmem:[#allocation27_spill] sm:$0xff]  ;;  %v8334_v54 = vld [vmem:[#allocation4_spill] sm:$0xff]  ;;  %v8335_v47 = vld [vmem:[#allocation26_spill] sm:$0xff] }
 0x458   : > { %8324 = vst [vmem:[#allocation23_spill] sm:$0xff] %v7578_v45  ;;  %v7595_v45 = vpop.f32.mrf.mxu3 }
 0x459   : > { %5892 = vmatmul.msk.f32.gmra.mxu1 %vm833_vm1, %v3964_v22  ;;  %8330 = vst [vmem:[#allocation3_spill] sm:$0xff] %v7595_v45  ;;  %v4417_v22 = vld [vmem:[#allocation2 + $0xa9] sm:$0xff]  ;;  %v1533_v45 = vadd.f32 %v8335_v47, %v8334_v54  ;;  %v7608_v37 = vpop.f32.mrf.mxu0  ;;  %v8342_v47 = vld [vmem:[#allocation29_spill] sm:$0xff] }
 0x45a   : > { %5948 = vmatmul.msk.f32.gmra.mxu2 %vm833_vm1, %v4416_v20  ;;  %v8331_v20 = vld [vmem:[#allocation73_spill] sm:$0xff] }
 0x45b   : > { %v2089_v59 = vadd.f32 %v8331_v20, %v1530_v2  ;;  %v8338_v2 = vld [vmem:[#allocation77_spill] sm:$0xff] }
 0x45c   : > { %v2090_v20 = vadd.f32 %v8338_v2, %v1533_v45  ;;  %v4419_v45 = vld [vmem:[#allocation2 + $0xb9] sm:$0xff] }
 0x45d   : > { %v2984_v39 = vpop.f32.mrf.mxu2  ;;  %5866 = vmatmul.msk.f32.gmra.mxu0 %vm833_vm1, %v7352_v21  ;;  %v2541_v32 = vadd.f32 %v8336_v49, %v2089_v59  ;;  %v8341_v59 = vld [vmem:[#allocation5_spill] sm:$0xff] }
 0x45e   : > { %v7589_v61 = vadd.f32 %v2984_v39, %v2592_v17  ;;  %v2535_v36 = vpop.f32.mrf.mxu1 }
 0x45f   : > { %v2593_v39 = vadd.f32 %v2535_v36, %v8332_v8  ;;  %v8339_v8 = vld [vmem:[#allocation30_spill] sm:$0xff] }
 0x460   : > { %8327 = vst [vmem:[#allocation25_spill] sm:$0xff] %v7589_v61  ;;  %v7612_v36 = vpop.f32.mrf.mxu3 }
 0x461   : > { %5893 = vmatmul.msk.f32.gmra.mxu1 %vm833_vm1, %v3965_v40  ;;  %v3966_v40 = vld [vmem:[#allocation2 + $0xb0] sm:$0xff]  ;;  %8337 = vst [vmem:[#allocation73_spill] sm:$0xff] %v7612_v36  ;;  %v7626_v2 = vpop.f32.mrf.mxu0 }
 0x462   : > { %5949 = vmatmul.msk.f32.gmra.mxu2 %vm833_vm1, %v4417_v22  ;;  %v4418_v22 = vld [vmem:[#allocation2 + $0xb1] sm:$0xff] }
 0x465   : > { %v2987_v17 = vpop.f32.mrf.mxu2  ;;  %5867 = vmatmul.msk.f32.gmra.mxu0 %vm833_vm1, %v7367_v24  ;;  %v2993_v24 = vadd.f32 %v8339_v8, %v2541_v32 }
 0x466   : > { %v7601_v61 = vadd.f32 %v2987_v17, %v2593_v39  ;;  %v2538_v21 = vpop.f32.mrf.mxu1  ;;  %v8340_v39 = vld [vmem:[#allocation31_spill] sm:$0xff] }
 0x467   : > { %v2594_v17 = vadd.f32 %v2538_v21, %v8340_v39  ;;  %v3445_v36 = vadd.f32 %v8344_v28, %v2993_v24  ;;  %v8346_v21 = vld [vmem:[#allocation34_spill] sm:$0xff] }
 0x468   : > { %8333 = vst [vmem:[#allocation24_spill] sm:$0xff] %v7601_v61  ;;  %v7637_v28 = vpop.f32.mrf.mxu3 }
 0x469   : > { %5894 = vmatmul.msk.f32.gmra.mxu1 %vm833_vm1, %v3966_v40  ;;  %v1536_v40 = vadd.f32 %v8342_v47, %v8341_v59  ;;  %v3897_v32 = vadd.f32 %v7295_v7, %v3445_v36  ;;  %v8347_v36 = vld [vmem:[#allocation36_spill] sm:$0xff] }
 0x46a   : > { %5950 = vmatmul.msk.f32.gmra.mxu2 %vm833_vm1, %v4418_v22  ;;  %v2542_v22 = vadd.f32 %v8343_v25, %v2090_v20  ;;  %v7635_v25 = vld [vmem:[%s8194_s4] ss:$0 sm:$0xff] }
 0x46c   : > { %v2994_v8 = vadd.f32 %v8346_v21, %v2542_v22  ;;  %v8349_v22 = vld [vmem:[#allocation6_spill] sm:$0xff] }
 0x46d   : > { %v2990_v61 = vpop.f32.mrf.mxu2  ;;  %5868 = vmatmul.msk.f32.gmra.mxu0 %vm833_vm1, %v7380_v34 }
 0x46e   : > { %v7617_v54 = vadd.f32 %v2990_v61, %v2594_v17  ;;  %v4187_v49 = vpop.f32.mrf.mxu1  ;;  %v8345_v61 = vld [vmem:[#allocation80_spill] sm:$0xff]  ;;  %v8348_v17 = vld [vmem:[#allocation39_spill] sm:$0xff] }
 0x46f   : > { %v2091_v34 = vadd.f32 %v8345_v61, %v1536_v40  ;;  %v4349_v39 = vadd.f32 %v4187_v49, %v3897_v32  ;;  %v3446_v59 = vadd.f32 %v8348_v17, %v2994_v8  ;;  %v3968_v49 = vld [vmem:[#allocation2 + $0xc0] sm:$0xff] }
 0x470   : > { %v4420_v40 = vld [vmem:[#allocation2 + $0xc1] sm:$0xff] }
 0x471   : > { %5895 = vmatmul.msk.f32.gmra.mxu1 %vm833_vm1, %v3967_v63  ;;  %v2543_v24 = vadd.f32 %v8347_v36, %v2091_v34  ;;  %v3898_v61 = vadd.f32 %v7309_v33, %v3446_v59  ;;  %v7656_v33 = vpop.f32.mrf.mxu3  ;;  %v8352_v59 = vld [vmem:[#allocation40_spill] sm:$0xff] }
 0x472   : > { %5951 = vmatmul.msk.f32.gmra.mxu2 %vm833_vm1, %v4419_v45  ;;  %v8350_v45 = vld [vmem:[#allocation33_spill] sm:$0xff] }
 0x473   : > { %v1539_v32 = vadd.f32 %v8350_v45, %v8349_v22  ;;  %v4421_v22 = vld [vmem:[#allocation2 + $0xc9] sm:$0xff] }
 0x474   : > { %v8354_v45 = vld [vmem:[#allocation7_spill] sm:$0xff] }
 0x475   : > { %v4639_v20 = vpop.f32.mrf.mxu2  ;;  %5869 = vmatmul.msk.f32.gmra.mxu0 %vm833_vm1, %v7393_v60  ;;  %v2092_v60 = vadd.f32 %v7151_v0, %v1539_v32 }
 0x476   : > { %v4801_v7 = vadd.f32 %v4639_v20, %v4349_v39  ;;  %v4190_v63 = vpop.f32.mrf.mxu1  ;;  %v8351_v39 = vld [vmem:[#allocation38_spill] sm:$0xff]  ;;  %v7651_v20 = vpop.f32.mrf.mxu0 }
 0x477   : > { %v2995_v34 = vadd.f32 %v8351_v39, %v2543_v24  ;;  %v4350_v8 = vadd.f32 %v4190_v63, %v3898_v61  ;;  %v3969_v24 = vld [vmem:[#allocation2 + $0xc8] sm:$0xff]  ;;  %v8355_v63 = vld [vmem:[#allocation37_spill] sm:$0xff] }
 0x478   : > { %v4859_v47 = vadd.f32 %v7635_v25, %v4801_v7  ;;  %v1542_v32 = vadd.f32 %v8355_v63, %v8354_v45  ;;  %v8356_v39 = vld [vmem:[#allocation42_spill] sm:$0xff]  ;;  %v8360_v45 = vld [vmem:[#allocation41_spill] sm:$0xff] }
 0x479   : > { %5896 = vmatmul.msk.f32.gmra.mxu1 %vm833_vm1, %v3968_v49  ;;  %v8353_v49 = vld [vmem:[#allocation43_spill] sm:$0xff] }
 0x47a   : > { %v4913_v21 = vmax.f32 %v4859_v47, 0.0  ;;  %5952 = vmatmul.msk.f32.gmra.mxu2 %vm833_vm1, %v4420_v40  ;;  %v2544_v47 = vadd.f32 %v8352_v59, %v2092_v60  ;;  %v3447_v40 = vadd.f32 %v8353_v49, %v2995_v34  ;;  %v8357_v59 = vld [vmem:[#allocation44_spill] sm:$0xff] }
 0x47c   : > { %5989 = vmatmul.msk.f32.vlgmr.msra.gmra.mxu3 %vm833_vm1, %v4913_v21  ;;  %v3899_v61 = vadd.f32 %v7326_v35, %v3447_v40  ;;  %v2996_v60 = vadd.f32 %v8356_v39, %v2544_v47  ;;  %v8358_v40 = vld [vmem:[#allocation47_spill] sm:$0xff] }
 0x47d   : > { %v4642_v7 = vpop.f32.mrf.mxu2  ;;  %5870 = vmatmul.msk.f32.gmra.mxu0 %vm833_vm1, %v7404_v30  ;;  %v2093_v30 = vadd.f32 %v7164_v13, %v1542_v32  ;;  %v7676_v13 = vpop.f32.mrf.mxu3  ;;  %v3970_v47 = vld [vmem:[#allocation2 + $0xd0] sm:$0xff] }
 0x47e   : > { %v4802_v36 = vadd.f32 %v4642_v7, %v4350_v8  ;;  %v4193_v17 = vpop.f32.mrf.mxu1  ;;  %v7669_v7 = vpop.f32.mrf.mxu0 }
 0x47f   : > { %v4351_v8 = vadd.f32 %v4193_v17, %v3899_v61  ;;  %v2545_v49 = vadd.f32 %v8357_v59, %v2093_v30  ;;  %v4422_v17 = vld [vmem:[#allocation2 + $0xd1] sm:$0xff] }
 0x480   : > { %v4860_v0 = vadd.f32 %v7635_v25, %v4802_v36  ;;  %v8363_v59 = vld [vmem:[#allocation51_spill] sm:$0xff] }
 0x481   : > { %5897 = vmatmul.msk.f32.gmra.mxu1 %vm833_vm1, %v3969_v24 }
 0x482   : > { %v4914_v21 = vmax.f32 %v4860_v0, 0.0  ;;  %5953 = vmatmul.msk.f32.gmra.mxu2 %vm833_vm1, %v4421_v22  ;;  %v3448_v0 = vadd.f32 %v8358_v40, %v2996_v60  ;;  %v8359_v22 = vld [vmem:[#allocation8_spill] sm:$0xff] }
 0x483   : > { %v1545_v63 = vadd.f32 %v8360_v45, %v8359_v22 }
 0x484   : > { %5990 = vmatmul.msk.f32.gmra.mxu3 %vm833_vm1, %v4914_v21  ;;  %v3900_v32 = vadd.f32 %v7341_v11, %v3448_v0  ;;  %v8361_v21 = vld [vmem:[#allocation46_spill] sm:$0xff] }
 0x485   : > { %v4645_v34 = vpop.f32.mrf.mxu2  ;;  %5871 = vmatmul.msk.f32.gmra.mxu0 %vm833_vm1, %v7417_v52  ;;  %v2094_v52 = vadd.f32 %v7177_v29, %v1545_v63  ;;  %v2997_v30 = vadd.f32 %v8361_v21, %v2545_v49  ;;  %v3971_v29 = vld [vmem:[#allocation2 + $0xd8] sm:$0xff]  ;;  %v8364_v49 = vld [vmem:[#allocation10_spill] sm:$0xff] }
 0x486   : > { %v4803_v36 = vadd.f32 %v4645_v34, %v4351_v8  ;;  %v4196_v35 = vpop.f32.mrf.mxu1  ;;  %v7690_v0 = vpop.f32.mrf.mxu0 }
 0x487   : > { %v4352_v39 = vadd.f32 %v4196_v35, %v3900_v32  ;;  %v3449_v40 = vadd.f32 %v8363_v59, %v2997_v30  ;;  %v8365_v35 = vld [vmem:[#allocation45_spill] sm:$0xff]  ;;  %v8366_v32 = vld [vmem:[#allocation50_spill] sm:$0xff] }
 0x488   : > { %v4861_v24 = vadd.f32 %v7635_v25, %v4803_v36  ;;  %v8362_v36 = vld [vmem:[#allocation48_spill] sm:$0xff] }
 0x489   : > { %5898 = vmatmul.msk.f32.gmra.mxu1 %vm833_vm1, %v3970_v47  ;;  %v2546_v11 = vadd.f32 %v8362_v36, %v2094_v52  ;;  %v4423_v47 = vld [vmem:[#allocation2 + $0xd9] sm:$0xff]  ;;  %v3901_v22 = vadd.f32 %v7358_v53, %v3449_v40 }
 0x48a   : > { %v4915_v61 = vmax.f32 %v4861_v24, 0.0  ;;  %5954 = vmatmul.msk.f32.gmra.mxu2 %vm833_vm1, %v4422_v17  ;;  %v1548_v17 = vadd.f32 %v8365_v35, %v8364_v49  ;;  %v3972_v40 = vld [vmem:[#allocation2 + $0xe0] sm:$0xff]  ;;  %v8371_v35 = vld [vmem:[#allocation54_spill] sm:$0xff] }
 0x48c   : > { %5991 = vmatmul.msk.f32.gmra.mxu3 %vm833_vm1, %v4915_v61  ;;  %v2095_v63 = vadd.f32 %v7190_v41, %v1548_v17  ;;  %v2998_v61 = vadd.f32 %v8366_v32, %v2546_v11  ;;  %v8369_v41 = vld [vmem:[#allocation12_spill] sm:$0xff]  ;;  %v3550_v32 = vld [vmem:[#allocation2 + $0x1cf] sm:$0xff] }
 0x48d   : > { %v4648_v60 = vpop.f32.mrf.mxu2  ;;  %5872 = vmatmul.msk.f32.gmra.mxu0 %vm833_vm1, %v7430_v46  ;;  %v7698_v46 = vpop.f32.mrf.mxu3 }
 0x48e   : > { %v4804_v8 = vadd.f32 %v4648_v60, %v4352_v39  ;;  %v4199_v34 = vpop.f32.mrf.mxu1  ;;  %v8367_v39 = vld [vmem:[#allocation52_spill] sm:$0xff] }
 0x48f   : > { %v4353_v52 = vadd.f32 %v4199_v34, %v3901_v22  ;;  %v2547_v60 = vadd.f32 %v8367_v39, %v2095_v63 }
 0x490   : > { %v4862_v24 = vadd.f32 %v7635_v25, %v4804_v8  ;;  %v8368_v8 = vld [vmem:[#allocation55_spill] sm:$0xff] }
 0x491   : > { %5899 = vmatmul.msk.f32.gmra.mxu1 %vm833_vm1, %v3971_v29  ;;  %v3450_v36 = vadd.f32 %v8368_v8, %v2998_v61  ;;  %v8370_v29 = vld [vmem:[#allocation49_spill] sm:$0xff]  ;;  %v2999_v17 = vadd.f32 %v8371_v35, %v2547_v60  ;;  %v8374_v60 = vld [vmem:[#allocation14_spill] sm:$0xff] }
 0x492   : > { %v4916_v45 = vmax.f32 %v4862_v24, 0.0  ;;  %5955 = vmatmul.msk.f32.gmra.mxu2 %vm833_vm1, %v4423_v47  ;;  %v4424_v24 = vld [vmem:[#allocation2 + $0xe1] sm:$0xff]  ;;  %v1551_v11 = vadd.f32 %v8370_v29, %v8369_v41  ;;  %v7711_v47 = vpop.f32.mrf.mxu0  ;;  %v3551_v41 = vld [vmem:[#allocation2 + $0x1d7] sm:$0xff] }
 0x493   : > { %v3902_v34 = vadd.f32 %v7374_v43, %v3450_v36  ;;  %v4425_v36 = vld [vmem:[#allocation2 + $0xe9] sm:$0xff] }
 0x494   : > { %5992 = vmatmul.msk.f32.gmra.mxu3 %vm833_vm1, %v4916_v45 }
 0x495   : > { %v4651_v21 = vpop.f32.mrf.mxu2  ;;  %5873 = vmatmul.msk.f32.gmra.mxu0 %vm833_vm1, %v7443_v19  ;;  %v2096_v19 = vadd.f32 %v7203_v55, %v1551_v11  ;;  %v7718_v45 = vpop.f32.mrf.mxu3  ;;  %v3973_v55 = vld [vmem:[#allocation2 + $0xe8] sm:$0xff] }
 0x496   : > { %v4805_v30 = vadd.f32 %v4651_v21, %v4353_v52  ;;  %v4202_v53 = vpop.f32.mrf.mxu1  ;;  %v8372_v52 = vld [vmem:[#allocation56_spill] sm:$0xff]  ;;  %v8376_v11 = vld [vmem:[#allocation58_spill] sm:$0xff] }
 0x497   : > { %v4354_v22 = vadd.f32 %v4202_v53, %v3902_v34  ;;  %v2548_v21 = vadd.f32 %v8372_v52, %v2096_v19  ;;  %v8375_v53 = vld [vmem:[#allocation53_spill] sm:$0xff] }
 0x498   : > { %v4863_v59 = vadd.f32 %v7635_v25, %v4805_v30  ;;  %v8373_v30 = vld [vmem:[#allocation59_spill] sm:$0xff] }
 0x499   : > { %5900 = vmatmul.msk.f32.gmra.mxu1 %vm833_vm1, %v3972_v40  ;;  %v3451_v39 = vadd.f32 %v8373_v30, %v2999_v17  ;;  %v3000_v34 = vadd.f32 %v8376_v11, %v2548_v21  ;;  %v3974_v30 = vld [vmem:[#allocation2 + $0xf0] sm:$0xff] }
 0x49a   : > { %v4917_v49 = vmax.f32 %v4863_v59, 0.0  ;;  %5956 = vmatmul.msk.f32.gmra.mxu2 %vm833_vm1, %v4424_v24  ;;  %v1554_v59 = vadd.f32 %v8375_v53, %v8374_v60  ;;  %v4426_v21 = vld [vmem:[#allocation2 + $0xf1] sm:$0xff]  ;;  %v3552_v60 = vld [vmem:[#allocation2 + $0x1df] sm:$0xff] }
 0x49b   : > { %v3903_v40 = vadd.f32 %v7391_v9, %v3451_v39  ;;  %v8379_v39 = vld [vmem:[#allocation16_spill] sm:$0xff] }
 0x49c   : > { %5993 = vmatmul.msk.f32.gmra.mxu3 %vm833_vm1, %v4917_v49  ;;  %v2097_v29 = vadd.f32 %v7216_v6, %v1554_v59  ;;  %v7731_v49 = vpop.f32.mrf.mxu0  ;;  %v8381_v59 = vld [vmem:[#allocation62_spill] sm:$0xff] }
 0x49d   : > { %v4654_v63 = vpop.f32.mrf.mxu2  ;;  %5874 = vmatmul.msk.f32.gmra.mxu0 %vm833_vm1, %v3550_v32  ;;  %v7735_v9 = vpop.f32.mrf.mxu3 }
 0x49e   : > { %v4806_v61 = vadd.f32 %v4654_v63, %v4354_v22  ;;  %v4205_v43 = vpop.f32.mrf.mxu1  ;;  %v8377_v63 = vld [vmem:[#allocation60_spill] sm:$0xff] }
 0x49f   : > { %v4355_v19 = vadd.f32 %v4205_v43, %v3903_v40  ;;  %v2549_v32 = vadd.f32 %v8377_v63, %v2097_v29 }
 0x4a0   : > { %v4864_v8 = vadd.f32 %v7635_v25, %v4806_v61  ;;  %v8378_v61 = vld [vmem:[#allocation63_spill] sm:$0xff] }
 0x4a1   : > { %5901 = vmatmul.msk.f32.gmra.mxu1 %vm833_vm1, %v3973_v55  ;;  %v3452_v52 = vadd.f32 %v8378_v61, %v3000_v34  ;;  %v3001_v40 = vadd.f32 %v8381_v59, %v2549_v32  ;;  %v8382_v34 = vld [vmem:[#allocation64_spill] sm:$0xff] }
 0x4a2   : > { %v4918_v24 = vmax.f32 %v4864_v8, 0.0  ;;  %5957 = vmatmul.msk.f32.gmra.mxu2 %vm833_vm1, %v4425_v36  ;;  %v8380_v8 = vld [vmem:[#allocation57_spill] sm:$0xff]  ;;  %v8387_v59 = vld [vmem:[#allocation68_spill] sm:$0xff] }
 0x4a3   : > { %v1557_v43 = vadd.f32 %v8380_v8, %v8379_v39  ;;  %v3904_v55 = vadd.f32 %v7406_v48, %v3452_v52  ;;  %v4427_v32 = vld [vmem:[#allocation2 + $0xf9] sm:$0xff]  ;;  %v8386_v8 = vld [vmem:[#allocation66_spill] sm:$0xff] }
 0x4a4   : > { %5994 = vmatmul.msk.f32.gmra.mxu3 %vm833_vm1, %v4918_v24  ;;  %v7748_v29 = vpop.f32.mrf.mxu0  ;;  %v8385_v52 = vld [vmem:[#allocation61_spill] sm:$0xff] }
 0x4a5   : > { %v4657_v35 = vpop.f32.mrf.mxu2  ;;  %5875 = vmatmul.msk.f32.gmra.mxu0 %vm833_vm1, %v3551_v41  ;;  %v2098_v53 = vadd.f32 %v7230_v23, %v1557_v43  ;;  %v7754_v61 = vpop.f32.mrf.mxu3  ;;  %v3975_v23 = vld [vmem:[#allocation2 + $0xf8] sm:$0xff] }
 0x4a6   : > { %v4807_v17 = vadd.f32 %v4657_v35, %v4355_v19  ;;  %v4208_v22 = vpop.f32.mrf.mxu1  ;;  %v8383_v35 = vld [vmem:[#allocation67_spill] sm:$0xff] }
 0x4a7   : > { %v4356_v24 = vadd.f32 %v4208_v22, %v3904_v55  ;;  %v2550_v19 = vadd.f32 %v8382_v34, %v2098_v53  ;;  %v8384_v22 = vld [vmem:[#allocation18_spill] sm:$0xff] }
 0x4a8   : > { %v4865_v6 = vadd.f32 %v7635_v25, %v4807_v17  ;;  %v3453_v17 = vadd.f32 %v8383_v35, %v3001_v40  ;;  %v4428_v34 = vld [vmem:[#allocation2 + $0x101] sm:$0xff]  ;;  %v8389_v35 = vld [vmem:[#allocation20_spill] sm:$0xff] }
 0x4a9   : > { %5902 = vmatmul.msk.f32.gmra.mxu1 %vm833_vm1, %v3974_v30  ;;  %v3002_v43 = vadd.f32 %v8386_v8, %v2550_v19 }
 0x4aa   : > { %v4919_v36 = vmax.f32 %v4865_v6, 0.0  ;;  %5958 = vmatmul.msk.f32.gmra.mxu2 %vm833_vm1, %v4426_v21  ;;  %v1560_v6 = vadd.f32 %v8385_v52, %v8384_v22  ;;  %v3905_v30 = vadd.f32 %v7423_v5, %v3453_v17  ;;  %v8390_v17 = vld [vmem:[#allocation65_spill] sm:$0xff] }
 0x4ac   : > { %5995 = vmatmul.msk.f32.gmra.mxu3 %vm833_vm1, %v4919_v36  ;;  %v2099_v39 = vadd.f32 %v7243_v44, %v1560_v6 }
 0x4ad   : > { %v4660_v41 = vpop.f32.mrf.mxu2  ;;  %5876 = vmatmul.msk.f32.gmra.mxu0 %vm833_vm1, %v3552_v60 }
 0x4ae   : > { %v4808_v11 = vadd.f32 %v4660_v41, %v4356_v24  ;;  %v4211_v48 = vpop.f32.mrf.mxu1  ;;  %v2551_v40 = vadd.f32 %v8387_v59, %v2099_v39  ;;  %v8388_v24 = vld [vmem:[#allocation71_spill] sm:$0xff]  ;;  %v8392_v39 = vld [vmem:[#allocation72_spill] sm:$0xff]  ;;  %v8394_v59 = vld [vmem:[#allocation22_spill] sm:$0xff] }
 0x4af   : > { %v4357_v55 = vadd.f32 %v4211_v48, %v3905_v30  ;;  %v3454_v41 = vadd.f32 %v8388_v24, %v3002_v43  ;;  %v7772_v48 = vpop.f32.mrf.mxu3  ;;  %v8395_v24 = vld [vmem:[#allocation69_spill] sm:$0xff] }
 0x4b0   : > { %v4866_v63 = vadd.f32 %v7635_v25, %v4808_v11  ;;  %v3976_v11 = vld [vmem:[#allocation2 + $0x100] sm:$0xff] }
 0x4b1   : > { %5903 = vmatmul.msk.f32.gmra.mxu1 %vm833_vm1, %v3975_v23  ;;  %v3906_v44 = vadd.f32 %v7437_v14, %v3454_v41  ;;  %v8393_v14 = vld [vmem:[#allocation75_spill] sm:$0xff]  ;;  %v1566_v41 = vadd.f32 %v8395_v24, %v8394_v59 }
 0x4b2   : > { %v4920_v21 = vmax.f32 %v4866_v63, 0.0  ;;  %5959 = vmatmul.msk.f32.gmra.mxu2 %vm833_vm1, %v4427_v32  ;;  %v1563_v63 = vadd.f32 %v8390_v17, %v8389_v35  ;;  %v8391_v32 = vld [vmem:[#allocation70_spill] sm:$0xff] }
 0x4b3   : > { %v3003_v22 = vadd.f32 %v8391_v32, %v2551_v40 }
 0x4b4   : > { %5996 = vmatmul.msk.f32.gmra.mxu3 %vm833_vm1, %v4920_v21  ;;  %v2100_v23 = vadd.f32 %v7260_v62, %v1563_v63 }
 0x4b5   : > { %v4663_v36 = vpop.f32.mrf.mxu2  ;;  %v3455_v43 = vadd.f32 %v8393_v14, %v3003_v22 }
 0x4b6   : > { %v4809_v60 = vadd.f32 %v4663_v36, %v4357_v55  ;;  %v4214_v53 = vpop.f32.mrf.mxu1  ;;  %v2552_v8 = vadd.f32 %v8392_v39, %v2100_v23  ;;  %v3977_v36 = vld [vmem:[#allocation2 + $0x108] sm:$0xff] }
 0x4b7   : > { %v4358_v52 = vadd.f32 %v4214_v53, %v3906_v44  ;;  %v3907_v62 = vadd.f32 %v7454_v58, %v3455_v43  ;;  %v2101_v53 = vadd.f32 %v7275_v15, %v1566_v41  ;;  %v7788_v35 = vpop.f32.mrf.mxu3  ;;  %v8398_v58 = vld [vmem:[#allocation79_spill] sm:$0xff]  ;;  %v4431_v41 = vld [vmem:[#allocation2 + $0x119] sm:$0xff] }
 0x4b8   : > { %v4867_v5 = vadd.f32 %v7635_v25, %v4809_v60  ;;  %v4429_v60 = vld [vmem:[#allocation2 + $0x109] sm:$0xff] }
 0x4b9   : > { %5904 = vmatmul.msk.f32.gmra.mxu1 %vm833_vm1, %v3976_v11 }
 0x4ba   : > { %v4921_v19 = vmax.f32 %v4867_v5, 0.0  ;;  %5960 = vmatmul.msk.f32.gmra.mxu2 %vm833_vm1, %v4428_v34  ;;  %v8396_v5 = vld [vmem:[#allocation74_spill] sm:$0xff] }
 0x4bb   : > { %v3004_v11 = vadd.f32 %v8396_v5, %v2552_v8 }
 0x4bc   : > { %5997 = vmatmul.msk.f32.gmra.mxu3 %vm833_vm1, %v4921_v19  ;;  %v8397_v19 = vld [vmem:[#allocation76_spill] sm:$0xff] }
 0x4bd   : > { %v4666_v6 = vpop.f32.mrf.mxu2  ;;  %v2553_v23 = vadd.f32 %v8397_v19, %v2101_v53  ;;  %v3456_v32 = vadd.f32 %v8398_v58, %v3004_v11  ;;  %v4432_v19 = vld [vmem:[#allocation2 + $0x121] sm:$0xff] }
 0x4be   : > { %v4810_v30 = vadd.f32 %v4666_v6, %v4358_v52  ;;  %v4217_v21 = vpop.f32.mrf.mxu1  ;;  %v3978_v52 = vld [vmem:[#allocation2 + $0x110] sm:$0xff] }
 0x4bf   : > { %v4359_v34 = vadd.f32 %v4217_v21, %v3907_v62  ;;  %v4430_v6 = vld [vmem:[#allocation2 + $0x111] sm:$0xff]  ;;  %v3908_v15 = vadd.f32 %v7464_v56, %v3456_v32  ;;  %v8399_v21 = vld [vmem:[#allocation78_spill] sm:$0xff] }
 0x4c0   : > { %v4868_v55 = vadd.f32 %v7635_v25, %v4810_v30  ;;  %v3005_v39 = vadd.f32 %v8399_v21, %v2553_v23  ;;  %v3979_v56 = vld [vmem:[#allocation2 + $0x118] sm:$0xff]  ;;  %v8401_v23 = vld [vmem:[#allocation82_spill] sm:$0xff] }
 0x4c1   : > { %5905 = vmatmul.msk.f32.gmra.mxu1 %vm833_vm1, %v3977_v36  ;;  %v4433_v21 = vld [vmem:[#allocation2 + $0x129] sm:$0xff] }
 0x4c2   : > { %v4922_v40 = vmax.f32 %v4868_v55, 0.0  ;;  %5961 = vmatmul.msk.f32.gmra.mxu2 %vm833_vm1, %v4429_v60  ;;  %v7798_v55 = vpop.f32.mrf.mxu3  ;;  %v8400_v60 = vld [vmem:[#allocation81_spill] sm:$0xff] }
 0x4c3   : > { %v3457_v59 = vadd.f32 %v8400_v60, %v3005_v39  ;;  %v8402_v39 = vld [vmem:[#allocation83_spill] sm:$0xff] }
 0x4c4   : > { %5998 = vmatmul.msk.f32.gmra.mxu3 %vm833_vm1, %v4922_v40 }
 0x4c5   : > { %v4669_v17 = vpop.f32.mrf.mxu2  ;;  %v3909_v62 = vadd.f32 %v7475_v50, %v3457_v59  ;;  %v3910_v50 = vadd.f32 %v7485_v27, %v8401_v23  ;;  %v4435_v23 = vld [vmem:[#allocation2 + $0x139] sm:$0xff] }
 0x4c6   : > { %v4811_v63 = vadd.f32 %v4669_v17, %v4359_v34  ;;  %v4220_v44 = vpop.f32.mrf.mxu1 }
 0x4c7   : > { %v4360_v8 = vadd.f32 %v4220_v44, %v3908_v15  ;;  %v3980_v44 = vld [vmem:[#allocation2 + $0x120] sm:$0xff] }
 0x4c8   : > { %v4869_v22 = vadd.f32 %v7635_v25, %v4811_v63 }
 0x4c9   : > { %5906 = vmatmul.msk.f32.gmra.mxu1 %vm833_vm1, %v3978_v52 }
 0x4ca   : > { %v4923_v30 = vmax.f32 %v4869_v22, 0.0  ;;  %5962 = vmatmul.msk.f32.gmra.mxu2 %vm833_vm1, %v4430_v6  ;;  %v7807_v63 = vpop.f32.mrf.mxu3 }
 0x4cc   : > { %5999 = vmatmul.msk.f32.gmra.mxu3 %vm833_vm1, %v4923_v30  ;;  %v3981_v30 = vld [vmem:[#allocation2 + $0x128] sm:$0xff] }
 0x4cd   : > { %v4672_v14 = vpop.f32.mrf.mxu2 }
 0x4ce   : > { %v4812_v43 = vadd.f32 %v4672_v14, %v4360_v8  ;;  %v4223_v36 = vpop.f32.mrf.mxu1  ;;  %v3911_v8 = vadd.f32 %v7500_v26, %v8402_v39  ;;  %v4436_v39 = vld [vmem:[#allocation2 + $0x141] sm:$0xff] }
 0x4cf   : > { %v4361_v53 = vadd.f32 %v4223_v36, %v3909_v62  ;;  %v8403_v62 = vld [vmem:[#allocation84_spill] sm:$0xff] }
 0x4d0   : > { %v4870_v24 = vadd.f32 %v7635_v25, %v4812_v43  ;;  %v3912_v26 = vadd.f32 %v7511_v12, %v8403_v62  ;;  %v3985_v62 = vld [vmem:[#allocation2 + $0x148] sm:$0xff] }
 0x4d1   : > { %5907 = vmatmul.msk.f32.gmra.mxu1 %vm833_vm1, %v3979_v56  ;;  %v3982_v56 = vld [vmem:[#allocation2 + $0x130] sm:$0xff] }
 0x4d2   : > { %v4924_v40 = vmax.f32 %v4870_v24, 0.0  ;;  %5963 = vmatmul.msk.f32.gmra.mxu2 %vm833_vm1, %v4431_v41  ;;  %v7819_v27 = vpop.f32.mrf.mxu3  ;;  %v4434_v41 = vld [vmem:[#allocation2 + $0x131] sm:$0xff] }
 0x4d4   : > { %6000 = vmatmul.msk.f32.gmra.mxu3 %vm833_vm1, %v4924_v40 }
 0x4d5   : > { %v4675_v5 = vpop.f32.mrf.mxu2 }
 0x4d6   : > { %v4813_v11 = vadd.f32 %v4675_v5, %v4361_v53  ;;  %v4226_v34 = vpop.f32.mrf.mxu1 }
 0x4d7   : > { %v4362_v32 = vadd.f32 %v4226_v34, %v3910_v50  ;;  %v8404_v50 = vld [vmem:[#allocation85_spill] sm:$0xff] }
 0x4d8   : > { %v4871_v17 = vadd.f32 %v7635_v25, %v4813_v11  ;;  %v3913_v12 = vadd.f32 %v7524_v42, %v8404_v50 }
 0x4d9   : > { %5908 = vmatmul.msk.f32.gmra.mxu1 %vm833_vm1, %v3980_v44 }
 0x4da   : > { %v4925_v58 = vmax.f32 %v4871_v17, 0.0  ;;  %5964 = vmatmul.msk.f32.gmra.mxu2 %vm833_vm1, %v4432_v19  ;;  %v7828_v5 = vpop.f32.mrf.mxu3  ;;  %v3983_v19 = vld [vmem:[#allocation2 + $0x138] sm:$0xff] }
 0x4dc   : > { %6001 = vmatmul.msk.f32.gmra.mxu3 %vm833_vm1, %v4925_v58 }
 0x4dd   : > { %v4678_v22 = vpop.f32.mrf.mxu2 }
 0x4de   : > { %v4814_v52 = vadd.f32 %v4678_v22, %v4362_v32  ;;  %v4229_v6 = vpop.f32.mrf.mxu1 }
 0x4df   : > { %v4363_v43 = vadd.f32 %v4229_v6, %v3911_v8  ;;  %v8405_v8 = vld [vmem:[#allocation86_spill] sm:$0xff] }
 0x4e0   : > { %v4872_v15 = vadd.f32 %v7635_v25, %v4814_v52  ;;  %v3914_v42 = vadd.f32 %v7536_v38, %v8405_v8 }
 0x4e1   : > { %5909 = vmatmul.msk.f32.gmra.mxu1 %vm833_vm1, %v3981_v30 }
 0x4e2   : > { %v4926_v14 = vmax.f32 %v4872_v15, 0.0  ;;  %5965 = vmatmul.msk.f32.gmra.mxu2 %vm833_vm1, %v4433_v21  ;;  %v7836_v6 = vpop.f32.mrf.mxu3  ;;  %v3984_v21 = vld [vmem:[#allocation2 + $0x140] sm:$0xff] }
 0x4e4   : > { %6002 = vmatmul.msk.f32.gmra.mxu3 %vm833_vm1, %v4926_v14 }
 0x4e5   : > { %v4681_v36 = vpop.f32.mrf.mxu2 }
 0x4e6   : > { %v4815_v60 = vadd.f32 %v4681_v36, %v4363_v43  ;;  %v4232_v59 = vpop.f32.mrf.mxu1  ;;  %v7847_v36 = vld [vmem:[%s8196_s6] ss:$0 sm:$0xff] }
 0x4e7   : > { %v4364_v53 = vadd.f32 %v4232_v59, %v3912_v26  ;;  %v4437_v26 = vld [vmem:[#allocation2 + $0x149] sm:$0xff] }
 0x4e8   : > { %v4873_v24 = vadd.f32 %v7635_v25, %v4815_v60 }
 0x4e9   : > { %5910 = vmatmul.msk.f32.gmra.mxu1 %vm833_vm1, %v3982_v56 }
 0x4ea   : > { %v4927_v40 = vmax.f32 %v4873_v24, 0.0  ;;  %5966 = vmatmul.msk.f32.gmra.mxu2 %vm833_vm1, %v4434_v41 }
 0x4ec   : > { %6003 = vmatmul.msk.f32.gmra.mxu3 %vm833_vm1, %v4927_v40  ;;  %v8406_v40 = vld [vmem:[#allocation87_spill] sm:$0xff] }
 0x4ed   : > { %v4684_v11 = vpop.f32.mrf.mxu2 }
 0x4ee   : > { %v4816_v34 = vadd.f32 %v4684_v11, %v4364_v53  ;;  %v4235_v17 = vpop.f32.mrf.mxu1  ;;  %v3915_v53 = vadd.f32 %v7551_v3, %v8406_v40  ;;  %v4438_v3 = vld [vmem:[#allocation2 + $0x151] sm:$0xff] }
 0x4ef   : > { %v4365_v32 = vadd.f32 %v4235_v17, %v3913_v12 }
 0x4f0   : > { %v4874_v44 = vadd.f32 %v7635_v25, %v4816_v34 }
 0x4f1   : > { %5911 = vmatmul.msk.f32.gmra.mxu1 %vm833_vm1, %v3983_v19 }
 0x4f2   : > { %v4928_v58 = vmax.f32 %v4874_v44, 0.0  ;;  %5967 = vmatmul.msk.f32.gmra.mxu2 %vm833_vm1, %v4435_v23 }
 0x4f4   : > { %6004 = vmatmul.msk.f32.gmra.mxu3 %vm833_vm1, %v4928_v58  ;;  %v3986_v58 = vld [vmem:[#allocation2 + $0x150] sm:$0xff] }
 0x4f5   : > { %v4687_v22 = vpop.f32.mrf.mxu2 }
 0x4f6   : > { %v4817_v52 = vadd.f32 %v4687_v22, %v4365_v32  ;;  %v4238_v15 = vpop.f32.mrf.mxu1  ;;  %v8407_v32 = vld [vmem:[#allocation88_spill] sm:$0xff] }
 0x4f7   : > { %v4366_v43 = vadd.f32 %v4238_v15, %v3914_v42  ;;  %v3916_v22 = vadd.f32 %v7562_v10, %v8407_v32  ;;  %v4439_v10 = vld [vmem:[#allocation2 + $0x159] sm:$0xff] }
 0x4f8   : > { %v4875_v30 = vadd.f32 %v7635_v25, %v4817_v52 }
 0x4f9   : > { %5912 = vmatmul.msk.f32.gmra.mxu1 %vm833_vm1, %v3984_v21 }
 0x4fa   : > { %v4929_v14 = vmax.f32 %v4875_v30, 0.0  ;;  %5968 = vmatmul.msk.f32.gmra.mxu2 %vm833_vm1, %v4436_v39 }
 0x4fc   : > { %6005 = vmatmul.msk.f32.gmra.mxu3 %vm833_vm1, %v4929_v14 }
 0x4fd   : > { %v4690_v60 = vpop.f32.mrf.mxu2 }
 0x4fe   : > { %v4818_v59 = vadd.f32 %v4690_v60, %v4366_v43  ;;  %v4241_v24 = vpop.f32.mrf.mxu1  ;;  %v3987_v43 = vld [vmem:[#allocation2 + $0x158] sm:$0xff]  ;;  %v8408_v60 = vld [vmem:[#allocation89_spill] sm:$0xff] }
 0x4ff   : > { %v5152_v38 = vpop.f32.mrf.mxu3  ;;  %v4367_v34 = vadd.f32 %v4241_v24, %v3915_v53 }
 0x500   : > { %v4876_v56 = vadd.f32 %v7635_v25, %v4818_v59  ;;  %v5153_v41 = vadd.f32 %v7847_v36, %v5152_v38  ;;  %v3917_v59 = vadd.f32 %v7575_v4, %v8408_v60  ;;  %v4440_v4 = vld [vmem:[#allocation2 + $0x161] sm:$0xff] }
 0x501   : > { %5913 = vmatmul.msk.f32.gmra.mxu1 %vm833_vm1, %v3985_v62 }
 0x502   : > { %v4930_v11 = vmax.f32 %v4876_v56, 0.0  ;;  %5314 = vst [vmem:[%s7854_s15] sm:$0xff] %v5153_v41  ;;  %5969 = vmatmul.msk.f32.gmra.mxu2 %vm833_vm1, %v4437_v26 }
 0x504   : > { %6006 = vmatmul.msk.f32.gmra.mxu3 %vm833_vm1, %v4930_v11  ;;  %v3988_v11 = vld [vmem:[#allocation2 + $0x160] sm:$0xff] }
 0x505   : > { %v4693_v17 = vpop.f32.mrf.mxu2 }
 0x506   : > { %v4819_v44 = vadd.f32 %v4693_v17, %v4367_v34  ;;  %v4244_v19 = vpop.f32.mrf.mxu1  ;;  %v8409_v34 = vld [vmem:[#allocation90_spill] sm:$0xff] }
 0x507   : > { %v5155_v23 = vpop.f32.mrf.mxu3  ;;  %v4368_v15 = vadd.f32 %v4244_v19, %v3916_v22  ;;  %v3918_v17 = vadd.f32 %v7587_v31, %v8409_v34  ;;  %v3989_v22 = vld [vmem:[#allocation2 + $0x168] sm:$0xff] }
 0x508   : > { %v4877_v50 = vadd.f32 %v7635_v25, %v4819_v44  ;;  %v5156_v12 = vadd.f32 %v7847_v36, %v5155_v23  ;;  %v4441_v31 = vld [vmem:[#allocation2 + $0x169] sm:$0xff] }
 0x509   : > { %5914 = vmatmul.msk.f32.gmra.mxu1 %vm833_vm1, %v3986_v58 }
 0x50a   : > { %v4931_v52 = vmax.f32 %v4877_v50, 0.0  ;;  %5315 = vst [vmem:[%s7854_s15 + $0x8] sm:$0xff] %v5156_v12  ;;  %5970 = vmatmul.msk.f32.gmra.mxu2 %vm833_vm1, %v4438_v3 }
 0x50c   : > { %6007 = vmatmul.msk.f32.gmra.mxu3 %vm833_vm1, %v4931_v52  ;;  %v3919_v52 = vadd.f32 %v7608_v37, %v7271_v51  ;;  %v4442_v51 = vld [vmem:[#allocation2 + $0x171] sm:$0xff] }
 0x50d   : > { %v4696_v30 = vpop.f32.mrf.mxu2  ;;  %v8410_v37 = vld [vmem:[#allocation91_spill] sm:$0xff] }
 0x50e   : > { %v4820_v21 = vadd.f32 %v4696_v30, %v4368_v15  ;;  %v4247_v39 = vpop.f32.mrf.mxu1  ;;  %v3920_v60 = vadd.f32 %v7626_v2, %v8410_v37 }
 0x50f   : > { %v5158_v8 = vpop.f32.mrf.mxu3  ;;  %v4369_v38 = vadd.f32 %v4247_v39, %v3917_v59 }
 0x510   : > { %v4878_v42 = vadd.f32 %v7635_v25, %v4820_v21  ;;  %v5159_v14 = vadd.f32 %v7847_v36, %v5158_v8 }
 0x511   : > { %5915 = vmatmul.msk.f32.gmra.mxu1 %vm833_vm1, %v3987_v43 }
 0x512   : > { %v4932_v24 = vmax.f32 %v4878_v42, 0.0  ;;  %5316 = vst [vmem:[%s7854_s15 + $0x10] sm:$0xff] %v5159_v14  ;;  %5971 = vmatmul.msk.f32.gmra.mxu2 %vm833_vm1, %v4439_v10  ;;  %v3990_v10 = vld [vmem:[#allocation2 + $0x170] sm:$0xff] }
 0x514   : > { %6008 = vmatmul.msk.f32.gmra.mxu3 %vm833_vm1, %v4932_v24 }
 0x515   : > { %v4699_v56 = vpop.f32.mrf.mxu2 }
 0x516   : > { %v4821_v41 = vadd.f32 %v4699_v56, %v4369_v38  ;;  %v4250_v62 = vpop.f32.mrf.mxu1 }
 0x517   : > { %v5161_v26 = vpop.f32.mrf.mxu3  ;;  %v4370_v19 = vadd.f32 %v4250_v62, %v3918_v17 }
 0x518   : > { %v4879_v40 = vadd.f32 %v7635_v25, %v4821_v41  ;;  %v5162_v53 = vadd.f32 %v7847_v36, %v5161_v26  ;;  %v7904_v26 = vpop.f32.mrf.mxu0 }
 0x519   : > { %5916 = vmatmul.msk.f32.gmra.mxu1 %vm833_vm1, %v3988_v11  ;;  %v4443_v11 = vld [vmem:[#allocation2 + $0x179] sm:$0xff] }
 0x51a   : > { %v4933_v44 = vmax.f32 %v4879_v40, 0.0  ;;  %5317 = vst [vmem:[%s7854_s15 + $0x18] sm:$0xff] %v5162_v53  ;;  %5972 = vmatmul.msk.f32.gmra.mxu2 %vm833_vm1, %v4440_v4  ;;  %v3991_v53 = vld [vmem:[#allocation2 + $0x178] sm:$0xff] }
 0x51b   : > { %v8411_v4 = vld [vmem:[#allocation92_spill] sm:$0xff] }
 0x51c   : > { %6009 = vmatmul.msk.f32.gmra.mxu3 %vm833_vm1, %v4933_v44  ;;  %v3921_v34 = vadd.f32 %v7651_v20, %v8411_v4  ;;  %v4444_v20 = vld [vmem:[#allocation2 + $0x181] sm:$0xff] }
 0x51d   : > { %v4702_v23 = vpop.f32.mrf.mxu2 }
 0x51e   : > { %v4822_v50 = vadd.f32 %v4702_v23, %v4370_v19  ;;  %v4253_v12 = vpop.f32.mrf.mxu1 }
 0x51f   : > { %v5164_v58 = vpop.f32.mrf.mxu3  ;;  %v4371_v30 = vadd.f32 %v4253_v12, %v3919_v52 }
 0x520   : > { %v4880_v3 = vadd.f32 %v7635_v25, %v4822_v50  ;;  %v5165_v32 = vadd.f32 %v7847_v36, %v5164_v58  ;;  %v7918_v52 = vpop.f32.mrf.mxu0 }
 0x521   : > { %5917 = vmatmul.msk.f32.gmra.mxu1 %vm833_vm1, %v3989_v22  ;;  %v8412_v22 = vld [vmem:[#allocation93_spill] sm:$0xff] }
 0x522   : > { %v4934_v15 = vmax.f32 %v4880_v3, 0.0  ;;  %5318 = vst [vmem:[%s7854_s15 + $0x20] sm:$0xff] %v5165_v32  ;;  %5973 = vmatmul.msk.f32.gmra.mxu2 %vm833_vm1, %v4441_v31  ;;  %v3992_v32 = vld [vmem:[#allocation2 + $0x180] sm:$0xff]  ;;  %v3922_v31 = vadd.f32 %v7669_v7, %v8412_v22 }
 0x524   : > { %6010 = vmatmul.msk.f32.gmra.mxu3 %vm833_vm1, %v4934_v15 }
 0x525   : > { %v4705_v21 = vpop.f32.mrf.mxu2 }
 0x526   : > { %v4823_v39 = vadd.f32 %v4705_v21, %v4371_v30  ;;  %v4256_v8 = vpop.f32.mrf.mxu1 }
 0x527   : > { %v5167_v42 = vpop.f32.mrf.mxu3  ;;  %v4372_v24 = vadd.f32 %v4256_v8, %v3920_v60 }
 0x528   : > { %v4881_v14 = vadd.f32 %v7635_v25, %v4823_v39  ;;  %v5168_v43 = vadd.f32 %v7847_v36, %v5167_v42 }
 0x529   : > { %5918 = vmatmul.msk.f32.gmra.mxu1 %vm833_vm1, %v3990_v10  ;;  %v4445_v10 = vld [vmem:[#allocation2 + $0x189] sm:$0xff] }
 0x52a   : > { %v4935_v59 = vmax.f32 %v4881_v14, 0.0  ;;  %5319 = vst [vmem:[%s7854_s15 + $0x28] sm:$0xff] %v5168_v43  ;;  %5974 = vmatmul.msk.f32.gmra.mxu2 %vm833_vm1, %v4442_v51  ;;  %v3993_v43 = vld [vmem:[#allocation2 + $0x188] sm:$0xff] }
 0x52b   : > { %v8413_v51 = vld [vmem:[#allocation94_spill] sm:$0xff] }
 0x52c   : > { %6011 = vmatmul.msk.f32.gmra.mxu3 %vm833_vm1, %v4935_v59  ;;  %v3923_v37 = vadd.f32 %v7690_v0, %v8413_v51  ;;  %v7931_v59 = vpop.f32.mrf.mxu0 }
 0x52d   : > { %v4708_v38 = vpop.f32.mrf.mxu2 }
 0x52e   : > { %v4824_v56 = vadd.f32 %v4708_v38, %v4372_v24  ;;  %v4259_v41 = vpop.f32.mrf.mxu1 }
 0x52f   : > { %v5170_v62 = vpop.f32.mrf.mxu3  ;;  %v4373_v44 = vadd.f32 %v4259_v41, %v3921_v34 }
 0x530   : > { %v4882_v40 = vadd.f32 %v7635_v25, %v4824_v56  ;;  %v5171_v2 = vadd.f32 %v7847_v36, %v5170_v62 }
 0x531   : > { %5919 = vmatmul.msk.f32.gmra.mxu1 %vm833_vm1, %v3991_v53  ;;  %v4446_v53 = vld [vmem:[#allocation2 + $0x191] sm:$0xff] }
 0x532   : > { %v4936_v17 = vmax.f32 %v4882_v40, 0.0  ;;  %5320 = vst [vmem:[%s7854_s15 + $0x30] sm:$0xff] %v5171_v2  ;;  %5975 = vmatmul.msk.f32.gmra.mxu2 %vm833_vm1, %v4443_v11  ;;  %v3994_v2 = vld [vmem:[#allocation2 + $0x190] sm:$0xff]  ;;  %v3924_v11 = vadd.f32 %v7711_v47, %v7337_v1  ;;  %v3995_v47 = vld [vmem:[#allocation2 + $0x198] sm:$0xff] }
 0x534   : > { %6012 = vmatmul.msk.f32.gmra.mxu3 %vm833_vm1, %v4936_v17 }
 0x535   : > { %v4711_v19 = vpop.f32.mrf.mxu2 }
 0x536   : > { %v4825_v23 = vadd.f32 %v4711_v19, %v4373_v44  ;;  %v4262_v50 = vpop.f32.mrf.mxu1  ;;  %v7942_v44 = vpop.f32.mrf.mxu0 }
 0x537   : > { %v5173_v12 = vpop.f32.mrf.mxu3  ;;  %v4374_v30 = vadd.f32 %v4262_v50, %v3922_v31 }
 0x538   : > { %v4883_v58 = vadd.f32 %v7635_v25, %v4825_v23  ;;  %v5174_v3 = vadd.f32 %v7847_v36, %v5173_v12 }
 0x539   : > { %5920 = vmatmul.msk.f32.gmra.mxu1 %vm833_vm1, %v3992_v32 }
 0x53a   : > { %v4937_v15 = vmax.f32 %v4883_v58, 0.0  ;;  %5321 = vst [vmem:[%s7854_s15 + $0x38] sm:$0xff] %v5174_v3  ;;  %5976 = vmatmul.msk.f32.gmra.mxu2 %vm833_vm1, %v4444_v20  ;;  %v4447_v58 = vld [vmem:[#allocation2 + $0x199] sm:$0xff]  ;;  %v3925_v3 = vadd.f32 %v7731_v49, %v7350_v18 }
 0x53b   : > { %v3996_v49 = vld [vmem:[#allocation2 + $0x1a0] sm:$0xff] }
 0x53c   : > { %6013 = vmatmul.msk.f32.gmra.mxu3 %vm833_vm1, %v4937_v15 }
 0x53d   : > { %v4714_v21 = vpop.f32.mrf.mxu2 }
 0x53e   : > { %v4826_v39 = vadd.f32 %v4714_v21, %v4374_v30  ;;  %v4265_v8 = vpop.f32.mrf.mxu1  ;;  %v7952_v21 = vpop.f32.mrf.mxu0 }
 0x53f   : > { %v5176_v42 = vpop.f32.mrf.mxu3  ;;  %v4375_v24 = vadd.f32 %v4265_v8, %v3923_v37  ;;  %v4448_v8 = vld [vmem:[#allocation2 + $0x1a1] sm:$0xff] }
 0x540   : > { %v4884_v14 = vadd.f32 %v7635_v25, %v4826_v39  ;;  %v5177_v7 = vadd.f32 %v7847_v36, %v5176_v42  ;;  %v3926_v42 = vadd.f32 %v7748_v29, %v7365_v16  ;;  %v3997_v29 = vld [vmem:[#allocation2 + $0x1a8] sm:$0xff] }
 0x541   : > { %5921 = vmatmul.msk.f32.gmra.mxu1 %vm833_vm1, %v3993_v43 }
 0x542   : > { %v4938_v60 = vmax.f32 %v4884_v14, 0.0  ;;  %5322 = vst [vmem:[%s7854_s15 + $0x40] sm:$0xff] %v5177_v7  ;;  %5977 = vmatmul.msk.f32.gmra.mxu2 %vm833_vm1, %v4445_v10 }
 0x544   : > { %6014 = vmatmul.msk.f32.gmra.mxu3 %vm833_vm1, %v4938_v60  ;;  %v8414_v60 = vld [vmem:[#allocation106_spill] sm:$0xff] }
 0x545   : > { %v4717_v38 = vpop.f32.mrf.mxu2 }
 0x546   : > { %v4827_v56 = vadd.f32 %v4717_v38, %v4375_v24  ;;  %v4268_v41 = vpop.f32.mrf.mxu1  ;;  %v3475_v24 = vadd.f32 %v8414_v60, %v7361_v57  ;;  %v8419_v60 = vld [vmem:[#allocation97_spill] sm:$0xff] }
 0x547   : > { %v5179_v62 = vpop.f32.mrf.mxu3  ;;  %v4376_v34 = vadd.f32 %v4268_v41, %v3924_v11 }
 0x548   : > { %v4885_v40 = vadd.f32 %v7635_v25, %v4827_v56  ;;  %v5180_v0 = vadd.f32 %v7847_v36, %v5179_v62  ;;  %v4449_v56 = vld [vmem:[#allocation2 + $0x1a9] sm:$0xff]  ;;  %v3927_v41 = vadd.f32 %v7904_v26, %v3475_v24  ;;  %v7967_v62 = vpop.f32.mrf.mxu0 }
 0x549   : > { %5922 = vmatmul.msk.f32.gmra.mxu1 %vm833_vm1, %v3994_v2  ;;  %v8420_v24 = vld [vmem:[#allocation110_spill] sm:$0xff] }
 0x54a   : > { %v4939_v4 = vmax.f32 %v4885_v40, 0.0  ;;  %5323 = vst [vmem:[%s7854_s15 + $0x48] sm:$0xff] %v5180_v0  ;;  %5978 = vmatmul.msk.f32.gmra.mxu2 %vm833_vm1, %v4446_v53 }
 0x54c   : > { %6015 = vmatmul.msk.f32.gmra.mxu3 %vm833_vm1, %v4939_v4  ;;  %v8415_v4 = vld [vmem:[#allocation95_spill] sm:$0xff] }
 0x54d   : > { %v4720_v17 = vpop.f32.mrf.mxu2 }
 0x54e   : > { %v4828_v19 = vadd.f32 %v4720_v17, %v4376_v34  ;;  %v4271_v23 = vpop.f32.mrf.mxu1  ;;  %v8416_v34 = vld [vmem:[#allocation108_spill] sm:$0xff] }
 0x54f   : > { %v5182_v50 = vpop.f32.mrf.mxu3  ;;  %v4377_v20 = vadd.f32 %v4271_v23, %v3925_v3  ;;  %v3476_v17 = vadd.f32 %v8416_v34, %v8415_v4  ;;  %v3998_v23 = vld [vmem:[#allocation2 + $0x1b0] sm:$0xff]  ;;  %v8421_v4 = vld [vmem:[#allocation98_spill] sm:$0xff] }
 0x550   : > { %v4886_v12 = vadd.f32 %v7635_v25, %v4828_v19  ;;  %v5183_v1 = vadd.f32 %v7847_v36, %v5182_v50  ;;  %v4450_v50 = vld [vmem:[#allocation2 + $0x1b1] sm:$0xff] }
 0x551   : > { %5923 = vmatmul.msk.f32.gmra.mxu1 %vm833_vm1, %v3995_v47  ;;  %v7981_v47 = vpop.f32.mrf.mxu0  ;;  %v8422_v34 = vld [vmem:[#allocation111_spill] sm:$0xff] }
 0x552   : > { %v4940_v32 = vmax.f32 %v4886_v12, 0.0  ;;  %5324 = vst [vmem:[%s7854_s15 + $0x50] sm:$0xff] %v5183_v1  ;;  %5979 = vmatmul.msk.f32.gmra.mxu2 %vm833_vm1, %v4447_v58  ;;  %v3928_v12 = vadd.f32 %v7918_v52, %v3476_v17  ;;  %v7989_v52 = vld [vmem:[%s8194_s4] ss:$0 sm:$0xff]  ;;  %v3479_v17 = vadd.f32 %v8422_v34, %v8421_v4  ;;  %v4456_v34 = vld [vmem:[#allocation2 + $0x1e1] sm:$0xff] }
 0x553   : > { %v4004_v4 = vld [vmem:[#allocation2 + $0x1e0] sm:$0xff] }
 0x554   : > { %6016 = vmatmul.msk.f32.gmra.mxu3 %vm833_vm1, %v4940_v32 }
 0x555   : > { %v4723_v22 = vpop.f32.mrf.mxu2 }
 0x556   : > { %v4829_v31 = vadd.f32 %v4723_v22, %v4377_v20  ;;  %v4274_v15 = vpop.f32.mrf.mxu1  ;;  %v8417_v22 = vld [vmem:[#allocation96_spill] sm:$0xff] }
 0x557   : > { %v5185_v30 = vpop.f32.mrf.mxu3  ;;  %v4378_v7 = vadd.f32 %v4274_v15, %v3926_v42 }
 0x558   : > { %v4887_v39 = vadd.f32 %v7635_v25, %v4829_v31  ;;  %v5186_v18 = vadd.f32 %v7847_v36, %v5185_v30  ;;  %v8418_v31 = vld [vmem:[#allocation11_spill] sm:$0xff] }
 0x559   : > { %5924 = vmatmul.msk.f32.gmra.mxu1 %vm833_vm1, %v3996_v49  ;;  %v3477_v15 = vadd.f32 %v8418_v31, %v8417_v22  ;;  %v4451_v49 = vld [vmem:[#allocation2 + $0x1b9] sm:$0xff]  ;;  %v4002_v22 = vld [vmem:[#allocation2 + $0x1d0] sm:$0xff] }
 0x55a   : > { %v4941_v14 = vmax.f32 %v4887_v39, 0.0  ;;  %5325 = vst [vmem:[%s7854_s15 + $0x58] sm:$0xff] %v5186_v18  ;;  %5980 = vmatmul.msk.f32.gmra.mxu2 %vm833_vm1, %v4448_v8  ;;  %v3999_v18 = vld [vmem:[#allocation2 + $0x1b8] sm:$0xff] }
 0x55b   : > { %v3929_v8 = vadd.f32 %v7931_v59, %v3477_v15  ;;  %v4454_v31 = vld [vmem:[#allocation2 + $0x1d1] sm:$0xff] }
 0x55c   : > { %6017 = vmatmul.msk.f32.gmra.mxu3 %vm833_vm1, %v4941_v14  ;;  %v8423_v15 = vld [vmem:[#allocation99_spill] sm:$0xff] }
 0x55d   : > { %v4726_v43 = vpop.f32.mrf.mxu2 }
 0x55e   : > { %v4830_v10 = vadd.f32 %v4726_v43, %v4378_v7  ;;  %v4277_v51 = vpop.f32.mrf.mxu1  ;;  %v7998_v43 = vpop.f32.mrf.mxu0 }
 0x55f   : > { %v5188_v37 = vpop.f32.mrf.mxu3  ;;  %v4379_v0 = vadd.f32 %v4277_v51, %v3927_v41 }
 0x560   : > { %v4888_v38 = vadd.f32 %v7635_v25, %v4830_v10  ;;  %v5189_v16 = vadd.f32 %v7847_v36, %v5188_v37 }
 0x561   : > { %5925 = vmatmul.msk.f32.gmra.mxu1 %vm833_vm1, %v3997_v29  ;;  %v4000_v29 = vld [vmem:[#allocation2 + $0x1c0] sm:$0xff] }
 0x562   : > { %v4942_v40 = vmax.f32 %v4888_v38, 0.0  ;;  %5326 = vst [vmem:[%s7854_s15 + $0x60] sm:$0xff] %v5189_v16  ;;  %5981 = vmatmul.msk.f32.gmra.mxu2 %vm833_vm1, %v4449_v56  ;;  %v3478_v38 = vadd.f32 %v8420_v24, %v8419_v60  ;;  %v4452_v56 = vld [vmem:[#allocation2 + $0x1c1] sm:$0xff]  ;;  %v4003_v60 = vld [vmem:[#allocation2 + $0x1d8] sm:$0xff] }
 0x563   : > { %v4455_v24 = vld [vmem:[#allocation2 + $0x1d9] sm:$0xff] }
 0x564   : > { %6018 = vmatmul.msk.f32.gmra.mxu3 %vm833_vm1, %v4942_v40  ;;  %v3930_v41 = vadd.f32 %v7942_v44, %v3478_v38  ;;  %v8425_v38 = vld [vmem:[#allocation100_spill] sm:$0xff] }
 0x565   : > { %v4729_v57 = vpop.f32.mrf.mxu2 }
 0x566   : > { %v4831_v2 = vadd.f32 %v4729_v57, %v4379_v0  ;;  %v4280_v53 = vpop.f32.mrf.mxu1 }
 0x567   : > { %v5191_v11 = vpop.f32.mrf.mxu3  ;;  %v4380_v58 = vadd.f32 %v4280_v53, %v3928_v12  ;;  %v3931_v12 = vadd.f32 %v7952_v21, %v3479_v17  ;;  %v8427_v17 = vld [vmem:[#allocation101_spill] sm:$0xff] }
 0x568   : > { %v4889_v26 = vadd.f32 %v7635_v25, %v4831_v2  ;;  %v5192_v19 = vadd.f32 %v7847_v36, %v5191_v11 }
 0x569   : > { %5926 = vmatmul.msk.f32.gmra.mxu1 %vm833_vm1, %v3998_v23  ;;  %v4001_v23 = vld [vmem:[#allocation2 + $0x1c8] sm:$0xff] }
 0x56a   : > { %v4943_v1 = vmax.f32 %v4889_v26, 0.0  ;;  %5327 = vst [vmem:[%s7854_s15 + $0x68] sm:$0xff] %v5192_v19  ;;  %5982 = vmatmul.msk.f32.gmra.mxu2 %vm833_vm1, %v4450_v50  ;;  %v8011_v26 = vpop.f32.mrf.mxu0  ;;  %v4453_v50 = vld [vmem:[#allocation2 + $0x1c9] sm:$0xff] }
 0x56c   : > { %6019 = vmatmul.msk.f32.gmra.mxu3 %vm833_vm1, %v4943_v1 }
 0x56d   : > { %v4732_v3 = vpop.f32.mrf.mxu2 }
 0x56e   : > { %v4832_v25 = vadd.f32 %v4732_v3, %v4380_v58  ;;  %v4283_v32 = vpop.f32.mrf.mxu1 }
 0x56f   : > { %v5194_v20 = vpop.f32.mrf.mxu3  ;;  %v4381_v14 = vadd.f32 %v4283_v32, %v3929_v8 }
 0x570   : > { %v4890_v30 = vadd.f32 %v7989_v52, %v4832_v25  ;;  %v5195_v39 = vadd.f32 %v7847_v36, %v5194_v20 }
 0x571   : > { %5927 = vmatmul.msk.f32.gmra.mxu1 %vm833_vm1, %v3999_v18 }
 0x572   : > { %v4944_v42 = vmax.f32 %v4890_v30, 0.0  ;;  %5328 = vst [vmem:[%s7854_s15 + $0x70] sm:$0xff] %v5195_v39  ;;  %5983 = vmatmul.msk.f32.gmra.mxu2 %vm833_vm1, %v4451_v49  ;;  %v8424_v30 = vld [vmem:[#allocation112_spill] sm:$0xff]  ;;  %v3852_v8 = vpop.f32.mrf.mxu0 }
 0x573   : > { %v3480_v39 = vadd.f32 %v8424_v30, %v8423_v15 }
 0x574   : > { %6020 = vmatmul.msk.f32.gmra.mxu3 %vm833_vm1, %v4944_v42 }
 0x575   : > { %v4735_v7 = vpop.f32.mrf.mxu2  ;;  %v3932_v49 = vadd.f32 %v7967_v62, %v3480_v39 }
 0x576   : > { %v4833_v10 = vadd.f32 %v4735_v7, %v4381_v14  ;;  %v4286_v51 = vpop.f32.mrf.mxu1 }
 0x577   : > { %v5197_v37 = vpop.f32.mrf.mxu3  ;;  %v4382_v0 = vadd.f32 %v4286_v51, %v3930_v41 }
 0x578   : > { %v4891_v59 = vadd.f32 %v7989_v52, %v4833_v10  ;;  %v5198_v16 = vadd.f32 %v7847_v36, %v5197_v37 }
 0x579   : > { %5928 = vmatmul.msk.f32.gmra.mxu1 %vm833_vm1, %v4000_v29 }
 0x57a   : > { %v4945_v40 = vmax.f32 %v4891_v59, 0.0  ;;  %5329 = vst [vmem:[%s7854_s15 + $0x78] sm:$0xff] %v5198_v16  ;;  %5984 = vmatmul.msk.f32.gmra.mxu2 %vm833_vm1, %v4452_v56  ;;  %v8426_v59 = vld [vmem:[#allocation21_spill] sm:$0xff] }
 0x57b   : > { %v3481_v62 = vadd.f32 %v8426_v59, %v8425_v38 }
 0x57c   : > { %6021 = vmatmul.msk.f32.gmra.mxu3 %vm833_vm1, %v4945_v40  ;;  %v3855_v40 = vpop.f32.mrf.mxu0 }
 0x57d   : > { %v4738_v57 = vpop.f32.mrf.mxu2  ;;  %v3933_v56 = vadd.f32 %v7981_v47, %v3481_v62 }
 0x57e   : > { %v4834_v2 = vadd.f32 %v4738_v57, %v4382_v0  ;;  %v4289_v53 = vpop.f32.mrf.mxu1 }
 0x57f   : > { %v5200_v11 = vpop.f32.mrf.mxu3  ;;  %v4383_v58 = vadd.f32 %v4289_v53, %v3931_v12 }
 0x580   : > { %v4892_v44 = vadd.f32 %v7989_v52, %v4834_v2  ;;  %v5201_v19 = vadd.f32 %v7847_v36, %v5200_v11 }
 0x581   : > { %5929 = vmatmul.msk.f32.gmra.mxu1 %vm833_vm1, %v4001_v23 }
 0x582   : > { %v4946_v1 = vmax.f32 %v4892_v44, 0.0  ;;  %5330 = vst [vmem:[%s7854_s15 + $0x80] sm:$0xff] %v5201_v19  ;;  %5985 = vmatmul.msk.f32.gmra.mxu2 %vm833_vm1, %v4453_v50  ;;  %v8428_v44 = vld [vmem:[#allocation114_spill] sm:$0xff] }
 0x583   : > { %v3482_v47 = vadd.f32 %v8428_v44, %v8427_v17 }
 0x584   : > { %6022 = vmatmul.msk.f32.gmra.mxu3 %vm833_vm1, %v4946_v1 }
 0x585   : > { %v4741_v3 = vpop.f32.mrf.mxu2  ;;  %v3934_v50 = vadd.f32 %v7998_v43, %v3482_v47 }
 0x586   : > { %v4835_v25 = vadd.f32 %v4741_v3, %v4383_v58  ;;  %v4292_v32 = vpop.f32.mrf.mxu1  ;;  %v3858_v3 = vpop.f32.mrf.mxu0 }
 0x587   : > { %v5203_v20 = vpop.f32.mrf.mxu3  ;;  %v4384_v14 = vadd.f32 %v4292_v32, %v3932_v49 }
 0x588   : > { %v4893_v21 = vadd.f32 %v7989_v52, %v4835_v25  ;;  %v5204_v18 = vadd.f32 %v7847_v36, %v5203_v20 }
 0x589   : > { %5930 = vmatmul.msk.f32.gmra.mxu1 %vm833_vm1, %v4002_v22  ;;  %v8429_v22 = vld [vmem:[#allocation102_spill] sm:$0xff] }
 0x58a   : > { %v4947_v42 = vmax.f32 %v4893_v21, 0.0  ;;  %5331 = vst [vmem:[%s7854_s15 + $0x88] sm:$0xff] %v5204_v18  ;;  %5986 = vmatmul.msk.f32.gmra.mxu2 %vm833_vm1, %v4454_v31  ;;  %v8430_v31 = vld [vmem:[#allocation3_spill] sm:$0xff] }
 0x58b   : > { %v3483_v15 = vadd.f32 %v8430_v31, %v8429_v22 }
 0x58c   : > { %6023 = vmatmul.msk.f32.gmra.mxu3 %vm833_vm1, %v4947_v42 }
 0x58d   : > { %v4744_v7 = vpop.f32.mrf.mxu2  ;;  %v3935_v39 = vadd.f32 %v8011_v26, %v3483_v15  ;;  %v8435_v15 = vld [vmem:[#allocation107_spill] sm:$0xff] }
 0x58e   : > { %v4836_v10 = vadd.f32 %v4744_v7, %v4384_v14  ;;  %v4295_v51 = vpop.f32.mrf.mxu1 }
 0x58f   : > { %v5206_v37 = vpop.f32.mrf.mxu3  ;;  %v4385_v0 = vadd.f32 %v4295_v51, %v3933_v56  ;;  %v8432_v51 = vld [vmem:[#allocation73_spill] sm:$0xff] }
 0x590   : > { %v4894_v16 = vadd.f32 %v7989_v52, %v4836_v10  ;;  %v5207_v29 = vadd.f32 %v7847_v36, %v5206_v37  ;;  %v8431_v10 = vld [vmem:[#allocation103_spill] sm:$0xff] }
 0x591   : > { %5931 = vmatmul.msk.f32.gmra.mxu1 %vm833_vm1, %v4003_v60  ;;  %v3484_v37 = vadd.f32 %v8432_v51, %v8431_v10  ;;  %v3861_v60 = vpop.f32.mrf.mxu0  ;;  %v8436_v10 = vld [vmem:[#allocation9_spill] sm:$0xff] }
 0x592   : > { %v4948_v41 = vmax.f32 %v4894_v16, 0.0  ;;  %5332 = vst [vmem:[%s7854_s15 + $0x90] sm:$0xff] %v5207_v29  ;;  %5987 = vmatmul.msk.f32.gmra.mxu2 %vm833_vm1, %v4455_v24  ;;  %v3488_v51 = vadd.f32 %v7698_v46, %v8436_v10 }
 0x593   : > { %v3936_v59 = vadd.f32 %v3852_v8, %v3484_v37 }
 0x594   : > { %6024 = vmatmul.msk.f32.gmra.mxu3 %vm833_vm1, %v4948_v41 }
 0x595   : > { %v4747_v57 = vpop.f32.mrf.mxu2 }
 0x596   : > { %v4837_v2 = vadd.f32 %v4747_v57, %v4385_v0  ;;  %v4298_v53 = vpop.f32.mrf.mxu1  ;;  %v8433_v0 = vld [vmem:[#allocation104_spill] sm:$0xff] }
 0x597   : > { %v5209_v11 = vpop.f32.mrf.mxu3  ;;  %v4386_v1 = vadd.f32 %v4298_v53, %v3934_v50  ;;  %v3485_v57 = vadd.f32 %v7637_v28, %v8433_v0 }
 0x598   : > { %v4895_v19 = vadd.f32 %v7989_v52, %v4837_v2  ;;  %v5210_v23 = vadd.f32 %v7847_v36, %v5209_v11 }
 0x599   : > { %5932 = vmatmul.msk.f32.gmra.mxu1 %vm833_vm1, %v4004_v4  ;;  %v3937_v11 = vadd.f32 %v3855_v40, %v3485_v57  ;;  %v3864_v4 = vpop.f32.mrf.mxu0 }
 0x59a   : > { %v4949_v12 = vmax.f32 %v4895_v19, 0.0  ;;  %5333 = vst [vmem:[%s7854_s15 + $0x98] sm:$0xff] %v5210_v23  ;;  %5988 = vmatmul.msk.f32.gmra.mxu2 %vm833_vm1, %v4456_v34  ;;  %v8434_v23 = vld [vmem:[#allocation105_spill] sm:$0xff] }
 0x59b   : > { %v3486_v50 = vadd.f32 %v7656_v33, %v8434_v23 }
 0x59c   : > { %6025 = vmatmul.msk.f32.gmra.mxu3 %vm833_vm1, %v4949_v12 }
 0x59d   : > { %v4750_v58 = vpop.f32.mrf.mxu2 }
 0x59e   : > { %v4838_v25 = vadd.f32 %v4750_v58, %v4386_v1  ;;  %v4301_v32 = vpop.f32.mrf.mxu1  ;;  %v3938_v1 = vadd.f32 %v3858_v3, %v3486_v50 }
 0x59f   : > { %v5212_v20 = vpop.f32.mrf.mxu3  ;;  %v4387_v18 = vadd.f32 %v4301_v32, %v3935_v39 }
 0x5a0   : > { %v4896_v43 = vadd.f32 %v7989_v52, %v4838_v25  ;;  %v5213_v30 = vadd.f32 %v7847_v36, %v5212_v20 }
 0x5a1   : > { %v3867_v58 = vpop.f32.mrf.mxu0 }
 0x5a2   : > { %v4950_v21 = vmax.f32 %v4896_v43, 0.0  ;;  %5334 = vst [vmem:[%s7854_s15 + $0xa0] sm:$0xff] %v5213_v30  ;;  %v3487_v43 = vadd.f32 %v7676_v13, %v8435_v15 }
 0x5a4   : > { %6026 = vmatmul.msk.f32.gmra.mxu3 %vm833_vm1, %v4950_v21  ;;  %v3939_v39 = vadd.f32 %v3861_v60, %v3487_v43 }
 0x5a5   : > { %v4753_v49 = vpop.f32.mrf.mxu2 }
 0x5a6   : > { %v4839_v42 = vadd.f32 %v4753_v49, %v4387_v18  ;;  %v4304_v14 = vpop.f32.mrf.mxu1 }
 0x5a7   : > { %v5215_v7 = vpop.f32.mrf.mxu3  ;;  %v4388_v62 = vadd.f32 %v4304_v14, %v3936_v59 }
 0x5a8   : > { %v4897_v24 = vadd.f32 %v7989_v52, %v4839_v42  ;;  %v5216_v38 = vadd.f32 %v7847_v36, %v5215_v7 }
 0x5a9   : > { %v3870_v49 = vpop.f32.mrf.mxu0 }
 0x5aa   : > { %v4951_v26 = vmax.f32 %v4897_v24, 0.0  ;;  %5335 = vst [vmem:[%s7854_s15 + $0xa8] sm:$0xff] %v5216_v38  ;;  %v3940_v24 = vadd.f32 %v3864_v4, %v3488_v51 }
 0x5ac   : > { %6027 = vmatmul.msk.f32.gmra.mxu3 %vm833_vm1, %v4951_v26 }
 0x5ad   : > { %v4756_v16 = vpop.f32.mrf.mxu2 }
 0x5ae   : > { %v4840_v29 = vadd.f32 %v4756_v16, %v4388_v62  ;;  %v4307_v56 = vpop.f32.mrf.mxu1 }
 0x5af   : > { %v5218_v41 = vpop.f32.mrf.mxu3  ;;  %v4389_v34 = vadd.f32 %v4307_v56, %v3937_v11 }
 0x5b0   : > { %v4898_v2 = vadd.f32 %v7989_v52, %v4840_v29  ;;  %v5219_v53 = vadd.f32 %v7847_v36, %v5218_v41  ;;  %v8437_v29 = vld [vmem:[#allocation109_spill] sm:$0xff] }
 0x5b1   : > { %v3489_v56 = vadd.f32 %v7718_v45, %v8437_v29  ;;  %v3873_v41 = vpop.f32.mrf.mxu0 }
 0x5b2   : > { %v4952_v8 = vmax.f32 %v4898_v2, 0.0  ;;  %5336 = vst [vmem:[%s7854_s15 + $0xb0] sm:$0xff] %v5219_v53 }
 0x5b3   : > { %v3941_v57 = vadd.f32 %v3867_v58, %v3489_v56 }
 0x5b4   : > { %6028 = vmatmul.msk.f32.gmra.mxu3 %vm833_vm1, %v4952_v8 }
 0x5b5   : > { %v4759_v17 = vpop.f32.mrf.mxu2 }
 0x5b6   : > { %v4841_v44 = vadd.f32 %v4759_v17, %v4389_v34  ;;  %v4310_v47 = vpop.f32.mrf.mxu1  ;;  %v8438_v17 = vld [vmem:[#allocation13_spill] sm:$0xff] }
 0x5b7   : > { %v5221_v19 = vpop.f32.mrf.mxu3  ;;  %v4390_v25 = vadd.f32 %v4310_v47, %v3938_v1 }
 0x5b8   : > { %v4899_v28 = vadd.f32 %v7989_v52, %v4841_v44  ;;  %v5222_v12 = vadd.f32 %v7847_v36, %v5221_v19  ;;  %v3490_v44 = vadd.f32 %v7735_v9, %v8438_v17 }
 0x5b9   : > { %v3876_v23 = vpop.f32.mrf.mxu0 }
 0x5ba   : > { %v4953_v40 = vmax.f32 %v4899_v28, 0.0  ;;  %5337 = vst [vmem:[%s7854_s15 + $0xb8] sm:$0xff] %v5222_v12  ;;  %v3942_v19 = vadd.f32 %v3870_v49, %v3490_v44 }
 0x5bc   : > { %6029 = vmatmul.msk.f32.gmra.mxu3 %vm833_vm1, %v4953_v40 }
 0x5bd   : > { %v4762_v32 = vpop.f32.mrf.mxu2 }
 0x5be   : > { %v4842_v20 = vadd.f32 %v4762_v32, %v4390_v25  ;;  %v4313_v22 = vpop.f32.mrf.mxu1  ;;  %v8439_v25 = vld [vmem:[#allocation15_spill] sm:$0xff] }
 0x5bf   : > { %v5224_v31 = vpop.f32.mrf.mxu3  ;;  %v4391_v21 = vadd.f32 %v4313_v22, %v3939_v39  ;;  %v3491_v32 = vadd.f32 %v7754_v61, %v8439_v25 }
 0x5c0   : > { %v4900_v33 = vadd.f32 %v7989_v52, %v4842_v20  ;;  %v5225_v30 = vadd.f32 %v7847_v36, %v5224_v31 }
 0x5c1   : > { %v3943_v22 = vadd.f32 %v3873_v41, %v3491_v32  ;;  %v3879_v15 = vpop.f32.mrf.mxu0 }
 0x5c2   : > { %v4954_v3 = vmax.f32 %v4900_v33, 0.0  ;;  %5338 = vst [vmem:[%s7854_s15 + $0xc0] sm:$0xff] %v5225_v30 }
 0x5c4   : > { %6030 = vmatmul.msk.f32.gmra.mxu3 %vm833_vm1, %v4954_v3 }
 0x5c5   : > { %v4765_v18 = vpop.f32.mrf.mxu2 }
 0x5c6   : > { %v4843_v42 = vadd.f32 %v4765_v18, %v4391_v21  ;;  %v4316_v14 = vpop.f32.mrf.mxu1  ;;  %v8440_v21 = vld [vmem:[#allocation17_spill] sm:$0xff] }
 0x5c7   : > { %v5227_v7 = vpop.f32.mrf.mxu3  ;;  %v4392_v38 = vadd.f32 %v4316_v14, %v3940_v24  ;;  %v3492_v18 = vadd.f32 %v7772_v48, %v8440_v21 }
 0x5c8   : > { %v4901_v13 = vadd.f32 %v7989_v52, %v4843_v42  ;;  %v5228_v37 = vadd.f32 %v7847_v36, %v5227_v7 }
 0x5c9   : > { %v3944_v42 = vadd.f32 %v3876_v23, %v3492_v18  ;;  %v3882_v51 = vpop.f32.mrf.mxu0  ;;  %v8445_v18 = vld [vmem:[#allocation24_spill] sm:$0xff] }
 0x5ca   : > { %v4955_v60 = vmax.f32 %v4901_v13, 0.0  ;;  %5339 = vst [vmem:[%s7854_s15 + $0xc8] sm:$0xff] %v5228_v37 }
 0x5cc   : > { %6031 = vmatmul.msk.f32.gmra.mxu3 %vm833_vm1, %v4955_v60  ;;  %v8441_v60 = vld [vmem:[#allocation19_spill] sm:$0xff] }
 0x5cd   : > { %v4768_v59 = vpop.f32.mrf.mxu2 }
 0x5ce   : > { %v4844_v26 = vadd.f32 %v4768_v59, %v4392_v38  ;;  %v4319_v62 = vpop.f32.mrf.mxu1  ;;  %v3493_v38 = vadd.f32 %v7788_v35, %v8441_v60 }
 0x5cf   : > { %v5230_v16 = vpop.f32.mrf.mxu3  ;;  %v4393_v53 = vadd.f32 %v4319_v62, %v3941_v57 }
 0x5d0   : > { %v4902_v46 = vadd.f32 %v7989_v52, %v4844_v26  ;;  %v5231_v0 = vadd.f32 %v7847_v36, %v5230_v16  ;;  %v3945_v26 = vadd.f32 %v3879_v15, %v3493_v38 }
 0x5d2   : > { %v4956_v2 = vmax.f32 %v4902_v46, 0.0  ;;  %5340 = vst [vmem:[%s7854_s15 + $0xd0] sm:$0xff] %v5231_v0  ;;  %v8442_v0 = vld [vmem:[#allocation113_spill] sm:$0xff] }
 0x5d3   : > { %v3494_v57 = vadd.f32 %v7798_v55, %v8442_v0 }
 0x5d4   : > { %6032 = vmatmul.msk.f32.gmra.mxu3 %vm833_vm1, %v4956_v2 }
 0x5d5   : > { %v4771_v11 = vpop.f32.mrf.mxu2 }
 0x5d6   : > { %v4845_v4 = vadd.f32 %v4771_v11, %v4393_v53  ;;  %v4322_v8 = vpop.f32.mrf.mxu1  ;;  %v3885_v53 = vpop.f32.mrf.mxu0  ;;  %v3946_v11 = vadd.f32 %v3882_v51, %v3494_v57 }
 0x5d7   : > { %v5233_v34 = vpop.f32.mrf.mxu3  ;;  %v4394_v28 = vadd.f32 %v4322_v8, %v3942_v19 }
 0x5d8   : > { %v4903_v45 = vadd.f32 %v7989_v52, %v4845_v4  ;;  %v5234_v47 = vadd.f32 %v7847_v36, %v5233_v34 }
 0x5da   : > { %v4957_v50 = vmax.f32 %v4903_v45, 0.0  ;;  %5341 = vst [vmem:[%s7854_s15 + $0xd8] sm:$0xff] %v5234_v47  ;;  %v8443_v47 = vld [vmem:[#allocation23_spill] sm:$0xff] }
 0x5db   : > { %v3495_v19 = vadd.f32 %v7807_v63, %v8443_v47 }
 0x5dc   : > { %6033 = vmatmul.msk.f32.gmra.mxu3 %vm833_vm1, %v4957_v50 }
 0x5dd   : > { %v4774_v12 = vpop.f32.mrf.mxu2  ;;  %v3947_v50 = vadd.f32 %v3885_v53, %v3495_v19 }
 0x5de   : > { %v4846_v1 = vadd.f32 %v4774_v12, %v4394_v28  ;;  %v4325_v40 = vpop.f32.mrf.mxu1  ;;  %v3888_v12 = vpop.f32.mrf.mxu0 }
 0x5df   : > { %v5236_v58 = vpop.f32.mrf.mxu3  ;;  %v4395_v43 = vadd.f32 %v4325_v40, %v3943_v22 }
 0x5e0   : > { %v4904_v9 = vadd.f32 %v7989_v52, %v4846_v1  ;;  %v5237_v20 = vadd.f32 %v7847_v36, %v5236_v58 }
 0x5e2   : > { %v4958_v31 = vmax.f32 %v4904_v9, 0.0  ;;  %5342 = vst [vmem:[%s7854_s15 + $0xe0] sm:$0xff] %v5237_v20  ;;  %v8444_v9 = vld [vmem:[#allocation25_spill] sm:$0xff] }
 0x5e3   : > { %v3496_v20 = vadd.f32 %v7819_v27, %v8444_v9 }
 0x5e4   : > { %6034 = vmatmul.msk.f32.gmra.mxu3 %vm833_vm1, %v4958_v31 }
 0x5e5   : > { %v4777_v33 = vpop.f32.mrf.mxu2  ;;  %v3948_v31 = vadd.f32 %v3888_v12, %v3496_v20 }
 0x5e6   : > { %v4847_v30 = vadd.f32 %v4777_v33, %v4395_v43  ;;  %v4328_v39 = vpop.f32.mrf.mxu1  ;;  %v3891_v33 = vpop.f32.mrf.mxu0 }
 0x5e7   : > { %v5239_v3 = vpop.f32.mrf.mxu3  ;;  %v4396_v7 = vadd.f32 %v4328_v39, %v3944_v42 }
 0x5e8   : > { %v4905_v61 = vadd.f32 %v7989_v52, %v4847_v30  ;;  %v5240_v49 = vadd.f32 %v7847_v36, %v5239_v3 }
 0x5ea   : > { %v4959_v14 = vmax.f32 %v4905_v61, 0.0  ;;  %5343 = vst [vmem:[%s7854_s15 + $0xe8] sm:$0xff] %v5240_v49  ;;  %v3497_v61 = vadd.f32 %v7828_v5, %v8445_v18 }
 0x5ec   : > { %6035 = vmatmul.msk.f32.gmra.mxu3 %vm833_vm1, %v4959_v14  ;;  %v3949_v42 = vadd.f32 %v3891_v33, %v3497_v61 }
 0x5ed   : > { %v4780_v10 = vpop.f32.mrf.mxu2 }
 0x5ee   : > { %v4848_v13 = vadd.f32 %v4780_v10, %v4396_v7  ;;  %v4331_v37 = vpop.f32.mrf.mxu1 }
 0x5ef   : > { %v5242_v24 = vpop.f32.mrf.mxu3  ;;  %v4397_v16 = vadd.f32 %v4331_v37, %v3945_v26 }
 0x5f0   : > { %v4906_v48 = vadd.f32 %v7989_v52, %v4848_v13  ;;  %v5243_v59 = vadd.f32 %v7847_v36, %v5242_v24  ;;  %v3894_v13 = vpop.f32.mrf.mxu0  ;;  %v3498_v24 = vadd.f32 %v7836_v6, %v7617_v54 }
 0x5f2   : > { %v4960_v62 = vmax.f32 %v4906_v48, 0.0  ;;  %5344 = vst [vmem:[%s7854_s15 + $0xf0] sm:$0xff] %v5243_v59  ;;  %v3950_v48 = vadd.f32 %v3894_v13, %v3498_v24 }
 0x5f4   : > { %6036 = vmatmul.msk.f32.gmra.mxu3 %vm833_vm1, %v4960_v62 }
 0x5f5   : > { %v4783_v29 = vpop.f32.mrf.mxu2 }
 0x5f6   : > { %v4849_v56 = vadd.f32 %v4783_v29, %v4397_v16  ;;  %v4334_v41 = vpop.f32.mrf.mxu1 }
 0x5f7   : > { %v5245_v46 = vpop.f32.mrf.mxu3  ;;  %v4398_v8 = vadd.f32 %v4334_v41, %v3946_v11 }
 0x5f8   : > { %v4907_v35 = vadd.f32 %v7989_v52, %v4849_v56  ;;  %v5246_v2 = vadd.f32 %v7847_v36, %v5245_v46 }
 0x5fa   : > { %v4961_v4 = vmax.f32 %v4907_v35, 0.0  ;;  %5345 = vst [vmem:[%s7854_s15 + $0xf8] sm:$0xff] %v5246_v2 }
 0x5fc   : > { %6037 = vmatmul.msk.f32.gmra.mxu3 %vm833_vm1, %v4961_v4 }
 0x5fd   : > { %v4786_v34 = vpop.f32.mrf.mxu2 }
 0x5fe   : > { %v4850_v17 = vadd.f32 %v4786_v34, %v4398_v8  ;;  %v4337_v44 = vpop.f32.mrf.mxu1 }
 0x5ff   : > { %v5248_v45 = vpop.f32.mrf.mxu3  ;;  %v4399_v1 = vadd.f32 %v4337_v44, %v3947_v50 }
 0x600   : > { %v4908_v55 = vadd.f32 %v7989_v52, %v4850_v17  ;;  %v5249_v23 = vadd.f32 %v7847_v36, %v5248_v45 }
 0x602   : > { %v4962_v28 = vmax.f32 %v4908_v55, 0.0  ;;  %5346 = vst [vmem:[%s7854_s15 + $0x100] sm:$0xff] %v5249_v23 }
 0x604   : > { %6038 = vmatmul.msk.f32.gmra.mxu3 %vm833_vm1, %v4962_v28 }
 0x605   : > { %v4789_v40 = vpop.f32.mrf.mxu2 }
 0x606   : > { %v4851_v58 = vadd.f32 %v4789_v40, %v4399_v1  ;;  %v4340_v25 = vpop.f32.mrf.mxu1 }
 0x607   : > { %v5251_v32 = vpop.f32.mrf.mxu3  ;;  %v4400_v43 = vadd.f32 %v4340_v25, %v3948_v31 }
 0x608   : > { %v4909_v63 = vadd.f32 %v7989_v52, %v4851_v58  ;;  %v5252_v22 = vadd.f32 %v7847_v36, %v5251_v32 }
 0x60a   : > { %v4963_v15 = vmax.f32 %v4909_v63, 0.0  ;;  %5347 = vst [vmem:[%s7854_s15 + $0x108] sm:$0xff] %v5252_v22 }
 0x60c   : > { %6039 = vmatmul.msk.f32.gmra.mxu3 %vm833_vm1, %v4963_v15 }
 0x60d   : > { %v4792_v30 = vpop.f32.mrf.mxu2 }
 0x60e   : > { %v4852_v39 = vadd.f32 %v4792_v30, %v4400_v43  ;;  %v4343_v3 = vpop.f32.mrf.mxu1 }
 0x60f   : > { %v5254_v21 = vpop.f32.mrf.mxu3  ;;  %v4401_v7 = vadd.f32 %v4343_v3, %v3949_v42 }
 0x610   : > { %v4910_v27 = vadd.f32 %v7989_v52, %v4852_v39  ;;  %v5255_v49 = vadd.f32 %v7847_v36, %v5254_v21  ;;  %v8144_v36 = vld [vmem:[%s8196_s6] ss:$0 sm:$0xff] }
 0x612   : > { %v4964_v14 = vmax.f32 %v4910_v27, 0.0  ;;  %5348 = vst [vmem:[%s7854_s15 + $0x110] sm:$0xff] %v5255_v49 }
 0x614   : > { %6040 = vmatmul.msk.f32.gmra.mxu3 %vm833_vm1, %v4964_v14 }
 0x615   : > { %v4795_v10 = vpop.f32.mrf.mxu2 }
 0x616   : > { %v4853_v51 = vadd.f32 %v4795_v10, %v4401_v7  ;;  %v4346_v38 = vpop.f32.mrf.mxu1 }
 0x617   : > { %v5257_v37 = vpop.f32.mrf.mxu3  ;;  %v4402_v26 = vadd.f32 %v4346_v38, %v3950_v48 }
 0x618   : > { %v4911_v5 = vadd.f32 %v7989_v52, %v4853_v51  ;;  %v5258_v60 = vadd.f32 %v8144_v36, %v5257_v37 }
 0x61a   : > { %v4965_v59 = vmax.f32 %v4911_v5, 0.0  ;;  %5349 = vst [vmem:[%s7854_s15 + $0x118] sm:$0xff] %v5258_v60 }
 0x61c   : > { %6041 = vmatmul.msk.f32.gmra.mxu3 %vm833_vm1, %v4965_v59 }
 0x61d   : > { %v4798_v54 = vpop.f32.mrf.mxu2 }
 0x61e   : > { %v4854_v6 = vadd.f32 %v4798_v54, %v4402_v26 }
 0x61f   : > { %v5260_v62 = vpop.f32.mrf.mxu3 }
 0x620   : > { %v4912_v16 = vadd.f32 %v7989_v52, %v4854_v6  ;;  %v5261_v29 = vadd.f32 %v8144_v36, %v5260_v62 }
 0x622   : > { %v4966_v56 = vmax.f32 %v4912_v16, 0.0  ;;  %5350 = vst [vmem:[%s7854_s15 + $0x120] sm:$0xff] %v5261_v29 }
 0x624   : > { %6042 = vmatmul.msk.f32.gmra.mxu3 %vm833_vm1, %v4966_v56 }
 0x627   : > { %v5263_v41 = vpop.f32.mrf.mxu3 }
 0x628   : > { %v5264_v46 = vadd.f32 %v8144_v36, %v5263_v41 }
 0x62a   : > { %5351 = vst [vmem:[%s7854_s15 + $0x128] sm:$0xff] %v5264_v46 }
 0x62f   : > { %v5266_v0 = vpop.f32.mrf.mxu3 }
 0x630   : > { %v5267_v57 = vadd.f32 %v8144_v36, %v5266_v0 }
 0x632   : > { %5352 = vst [vmem:[%s7854_s15 + $0x130] sm:$0xff] %v5267_v57 }
 0x637   : > { %v5269_v35 = vpop.f32.mrf.mxu3 }
 0x638   : > { %v5270_v52 = vadd.f32 %v8144_v36, %v5269_v35 }
 0x63a   : > { %5353 = vst [vmem:[%s7854_s15 + $0x138] sm:$0xff] %v5270_v52 }
 0x63f   : > { %v5272_v2 = vpop.f32.mrf.mxu3 }
 0x640   : > { %v5273_v53 = vadd.f32 %v8144_v36, %v5272_v2 }
 0x642   : > { %5354 = vst [vmem:[%s7854_s15 + $0x140] sm:$0xff] %v5273_v53 }
 0x647   : > { %v5275_v11 = vpop.f32.mrf.mxu3 }
 0x648   : > { %v5276_v4 = vadd.f32 %v8144_v36, %v5275_v11 }
 0x64a   : > { %5355 = vst [vmem:[%s7854_s15 + $0x148] sm:$0xff] %v5276_v4 }
 0x64f   : > { %v5278_v8 = vpop.f32.mrf.mxu3 }
 0x650   : > { %v5279_v34 = vadd.f32 %v8144_v36, %v5278_v8 }
 0x652   : > { %5356 = vst [vmem:[%s7854_s15 + $0x150] sm:$0xff] %v5279_v34 }
 0x657   : > { %v5281_v17 = vpop.f32.mrf.mxu3 }
 0x658   : > { %v5282_v44 = vadd.f32 %v8144_v36, %v5281_v17 }
 0x65a   : > { %5357 = vst [vmem:[%s7854_s15 + $0x158] sm:$0xff] %v5282_v44 }
 0x65f   : > { %v5284_v45 = vpop.f32.mrf.mxu3 }
 0x660   : > { %v5285_v47 = vadd.f32 %v8144_v36, %v5284_v45 }
 0x662   : > { %5358 = vst [vmem:[%s7854_s15 + $0x160] sm:$0xff] %v5285_v47 }
 0x667   : > { %v5287_v19 = vpop.f32.mrf.mxu3 }
 0x668   : > { %v5288_v55 = vadd.f32 %v8144_v36, %v5287_v19 }
 0x66a   : > { %5359 = vst [vmem:[%s7854_s15 + $0x168] sm:$0xff] %v5288_v55 }
 0x66f   : > { %v5290_v23 = vpop.f32.mrf.mxu3 }
 0x670   : > { %v5291_v50 = vadd.f32 %v8144_v36, %v5290_v23 }
 0x672   : > { %5360 = vst [vmem:[%s7854_s15 + $0x170] sm:$0xff] %v5291_v50 }
 0x677   : > { %v5293_v28 = vpop.f32.mrf.mxu3 }
 0x678   : > { %v5294_v12 = vadd.f32 %v8144_v36, %v5293_v28 }
 0x67a   : > { %5361 = vst [vmem:[%s7854_s15 + $0x178] sm:$0xff] %v5294_v12 }
 0x67f   : > { %v5296_v1 = vpop.f32.mrf.mxu3 }
 0x680   : > { %v5297_v40 = vadd.f32 %v8144_v36, %v5296_v1 }
 0x682   : > { %5362 = vst [vmem:[%s7854_s15 + $0x180] sm:$0xff] %v5297_v40 }
 0x687   : > { %v5299_v58 = vpop.f32.mrf.mxu3 }
 0x688   : > { %v5300_v25 = vadd.f32 %v8144_v36, %v5299_v58 }
 0x68a   : > { %5363 = vst [vmem:[%s7854_s15 + $0x188] sm:$0xff] %v5300_v25 }
 0x68f   : > { %v5302_v32 = vpop.f32.mrf.mxu3 }
 0x690   : > { %v5303_v9 = vadd.f32 %v8144_v36, %v5302_v32 }
 0x692   : > { %5364 = vst [vmem:[%s7854_s15 + $0x190] sm:$0xff] %v5303_v9 }
 0x697   : > { %v5305_v20 = vpop.f32.mrf.mxu3 }
 0x698   : > { %v5306_v63 = vadd.f32 %v8144_v36, %v5305_v20 }
 0x69a   : > { %5365 = vst [vmem:[%s7854_s15 + $0x198] sm:$0xff] %v5306_v63 }
 0x69f   : > { %v5308_v22 = vpop.f32.mrf.mxu3 }
 0x6a0   : > { %v5309_v31 = vadd.f32 %v8144_v36, %v5308_v22 }
 0x6a2   : > { %5366 = vst [vmem:[%s7854_s15 + $0x1a0] sm:$0xff] %v5309_v31 }
 0x6a7   : > { %v5311_v15 = vpop.f32.mrf.mxu3 }
 0x6a8   : > { %v5312_v43 = vadd.f32 %v8144_v36, %v5311_v15 }
 0x6aa   : > { %5367 = vst [vmem:[%s7854_s15 + $0x1a8] sm:$0xff] %v5312_v43 }
 0x6ab PF: > { %s17_s24 = sadd.s32 1, %s6072_s24  }
 0x6ac   : > { %p14_p4 = scmp.ge.s32.totalorder %s17_s24, 4  }
 0x6ae   :  { %16 = sbr.rel (!%p14_p4) target bundleno = 1 (0x1), region = 86 }

</bundles_post_ra>
